<compile_context>
chip_gen: v6e
topology: v6e:2x2x1
jax: 0.10.0
libtpu: 0.0.40
codegen_flags: <defaults>
</compile_context>

<pallas_src>
import math
from types import SimpleNamespace

import numpy as np
import jax
import jax.numpy as jnp
from jax import lax
from jax.experimental import pallas as pl
from jax.experimental.pallas import tpu as pltpu


# ---------------------------------------------------------------------------
# Host-built constant selection matrices (tiny, passed as kernel inputs so no
# iota / integer-div work happens inside the kernel).
# ---------------------------------------------------------------------------
def _selection_constants(B, K):
    N = B * K
    sx = np.zeros((27, 9), np.float32)   # xrep[9m+3i+j] = xe[3i+m]
    st = np.zeros((27, 9), np.float32)   # trep[9m+3i+j] = tb[3m+j]
    r9 = np.zeros((9, 27), np.float32)   # xt[3i+j] = sum_m prod[9m+3i+j]
    for m in range(3):
        for i in range(3):
            for j in range(3):
                p = 9 * m + 3 * i + j
                sx[p, 3 * i + m] = 1.0
                st[p, 3 * m + j] = 1.0
                r9[3 * i + j, p] = 1.0
    sel_bn = (np.arange(N)[None, :] // K == np.arange(B)[:, None]).astype(np.float32)  # (B,N)
    oh_nk = (np.arange(N)[:, None] % K == np.arange(K)[None, :]).astype(np.float32)    # (N,K)
    oh_kn = np.ascontiguousarray(oh_nk.T)                                              # (K,N)
    return sx, st, r9, sel_bn, oh_nk, oh_kn


# ---------------------------------------------------------------------------
# Fused loss kernel
#   inputs : x_equi^T (9,N), y_equi^T (9,N), x_inv (1,N), y_inv (1,N), T^T (9,B)
#            + constant selectors SX(27,9), ST(27,9), R9(9,27),
#              sel_bn(B,N), onehot_nk(N,K), onehot_kn(K,N)
#   output : packed losses (1,128): [inv, memax, mse_equi, std, cov] in lanes 0..4
# ---------------------------------------------------------------------------
def _make_fused_loss_kernel(B, K, batch_size):
    N = B * K            # lane axis (column n = b*K + k)
    D = 10 * K           # full embedding size: K invariant + 9K equivariant feats
    LOG_K = math.log(float(K))
    inv_B = 1.0 / float(B)
    inv_Bm1 = 1.0 / float(B - 1)
    inv_9N = 1.0 / float(9 * N)
    inv_D = 1.0 / float(D)
    inv_bs1sq = 1.0 / float((batch_size - 1) ** 2)

    def kernel(xe_ref, ye_ref, xi_ref, yi_ref, t_ref,
               sx_ref, st_ref, r9_ref, selbn_ref, nk_ref, kn_ref, out_ref):
        f32 = jnp.float32
        dot = lambda a, b: jnp.dot(a, b, preferred_element_type=f32)

        xe = xe_ref[...]          # (9, N)  x pose components, row 3i+j
        ye = ye_ref[...]          # (9, N)
        xif = xi_ref[...]         # (1, N)  x_inv[b, k] at lane b*K + k
        yif = yi_ref[...]         # (1, N)
        t = t_ref[...]            # (9, B)  transform[b, m, j] at row 3m+j
        sx = sx_ref[...]          # (27, 9)
        st_sel = st_ref[...]      # (27, 9)
        r9 = r9_ref[...]          # (9, 27)
        sel_bn = selbn_ref[...]   # (B, N)  sample one-hot
        oh_nk = nk_ref[...]       # (N, K)  capsule one-hot
        oh_kn = kn_ref[...]       # (K, N)

        # --- broadcast per-sample transform along lanes (one tiny MXU op) ----
        tb = dot(t, sel_bn)                              # (9, N), row 3m+j

        # --- 3x3 pose transform: xt[3i+j] = sum_m xe[3i+m] * tb[3m+j] --------
        #     done as selection matmuls + ONE full-width multiply (no per-row FMAs)
        xrep = dot(sx, xe)                               # (27, N)
        trep = dot(st_sel, tb)                           # (27, N)
        xt = dot(r9, xrep * trep)                        # (9, N)

        xt_ssq = jnp.sum(xt * xt, axis=0, keepdims=True)     # Frobenius^2 per capsule
        xt_n = xt * lax.rsqrt(xt_ssq + 1e-12)                # normalize (eps guard)
        ye_ssq = jnp.sum(ye * ye, axis=0, keepdims=True)
        yn = ye * lax.rsqrt(ye_ssq + 1e-12)

        # --- equivariance MSE (mean over B * 9K elements) ---------------------
        diff = xt_n - yn
        mse = jnp.sum(diff * diff) * inv_9N

        # --- invariance loss: mean_b sum_k -y * log(x) ------------------------
        inv_loss = jnp.sum(-yif * jnp.log(jnp.maximum(xif, 1e-12))) * inv_B

        # --- per-view std / cov / memax ---------------------------------------
        def branch_stats(q_equi, q_inv):
            # per-feature (over batch) mean on small (rows, K) tiles
            me_pk = dot(q_equi, oh_nk) * inv_B           # (9, K)
            mi_pk = dot(q_inv, oh_nk) * inv_B            # (1, K)
            qec = q_equi - dot(me_pk, oh_kn)             # centered (9, N)
            qic = q_inv - dot(mi_pk, oh_kn)              # centered (1, N)
            # per-feature sum of squares (= covariance diagonal * (bs-1))
            sse_pk = dot(qec * qec, oh_nk)               # (9, K)
            ssi_pk = dot(qic * qic, oh_nk)               # (1, K)
            std_e = jnp.sqrt(sse_pk * inv_Bm1 + 1e-4)
            std_i = jnp.sqrt(ssi_pk * inv_Bm1 + 1e-4)
            std_term = (jnp.sum(jnp.maximum(1.0 - std_e, 0.0))
                        + jnp.sum(jnp.maximum(1.0 - std_i, 0.0))) * inv_D
            diag_sq = jnp.sum(sse_pk * sse_pk) + jnp.sum(ssi_pk * ssi_pk)
            # ||cov||_F^2 via the B x B Gram G = Ec Ec^T, accumulated on the MXU
            # from per-feature-row (B,K) slabs (standard / rhs-transposed dots only).
            g_blk = jnp.zeros((B, B), f32)
            for r in range(9):
                er = dot(sel_bn * qec[r:r + 1, :], oh_nk)        # (B, K)
                g_blk = g_blk + lax.dot_general(
                    er, er, (((1,), (1,)), ((), ())),
                    preferred_element_type=f32)
            ei = dot(sel_bn * qic, oh_nk)                        # (B, K)
            g_blk = g_blk + lax.dot_general(
                ei, ei, (((1,), (1,)), ((), ())),
                preferred_element_type=f32)
            gfro = jnp.sum(g_blk * g_blk)                        # ||G||_F^2
            cov_term = (gfro - diag_sq) * inv_bs1sq * inv_D
            # MEMAX: per-capsule batch average of the invariant probs
            memax = jnp.sum(mi_pk * jnp.log(jnp.maximum(mi_pk, 1e-12))) + LOG_K
            return std_term, cov_term, memax

        std_x, cov_x, memax_x = branch_stats(xt_n, xif)
        std_y, cov_y, memax_y = branch_stats(yn, yif)

        std_loss = 0.5 * std_x + 0.5 * std_y
        cov_loss = cov_x + cov_y
        memax_loss = memax_x + memax_y

        # --- pack the five scalars into one lane-dense row --------------------
        lane = lax.broadcasted_iota(jnp.int32, (1, 128), 1)
        packed = (jnp.where(lane == 0, inv_loss, 0.0)
                  + jnp.where(lane == 1, memax_loss, 0.0)
                  + jnp.where(lane == 2, mse, 0.0)
                  + jnp.where(lane == 3, std_loss, 0.0)
                  + jnp.where(lane == 4, cov_loss, 0.0))
        out_ref[...] = packed.astype(f32)

    return kernel


def fused_equicaps_losses(x_inv, y_inv, x_rot, y_rot, transform, batch_size):
    """Returns (repr_loss_inv, memax_loss, repr_loss_equi, std_loss, cov_loss)."""
    B, K = x_inv.shape
    N = B * K
    # TODO(synk): the producer (projector) could emit these lane-dense layouts
    # directly via transposed weights; the tiny host-side transposes stay here.
    xe_t = x_rot.reshape(N, 9).T.astype(jnp.float32)          # (9, N)
    ye_t = y_rot.reshape(N, 9).T.astype(jnp.float32)          # (9, N)
    xi_f = x_inv.reshape(1, N).astype(jnp.float32)            # (1, N)
    yi_f = y_inv.reshape(1, N).astype(jnp.float32)            # (1, N)
    t_t = transform.reshape(B, 9).T.astype(jnp.float32)       # (9, B)
    sx, st, r9, sel_bn, oh_nk, oh_kn = _selection_constants(B, K)

    vmem = pl.BlockSpec(memory_space=pltpu.MemorySpace.VMEM)  # whole-array blocks
    losses = pl.pallas_call(
        _make_fused_loss_kernel(B, K, batch_size),
        out_shape=jax.ShapeDtypeStruct((1, 128), jnp.float32),
        in_specs=[vmem] * 11,
        out_specs=vmem,
    )(xe_t, ye_t, xi_f, yi_f, t_t,
      jnp.asarray(sx), jnp.asarray(st), jnp.asarray(r9),
      jnp.asarray(sel_bn), jnp.asarray(oh_nk), jnp.asarray(oh_kn))
    return losses[0, 0], losses[0, 1], losses[0, 2], losses[0, 3], losses[0, 4]


# ---------------------------------------------------------------------------
# Plain-JAX glue: deterministic stand-ins for external sub-modules
# ---------------------------------------------------------------------------
def make_params(key, repr_size, K):
    k1, k2, k3 = jax.random.split(key, 3)
    return dict(
        w_bb=jax.random.normal(k1, (3, repr_size), jnp.float32) * 0.1,
        w_inv=jax.random.normal(k2, (repr_size, K), jnp.float32) * 0.1,
        w_equi=jax.random.normal(k3, (repr_size, K * 9), jnp.float32) * 0.1,
    )


def backbone_stub(x, params, res_out):
    # TODO(synk): real ResNet backbone (resnet.__dict__[args.arch]) is an external
    # module; replaced by a deterministic avg-pool + 1x1 channel-mix stand-in.
    B, C, H, W = x.shape
    s = H // res_out
    pooled = x.reshape(B, C, res_out, s, res_out, s).mean(axis=(3, 5))
    feat = jnp.einsum('bchw,cd->bdhw', pooled, params['w_bb'])
    return jax.nn.relu(feat)


def projector_stub(x_repr, params, K):
    # TODO(synk): real srcapsnet.CapsNetNoStem projector is an external module;
    # replaced by GAP + linear heads producing (positive activations, 3x3 poses).
    g = x_repr.mean(axis=(2, 3))
    inv = jax.nn.softmax(g @ params['w_inv'], axis=-1)           # (B, K), > 0
    equi = (g @ params['w_equi']).reshape(g.shape[0], K, 3, 3)   # (B, K, 3, 3)
    return inv, equi


def equicaps_forward(params, args, x_img, y_img, z_angles, transform_matrix, labels):
    K = int(args.mlp.split('-')[-1])
    res_out = args.resolution // 32

    x_repr = backbone_stub(x_img, params, res_out)
    y_repr = backbone_stub(y_img, params, res_out)
    x_inv, x_rot = projector_stub(x_repr, params, K)
    y_inv, y_rot = projector_stub(y_repr, params, K)

    # TODO(synk): OnlineEvaluatorCaps depends on srcapsnet.SelfRouting2d (not
    # provided); evaluator loss / stats are skipped.
    loss_eval, stats_eval = jnp.float32(0.0), {}
    # TODO(synk): std_losses / cor_metrics monitoring stats (torch.no_grad block) skipped.

    # Single fused Pallas kernel: inv + MEMAX + equivariance MSE + std + cov.
    # (AllReduce / FullGatherLayer are identities on a single device.)
    (repr_loss_inv, memax_loss, repr_loss_equi,
     std_loss, cov_loss) = fused_equicaps_losses(
        x_inv, y_inv, x_rot, y_rot, transform_matrix, args.batch_size)

    loss = (args.sim_coeff * repr_loss_inv
            + args.equi_factor * repr_loss_equi
            + args.std_coeff * std_loss
            + memax_loss
            + args.cov_coeff * cov_loss)

    stats = dict(repr_loss_inv=repr_loss_inv, repr_loss_equi=repr_loss_equi,
                 std_loss=std_loss, MEMAX_loss=memax_loss, cov_loss=cov_loss,
                 loss=loss)
    return loss, loss_eval, stats, stats_eval


if __name__ == "__main__":
    B = 8
    args = SimpleNamespace(resolution=64, arch="resnet_stub", mlp="512-512-16",
                           batch_size=B, sim_coeff=25.0, std_coeff=25.0,
                           cov_coeff=1.0, equi_factor=1.0)
    K = int(args.mlp.split('-')[-1])          # 16 capsules -> N = B*K = 128 lanes
    repr_size = 64

    key = jax.random.PRNGKey(0)
    kp, kx, ky, kz, kt, kl = jax.random.split(key, 6)
    params = make_params(kp, repr_size, K)

    x = jax.random.normal(kx, (B, 3, args.resolution, args.resolution), jnp.float32)
    y = jax.random.normal(ky, (B, 3, args.resolution, args.resolution), jnp.float32)
    z = jax.random.normal(kz, (2 * B, 4), jnp.float32)                   # angles
    t = jax.random.normal(kt, (B, 3, 3), jnp.float32)
    transform_matrix = t + 2.0 * jnp.eye(3, dtype=jnp.float32)[None]     # well-conditioned
    labels = jax.random.randint(kl, (B,), 0, 55)

    loss, loss_eval, stats, stats_eval = equicaps_forward(
        params, args, x, y, z, transform_matrix, labels)
    jax.block_until_ready(loss)
    print("KERNEL_OK")
</pallas_src>

<mosaic_0001>
module attributes {stable_mosaic.version = 11 : i64} {
  func.func @kernel(%arg0: memref<9x128xf32, #tpu.memory_space<vmem>>, %arg1: memref<9x128xf32, #tpu.memory_space<vmem>>, %arg2: memref<1x128xf32, #tpu.memory_space<vmem>>, %arg3: memref<1x128xf32, #tpu.memory_space<vmem>>, %arg4: memref<9x8xf32, #tpu.memory_space<vmem>>, %arg5: memref<27x9xf32, #tpu.memory_space<vmem>>, %arg6: memref<27x9xf32, #tpu.memory_space<vmem>>, %arg7: memref<9x27xf32, #tpu.memory_space<vmem>>, %arg8: memref<8x128xf32, #tpu.memory_space<vmem>>, %arg9: memref<128x16xf32, #tpu.memory_space<vmem>>, %arg10: memref<16x128xf32, #tpu.memory_space<vmem>>, %arg11: memref<1x128xf32, #tpu.memory_space<vmem>>) attributes {dimension_semantics = [], scalar_prefetch = 0 : i64, scratch_operands = 0 : i64, tpu.core_type = #tpu.core_type<tc>} {
    %c0 = arith.constant 0 : index
    %c0_0 = arith.constant 0 : index
    %0 = vector.load %arg0[%c0, %c0_0] : memref<9x128xf32, #tpu.memory_space<vmem>>, vector<9x128xf32>
    %c0_1 = arith.constant 0 : index
    %c0_2 = arith.constant 0 : index
    %1 = vector.load %arg1[%c0_1, %c0_2] : memref<9x128xf32, #tpu.memory_space<vmem>>, vector<9x128xf32>
    %c0_3 = arith.constant 0 : index
    %c0_4 = arith.constant 0 : index
    %2 = vector.load %arg2[%c0_3, %c0_4] : memref<1x128xf32, #tpu.memory_space<vmem>>, vector<1x128xf32>
    %c0_5 = arith.constant 0 : index
    %c0_6 = arith.constant 0 : index
    %3 = vector.load %arg3[%c0_5, %c0_6] : memref<1x128xf32, #tpu.memory_space<vmem>>, vector<1x128xf32>
    %c0_7 = arith.constant 0 : index
    %c0_8 = arith.constant 0 : index
    %4 = vector.load %arg4[%c0_7, %c0_8] : memref<9x8xf32, #tpu.memory_space<vmem>>, vector<9x8xf32>
    %c0_9 = arith.constant 0 : index
    %c0_10 = arith.constant 0 : index
    %5 = vector.load %arg5[%c0_9, %c0_10] : memref<27x9xf32, #tpu.memory_space<vmem>>, vector<27x9xf32>
    %c0_11 = arith.constant 0 : index
    %c0_12 = arith.constant 0 : index
    %6 = vector.load %arg6[%c0_11, %c0_12] : memref<27x9xf32, #tpu.memory_space<vmem>>, vector<27x9xf32>
    %c0_13 = arith.constant 0 : index
    %c0_14 = arith.constant 0 : index
    %7 = vector.load %arg7[%c0_13, %c0_14] : memref<9x27xf32, #tpu.memory_space<vmem>>, vector<9x27xf32>
    %c0_15 = arith.constant 0 : index
    %c0_16 = arith.constant 0 : index
    %8 = vector.load %arg8[%c0_15, %c0_16] : memref<8x128xf32, #tpu.memory_space<vmem>>, vector<8x128xf32>
    %c0_17 = arith.constant 0 : index
    %c0_18 = arith.constant 0 : index
    %9 = vector.load %arg9[%c0_17, %c0_18] : memref<128x16xf32, #tpu.memory_space<vmem>>, vector<128x16xf32>
    %c0_19 = arith.constant 0 : index
    %c0_20 = arith.constant 0 : index
    %10 = vector.load %arg10[%c0_19, %c0_20] : memref<16x128xf32, #tpu.memory_space<vmem>>, vector<16x128xf32>
    %cst = arith.constant dense<0.000000e+00> : vector<9x128xf32>
    %11 = tpu.matmul %4, %8, %cst {dimension_numbers = #tpu.dot_dimension_numbers<[1], [0], [0], [1], [0, 0, 1, 1], [], []>} : vector<9x8xf32>, vector<8x128xf32>, vector<9x128xf32> -> vector<9x128xf32>
    %cst_21 = arith.constant dense<0.000000e+00> : vector<27x128xf32>
    %12 = tpu.matmul %5, %0, %cst_21 {dimension_numbers = #tpu.dot_dimension_numbers<[1], [0], [0], [1], [0, 0, 1, 1], [], []>} : vector<27x9xf32>, vector<9x128xf32>, vector<27x128xf32> -> vector<27x128xf32>
    %cst_22 = arith.constant dense<0.000000e+00> : vector<27x128xf32>
    %13 = tpu.matmul %6, %11, %cst_22 {dimension_numbers = #tpu.dot_dimension_numbers<[1], [0], [0], [1], [0, 0, 1, 1], [], []>} : vector<27x9xf32>, vector<9x128xf32>, vector<27x128xf32> -> vector<27x128xf32>
    %14 = arith.mulf %12, %13 : vector<27x128xf32>
    %cst_23 = arith.constant dense<0.000000e+00> : vector<9x128xf32>
    %15 = tpu.matmul %7, %14, %cst_23 {dimension_numbers = #tpu.dot_dimension_numbers<[1], [0], [0], [1], [0, 0, 1, 1], [], []>} : vector<9x27xf32>, vector<27x128xf32>, vector<9x128xf32> -> vector<9x128xf32>
    %16 = arith.mulf %15, %15 : vector<9x128xf32>
    %cst_24 = arith.constant dense<0.000000e+00> : vector<128xf32>
    %17 = vector.multi_reduction <add>, %16, %cst_24 [0] : vector<9x128xf32> to vector<128xf32>
    %18 = vector.shape_cast %17 : vector<128xf32> to vector<1x128xf32>
    %cst_25 = arith.constant 9.99999996E-13 : f32
    %19 = vector.broadcast %cst_25 : f32 to vector<1x128xf32>
    %20 = arith.addf %18, %19 : vector<1x128xf32>
    %21 = math.rsqrt %20 : vector<1x128xf32>
    %22 = vector.broadcast %21 : vector<1x128xf32> to vector<9x128xf32>
    %23 = arith.mulf %15, %22 : vector<9x128xf32>
    %24 = arith.mulf %1, %1 : vector<9x128xf32>
    %cst_26 = arith.constant dense<0.000000e+00> : vector<128xf32>
    %25 = vector.multi_reduction <add>, %24, %cst_26 [0] : vector<9x128xf32> to vector<128xf32>
    %26 = vector.shape_cast %25 : vector<128xf32> to vector<1x128xf32>
    %cst_27 = arith.constant 9.99999996E-13 : f32
    %27 = vector.broadcast %cst_27 : f32 to vector<1x128xf32>
    %28 = arith.addf %26, %27 : vector<1x128xf32>
    %29 = math.rsqrt %28 : vector<1x128xf32>
    %30 = vector.broadcast %29 : vector<1x128xf32> to vector<9x128xf32>
    %31 = arith.mulf %1, %30 : vector<9x128xf32>
    %32 = arith.subf %23, %31 : vector<9x128xf32>
    %33 = arith.mulf %32, %32 : vector<9x128xf32>
    %34 = vector.shape_cast %33 : vector<9x128xf32> to vector<1x9x128xf32>
    %cst_28 = arith.constant dense<0.000000e+00> : vector<1xf32>
    %35 = vector.multi_reduction <add>, %34, %cst_28 [1, 2] : vector<1x9x128xf32> to vector<1xf32>
    %36 = vector.shape_cast %35 : vector<1xf32> to vector<1x1x1xf32>
    %37 = vector.extract %36[0, 0, 0] : f32 from vector<1x1x1xf32>
    %cst_29 = arith.constant 8.68055562E-4 : f32
    %38 = arith.mulf %37, %cst_29 : f32
    %cst_30 = arith.constant 0.000000e+00 : f32
    %39 = vector.broadcast %cst_30 : f32 to vector<1x128xf32>
    %40 = arith.subf %39, %3 : vector<1x128xf32>
    %cst_31 = arith.constant 9.99999996E-13 : f32
    %41 = vector.broadcast %cst_31 : f32 to vector<1x128xf32>
    %42 = arith.maximumf %2, %41 : vector<1x128xf32>
    %43 = math.log %42 : vector<1x128xf32>
    %44 = arith.mulf %40, %43 : vector<1x128xf32>
    %45 = vector.shape_cast %44 : vector<1x128xf32> to vector<1x1x128xf32>
    %cst_32 = arith.constant dense<0.000000e+00> : vector<1xf32>
    %46 = vector.multi_reduction <add>, %45, %cst_32 [1, 2] : vector<1x1x128xf32> to vector<1xf32>
    %47 = vector.shape_cast %46 : vector<1xf32> to vector<1x1x1xf32>
    %48 = vector.extract %47[0, 0, 0] : f32 from vector<1x1x1xf32>
    %cst_33 = arith.constant 1.250000e-01 : f32
    %49 = arith.mulf %48, %cst_33 : f32
    %cst_34 = arith.constant dense<0.000000e+00> : vector<9x16xf32>
    %50 = tpu.matmul %23, %9, %cst_34 {dimension_numbers = #tpu.dot_dimension_numbers<[1], [0], [0], [1], [0, 0, 1, 1], [], []>} : vector<9x128xf32>, vector<128x16xf32>, vector<9x16xf32> -> vector<9x16xf32>
    %cst_35 = arith.constant 1.250000e-01 : f32
    %51 = vector.broadcast %cst_35 : f32 to vector<9x16xf32>
    %52 = arith.mulf %50, %51 : vector<9x16xf32>
    %cst_36 = arith.constant dense<0.000000e+00> : vector<1x16xf32>
    %53 = tpu.matmul %2, %9, %cst_36 {dimension_numbers = #tpu.dot_dimension_numbers<[1], [0], [0], [1], [0, 0, 1, 1], [], []>} : vector<1x128xf32>, vector<128x16xf32>, vector<1x16xf32> -> vector<1x16xf32>
    %cst_37 = arith.constant 1.250000e-01 : f32
    %54 = vector.broadcast %cst_37 : f32 to vector<1x16xf32>
    %55 = arith.mulf %53, %54 : vector<1x16xf32>
    %cst_38 = arith.constant dense<0.000000e+00> : vector<9x128xf32>
    %56 = tpu.matmul %52, %10, %cst_38 {dimension_numbers = #tpu.dot_dimension_numbers<[1], [0], [0], [1], [0, 0, 1, 1], [], []>} : vector<9x16xf32>, vector<16x128xf32>, vector<9x128xf32> -> vector<9x128xf32>
    %57 = arith.subf %23, %56 : vector<9x128xf32>
    %cst_39 = arith.constant dense<0.000000e+00> : vector<1x128xf32>
    %58 = tpu.matmul %55, %10, %cst_39 {dimension_numbers = #tpu.dot_dimension_numbers<[1], [0], [0], [1], [0, 0, 1, 1], [], []>} : vector<1x16xf32>, vector<16x128xf32>, vector<1x128xf32> -> vector<1x128xf32>
    %59 = arith.subf %2, %58 : vector<1x128xf32>
    %60 = arith.mulf %57, %57 : vector<9x128xf32>
    %cst_40 = arith.constant dense<0.000000e+00> : vector<9x16xf32>
    %61 = tpu.matmul %60, %9, %cst_40 {dimension_numbers = #tpu.dot_dimension_numbers<[1], [0], [0], [1], [0, 0, 1, 1], [], []>} : vector<9x128xf32>, vector<128x16xf32>, vector<9x16xf32> -> vector<9x16xf32>
    %62 = arith.mulf %59, %59 : vector<1x128xf32>
    %cst_41 = arith.constant dense<0.000000e+00> : vector<1x16xf32>
    %63 = tpu.matmul %62, %9, %cst_41 {dimension_numbers = #tpu.dot_dimension_numbers<[1], [0], [0], [1], [0, 0, 1, 1], [], []>} : vector<1x128xf32>, vector<128x16xf32>, vector<1x16xf32> -> vector<1x16xf32>
    %cst_42 = arith.constant 0.142857149 : f32
    %64 = vector.broadcast %cst_42 : f32 to vector<9x16xf32>
    %65 = arith.mulf %61, %64 : vector<9x16xf32>
    %cst_43 = arith.constant 9.99999974E-5 : f32
    %66 = vector.broadcast %cst_43 : f32 to vector<9x16xf32>
    %67 = arith.addf %65, %66 : vector<9x16xf32>
    %68 = math.sqrt %67 : vector<9x16xf32>
    %cst_44 = arith.constant 0.142857149 : f32
    %69 = vector.broadcast %cst_44 : f32 to vector<1x16xf32>
    %70 = arith.mulf %63, %69 : vector<1x16xf32>
    %cst_45 = arith.constant 9.99999974E-5 : f32
    %71 = vector.broadcast %cst_45 : f32 to vector<1x16xf32>
    %72 = arith.addf %70, %71 : vector<1x16xf32>
    %73 = math.sqrt %72 : vector<1x16xf32>
    %cst_46 = arith.constant 1.000000e+00 : f32
    %74 = vector.broadcast %cst_46 : f32 to vector<9x16xf32>
    %75 = arith.subf %74, %68 : vector<9x16xf32>
    %cst_47 = arith.constant 0.000000e+00 : f32
    %76 = vector.broadcast %cst_47 : f32 to vector<9x16xf32>
    %77 = arith.maximumf %75, %76 : vector<9x16xf32>
    %78 = vector.shape_cast %77 : vector<9x16xf32> to vector<1x9x16xf32>
    %cst_48 = arith.constant dense<0.000000e+00> : vector<1xf32>
    %79 = vector.multi_reduction <add>, %78, %cst_48 [1, 2] : vector<1x9x16xf32> to vector<1xf32>
    %80 = vector.shape_cast %79 : vector<1xf32> to vector<1x1x1xf32>
    %81 = vector.extract %80[0, 0, 0] : f32 from vector<1x1x1xf32>
    %cst_49 = arith.constant 1.000000e+00 : f32
    %82 = vector.broadcast %cst_49 : f32 to vector<1x16xf32>
    %83 = arith.subf %82, %73 : vector<1x16xf32>
    %cst_50 = arith.constant 0.000000e+00 : f32
    %84 = vector.broadcast %cst_50 : f32 to vector<1x16xf32>
    %85 = arith.maximumf %83, %84 : vector<1x16xf32>
    %86 = vector.shape_cast %85 : vector<1x16xf32> to vector<1x1x16xf32>
    %cst_51 = arith.constant dense<0.000000e+00> : vector<1xf32>
    %87 = vector.multi_reduction <add>, %86, %cst_51 [1, 2] : vector<1x1x16xf32> to vector<1xf32>
    %88 = vector.shape_cast %87 : vector<1xf32> to vector<1x1x1xf32>
    %89 = vector.extract %88[0, 0, 0] : f32 from vector<1x1x1xf32>
    %90 = arith.addf %81, %89 : f32
    %cst_52 = arith.constant 6.250000e-03 : f32
    %91 = arith.mulf %90, %cst_52 : f32
    %92 = arith.mulf %61, %61 : vector<9x16xf32>
    %93 = vector.shape_cast %92 : vector<9x16xf32> to vector<1x9x16xf32>
    %cst_53 = arith.constant dense<0.000000e+00> : vector<1xf32>
    %94 = vector.multi_reduction <add>, %93, %cst_53 [1, 2] : vector<1x9x16xf32> to vector<1xf32>
    %95 = vector.shape_cast %94 : vector<1xf32> to vector<1x1x1xf32>
    %96 = vector.extract %95[0, 0, 0] : f32 from vector<1x1x1xf32>
    %97 = arith.mulf %63, %63 : vector<1x16xf32>
    %98 = vector.shape_cast %97 : vector<1x16xf32> to vector<1x1x16xf32>
    %cst_54 = arith.constant dense<0.000000e+00> : vector<1xf32>
    %99 = vector.multi_reduction <add>, %98, %cst_54 [1, 2] : vector<1x1x16xf32> to vector<1xf32>
    %100 = vector.shape_cast %99 : vector<1xf32> to vector<1x1x1xf32>
    %101 = vector.extract %100[0, 0, 0] : f32 from vector<1x1x1xf32>
    %102 = arith.addf %96, %101 : f32
    %cst_55 = arith.constant 0.000000e+00 : f32
    %103 = vector.broadcast %cst_55 : f32 to vector<8x8xf32>
    %104 = vector.extract_strided_slice %57 {offsets = [0, 0], sizes = [1, 128], strides = [1, 1]} : vector<9x128xf32> to vector<1x128xf32>
    %105 = vector.broadcast %104 : vector<1x128xf32> to vector<8x128xf32>
    %106 = arith.mulf %8, %105 : vector<8x128xf32>
    %cst_56 = arith.constant dense<0.000000e+00> : vector<8x16xf32>
    %107 = tpu.matmul %106, %9, %cst_56 {dimension_numbers = #tpu.dot_dimension_numbers<[1], [0], [0], [1], [0, 0, 1, 1], [], []>} : vector<8x128xf32>, vector<128x16xf32>, vector<8x16xf32> -> vector<8x16xf32>
    %cst_57 = arith.constant dense<0.000000e+00> : vector<8x8xf32>
    %108 = tpu.matmul %107, %107, %cst_57 {dimension_numbers = #tpu.dot_dimension_numbers<[1], [1], [0], [0], [0, 0, 1, 0], [], []>} : vector<8x16xf32>, vector<8x16xf32>, vector<8x8xf32> -> vector<8x8xf32>
    %109 = arith.addf %103, %108 : vector<8x8xf32>
    %110 = vector.extract_strided_slice %57 {offsets = [1, 0], sizes = [1, 128], strides = [1, 1]} : vector<9x128xf32> to vector<1x128xf32>
    %111 = vector.broadcast %110 : vector<1x128xf32> to vector<8x128xf32>
    %112 = arith.mulf %8, %111 : vector<8x128xf32>
    %cst_58 = arith.constant dense<0.000000e+00> : vector<8x16xf32>
    %113 = tpu.matmul %112, %9, %cst_58 {dimension_numbers = #tpu.dot_dimension_numbers<[1], [0], [0], [1], [0, 0, 1, 1], [], []>} : vector<8x128xf32>, vector<128x16xf32>, vector<8x16xf32> -> vector<8x16xf32>
    %cst_59 = arith.constant dense<0.000000e+00> : vector<8x8xf32>
    %114 = tpu.matmul %113, %113, %cst_59 {dimension_numbers = #tpu.dot_dimension_numbers<[1], [1], [0], [0], [0, 0, 1, 0], [], []>} : vector<8x16xf32>, vector<8x16xf32>, vector<8x8xf32> -> vector<8x8xf32>
    %115 = arith.addf %109, %114 : vector<8x8xf32>
    %116 = vector.extract_strided_slice %57 {offsets = [2, 0], sizes = [1, 128], strides = [1, 1]} : vector<9x128xf32> to vector<1x128xf32>
    %117 = vector.broadcast %116 : vector<1x128xf32> to vector<8x128xf32>
    %118 = arith.mulf %8, %117 : vector<8x128xf32>
    %cst_60 = arith.constant dense<0.000000e+00> : vector<8x16xf32>
    %119 = tpu.matmul %118, %9, %cst_60 {dimension_numbers = #tpu.dot_dimension_numbers<[1], [0], [0], [1], [0, 0, 1, 1], [], []>} : vector<8x128xf32>, vector<128x16xf32>, vector<8x16xf32> -> vector<8x16xf32>
    %cst_61 = arith.constant dense<0.000000e+00> : vector<8x8xf32>
    %120 = tpu.matmul %119, %119, %cst_61 {dimension_numbers = #tpu.dot_dimension_numbers<[1], [1], [0], [0], [0, 0, 1, 0], [], []>} : vector<8x16xf32>, vector<8x16xf32>, vector<8x8xf32> -> vector<8x8xf32>
    %121 = arith.addf %115, %120 : vector<8x8xf32>
    %122 = vector.extract_strided_slice %57 {offsets = [3, 0], sizes = [1, 128], strides = [1, 1]} : vector<9x128xf32> to vector<1x128xf32>
    %123 = vector.broadcast %122 : vector<1x128xf32> to vector<8x128xf32>
    %124 = arith.mulf %8, %123 : vector<8x128xf32>
    %cst_62 = arith.constant dense<0.000000e+00> : vector<8x16xf32>
    %125 = tpu.matmul %124, %9, %cst_62 {dimension_numbers = #tpu.dot_dimension_numbers<[1], [0], [0], [1], [0, 0, 1, 1], [], []>} : vector<8x128xf32>, vector<128x16xf32>, vector<8x16xf32> -> vector<8x16xf32>
    %cst_63 = arith.constant dense<0.000000e+00> : vector<8x8xf32>
    %126 = tpu.matmul %125, %125, %cst_63 {dimension_numbers = #tpu.dot_dimension_numbers<[1], [1], [0], [0], [0, 0, 1, 0], [], []>} : vector<8x16xf32>, vector<8x16xf32>, vector<8x8xf32> -> vector<8x8xf32>
    %127 = arith.addf %121, %126 : vector<8x8xf32>
    %128 = vector.extract_strided_slice %57 {offsets = [4, 0], sizes = [1, 128], strides = [1, 1]} : vector<9x128xf32> to vector<1x128xf32>
    %129 = vector.broadcast %128 : vector<1x128xf32> to vector<8x128xf32>
    %130 = arith.mulf %8, %129 : vector<8x128xf32>
    %cst_64 = arith.constant dense<0.000000e+00> : vector<8x16xf32>
    %131 = tpu.matmul %130, %9, %cst_64 {dimension_numbers = #tpu.dot_dimension_numbers<[1], [0], [0], [1], [0, 0, 1, 1], [], []>} : vector<8x128xf32>, vector<128x16xf32>, vector<8x16xf32> -> vector<8x16xf32>
    %cst_65 = arith.constant dense<0.000000e+00> : vector<8x8xf32>
    %132 = tpu.matmul %131, %131, %cst_65 {dimension_numbers = #tpu.dot_dimension_numbers<[1], [1], [0], [0], [0, 0, 1, 0], [], []>} : vector<8x16xf32>, vector<8x16xf32>, vector<8x8xf32> -> vector<8x8xf32>
    %133 = arith.addf %127, %132 : vector<8x8xf32>
    %134 = vector.extract_strided_slice %57 {offsets = [5, 0], sizes = [1, 128], strides = [1, 1]} : vector<9x128xf32> to vector<1x128xf32>
    %135 = vector.broadcast %134 : vector<1x128xf32> to vector<8x128xf32>
    %136 = arith.mulf %8, %135 : vector<8x128xf32>
    %cst_66 = arith.constant dense<0.000000e+00> : vector<8x16xf32>
    %137 = tpu.matmul %136, %9, %cst_66 {dimension_numbers = #tpu.dot_dimension_numbers<[1], [0], [0], [1], [0, 0, 1, 1], [], []>} : vector<8x128xf32>, vector<128x16xf32>, vector<8x16xf32> -> vector<8x16xf32>
    %cst_67 = arith.constant dense<0.000000e+00> : vector<8x8xf32>
    %138 = tpu.matmul %137, %137, %cst_67 {dimension_numbers = #tpu.dot_dimension_numbers<[1], [1], [0], [0], [0, 0, 1, 0], [], []>} : vector<8x16xf32>, vector<8x16xf32>, vector<8x8xf32> -> vector<8x8xf32>
    %139 = arith.addf %133, %138 : vector<8x8xf32>
    %140 = vector.extract_strided_slice %57 {offsets = [6, 0], sizes = [1, 128], strides = [1, 1]} : vector<9x128xf32> to vector<1x128xf32>
    %141 = vector.broadcast %140 : vector<1x128xf32> to vector<8x128xf32>
    %142 = arith.mulf %8, %141 : vector<8x128xf32>
    %cst_68 = arith.constant dense<0.000000e+00> : vector<8x16xf32>
    %143 = tpu.matmul %142, %9, %cst_68 {dimension_numbers = #tpu.dot_dimension_numbers<[1], [0], [0], [1], [0, 0, 1, 1], [], []>} : vector<8x128xf32>, vector<128x16xf32>, vector<8x16xf32> -> vector<8x16xf32>
    %cst_69 = arith.constant dense<0.000000e+00> : vector<8x8xf32>
    %144 = tpu.matmul %143, %143, %cst_69 {dimension_numbers = #tpu.dot_dimension_numbers<[1], [1], [0], [0], [0, 0, 1, 0], [], []>} : vector<8x16xf32>, vector<8x16xf32>, vector<8x8xf32> -> vector<8x8xf32>
    %145 = arith.addf %139, %144 : vector<8x8xf32>
    %146 = vector.extract_strided_slice %57 {offsets = [7, 0], sizes = [1, 128], strides = [1, 1]} : vector<9x128xf32> to vector<1x128xf32>
    %147 = vector.broadcast %146 : vector<1x128xf32> to vector<8x128xf32>
    %148 = arith.mulf %8, %147 : vector<8x128xf32>
    %cst_70 = arith.constant dense<0.000000e+00> : vector<8x16xf32>
    %149 = tpu.matmul %148, %9, %cst_70 {dimension_numbers = #tpu.dot_dimension_numbers<[1], [0], [0], [1], [0, 0, 1, 1], [], []>} : vector<8x128xf32>, vector<128x16xf32>, vector<8x16xf32> -> vector<8x16xf32>
    %cst_71 = arith.constant dense<0.000000e+00> : vector<8x8xf32>
    %150 = tpu.matmul %149, %149, %cst_71 {dimension_numbers = #tpu.dot_dimension_numbers<[1], [1], [0], [0], [0, 0, 1, 0], [], []>} : vector<8x16xf32>, vector<8x16xf32>, vector<8x8xf32> -> vector<8x8xf32>
    %151 = arith.addf %145, %150 : vector<8x8xf32>
    %152 = vector.extract_strided_slice %57 {offsets = [8, 0], sizes = [1, 128], strides = [1, 1]} : vector<9x128xf32> to vector<1x128xf32>
    %153 = vector.broadcast %152 : vector<1x128xf32> to vector<8x128xf32>
    %154 = arith.mulf %8, %153 : vector<8x128xf32>
    %cst_72 = arith.constant dense<0.000000e+00> : vector<8x16xf32>
    %155 = tpu.matmul %154, %9, %cst_72 {dimension_numbers = #tpu.dot_dimension_numbers<[1], [0], [0], [1], [0, 0, 1, 1], [], []>} : vector<8x128xf32>, vector<128x16xf32>, vector<8x16xf32> -> vector<8x16xf32>
    %cst_73 = arith.constant dense<0.000000e+00> : vector<8x8xf32>
    %156 = tpu.matmul %155, %155, %cst_73 {dimension_numbers = #tpu.dot_dimension_numbers<[1], [1], [0], [0], [0, 0, 1, 0], [], []>} : vector<8x16xf32>, vector<8x16xf32>, vector<8x8xf32> -> vector<8x8xf32>
    %157 = arith.addf %151, %156 : vector<8x8xf32>
    %158 = vector.broadcast %59 : vector<1x128xf32> to vector<8x128xf32>
    %159 = arith.mulf %8, %158 : vector<8x128xf32>
    %cst_74 = arith.constant dense<0.000000e+00> : vector<8x16xf32>
    %160 = tpu.matmul %159, %9, %cst_74 {dimension_numbers = #tpu.dot_dimension_numbers<[1], [0], [0], [1], [0, 0, 1, 1], [], []>} : vector<8x128xf32>, vector<128x16xf32>, vector<8x16xf32> -> vector<8x16xf32>
    %cst_75 = arith.constant dense<0.000000e+00> : vector<8x8xf32>
    %161 = tpu.matmul %160, %160, %cst_75 {dimension_numbers = #tpu.dot_dimension_numbers<[1], [1], [0], [0], [0, 0, 1, 0], [], []>} : vector<8x16xf32>, vector<8x16xf32>, vector<8x8xf32> -> vector<8x8xf32>
    %162 = arith.addf %157, %161 : vector<8x8xf32>
    %163 = arith.mulf %162, %162 : vector<8x8xf32>
    %164 = vector.shape_cast %163 : vector<8x8xf32> to vector<1x8x8xf32>
    %cst_76 = arith.constant dense<0.000000e+00> : vector<1xf32>
    %165 = vector.multi_reduction <add>, %164, %cst_76 [1, 2] : vector<1x8x8xf32> to vector<1xf32>
    %166 = vector.shape_cast %165 : vector<1xf32> to vector<1x1x1xf32>
    %167 = vector.extract %166[0, 0, 0] : f32 from vector<1x1x1xf32>
    %168 = arith.subf %167, %102 : f32
    %cst_77 = arith.constant 0.0204081628 : f32
    %169 = arith.mulf %168, %cst_77 : f32
    %cst_78 = arith.constant 6.250000e-03 : f32
    %170 = arith.mulf %169, %cst_78 : f32
    %cst_79 = arith.constant 9.99999996E-13 : f32
    %171 = vector.broadcast %cst_79 : f32 to vector<1x16xf32>
    %172 = arith.maximumf %55, %171 : vector<1x16xf32>
    %173 = math.log %172 : vector<1x16xf32>
    %174 = arith.mulf %55, %173 : vector<1x16xf32>
    %175 = vector.shape_cast %174 : vector<1x16xf32> to vector<1x1x16xf32>
    %cst_80 = arith.constant dense<0.000000e+00> : vector<1xf32>
    %176 = vector.multi_reduction <add>, %175, %cst_80 [1, 2] : vector<1x1x16xf32> to vector<1xf32>
    %177 = vector.shape_cast %176 : vector<1xf32> to vector<1x1x1xf32>
    %178 = vector.extract %177[0, 0, 0] : f32 from vector<1x1x1xf32>
    %cst_81 = arith.constant 2.77258873 : f32
    %179 = arith.addf %178, %cst_81 : f32
    %cst_82 = arith.constant dense<0.000000e+00> : vector<9x16xf32>
    %180 = tpu.matmul %31, %9, %cst_82 {dimension_numbers = #tpu.dot_dimension_numbers<[1], [0], [0], [1], [0, 0, 1, 1], [], []>} : vector<9x128xf32>, vector<128x16xf32>, vector<9x16xf32> -> vector<9x16xf32>
    %cst_83 = arith.constant 1.250000e-01 : f32
    %181 = vector.broadcast %cst_83 : f32 to vector<9x16xf32>
    %182 = arith.mulf %180, %181 : vector<9x16xf32>
    %cst_84 = arith.constant dense<0.000000e+00> : vector<1x16xf32>
    %183 = tpu.matmul %3, %9, %cst_84 {dimension_numbers = #tpu.dot_dimension_numbers<[1], [0], [0], [1], [0, 0, 1, 1], [], []>} : vector<1x128xf32>, vector<128x16xf32>, vector<1x16xf32> -> vector<1x16xf32>
    %cst_85 = arith.constant 1.250000e-01 : f32
    %184 = vector.broadcast %cst_85 : f32 to vector<1x16xf32>
    %185 = arith.mulf %183, %184 : vector<1x16xf32>
    %cst_86 = arith.constant dense<0.000000e+00> : vector<9x128xf32>
    %186 = tpu.matmul %182, %10, %cst_86 {dimension_numbers = #tpu.dot_dimension_numbers<[1], [0], [0], [1], [0, 0, 1, 1], [], []>} : vector<9x16xf32>, vector<16x128xf32>, vector<9x128xf32> -> vector<9x128xf32>
    %187 = arith.subf %31, %186 : vector<9x128xf32>
    %cst_87 = arith.constant dense<0.000000e+00> : vector<1x128xf32>
    %188 = tpu.matmul %185, %10, %cst_87 {dimension_numbers = #tpu.dot_dimension_numbers<[1], [0], [0], [1], [0, 0, 1, 1], [], []>} : vector<1x16xf32>, vector<16x128xf32>, vector<1x128xf32> -> vector<1x128xf32>
    %189 = arith.subf %3, %188 : vector<1x128xf32>
    %190 = arith.mulf %187, %187 : vector<9x128xf32>
    %cst_88 = arith.constant dense<0.000000e+00> : vector<9x16xf32>
    %191 = tpu.matmul %190, %9, %cst_88 {dimension_numbers = #tpu.dot_dimension_numbers<[1], [0], [0], [1], [0, 0, 1, 1], [], []>} : vector<9x128xf32>, vector<128x16xf32>, vector<9x16xf32> -> vector<9x16xf32>
    %192 = arith.mulf %189, %189 : vector<1x128xf32>
    %cst_89 = arith.constant dense<0.000000e+00> : vector<1x16xf32>
    %193 = tpu.matmul %192, %9, %cst_89 {dimension_numbers = #tpu.dot_dimension_numbers<[1], [0], [0], [1], [0, 0, 1, 1], [], []>} : vector<1x128xf32>, vector<128x16xf32>, vector<1x16xf32> -> vector<1x16xf32>
    %cst_90 = arith.constant 0.142857149 : f32
    %194 = vector.broadcast %cst_90 : f32 to vector<9x16xf32>
    %195 = arith.mulf %191, %194 : vector<9x16xf32>
    %cst_91 = arith.constant 9.99999974E-5 : f32
    %196 = vector.broadcast %cst_91 : f32 to vector<9x16xf32>
    %197 = arith.addf %195, %196 : vector<9x16xf32>
    %198 = math.sqrt %197 : vector<9x16xf32>
    %cst_92 = arith.constant 0.142857149 : f32
    %199 = vector.broadcast %cst_92 : f32 to vector<1x16xf32>
    %200 = arith.mulf %193, %199 : vector<1x16xf32>
    %cst_93 = arith.constant 9.99999974E-5 : f32
    %201 = vector.broadcast %cst_93 : f32 to vector<1x16xf32>
    %202 = arith.addf %200, %201 : vector<1x16xf32>
    %203 = math.sqrt %202 : vector<1x16xf32>
    %cst_94 = arith.constant 1.000000e+00 : f32
    %204 = vector.broadcast %cst_94 : f32 to vector<9x16xf32>
    %205 = arith.subf %204, %198 : vector<9x16xf32>
    %cst_95 = arith.constant 0.000000e+00 : f32
    %206 = vector.broadcast %cst_95 : f32 to vector<9x16xf32>
    %207 = arith.maximumf %205, %206 : vector<9x16xf32>
    %208 = vector.shape_cast %207 : vector<9x16xf32> to vector<1x9x16xf32>
    %cst_96 = arith.constant dense<0.000000e+00> : vector<1xf32>
    %209 = vector.multi_reduction <add>, %208, %cst_96 [1, 2] : vector<1x9x16xf32> to vector<1xf32>
    %210 = vector.shape_cast %209 : vector<1xf32> to vector<1x1x1xf32>
    %211 = vector.extract %210[0, 0, 0] : f32 from vector<1x1x1xf32>
    %cst_97 = arith.constant 1.000000e+00 : f32
    %212 = vector.broadcast %cst_97 : f32 to vector<1x16xf32>
    %213 = arith.subf %212, %203 : vector<1x16xf32>
    %cst_98 = arith.constant 0.000000e+00 : f32
    %214 = vector.broadcast %cst_98 : f32 to vector<1x16xf32>
    %215 = arith.maximumf %213, %214 : vector<1x16xf32>
    %216 = vector.shape_cast %215 : vector<1x16xf32> to vector<1x1x16xf32>
    %cst_99 = arith.constant dense<0.000000e+00> : vector<1xf32>
    %217 = vector.multi_reduction <add>, %216, %cst_99 [1, 2] : vector<1x1x16xf32> to vector<1xf32>
    %218 = vector.shape_cast %217 : vector<1xf32> to vector<1x1x1xf32>
    %219 = vector.extract %218[0, 0, 0] : f32 from vector<1x1x1xf32>
    %220 = arith.addf %211, %219 : f32
    %cst_100 = arith.constant 6.250000e-03 : f32
    %221 = arith.mulf %220, %cst_100 : f32
    %222 = arith.mulf %191, %191 : vector<9x16xf32>
    %223 = vector.shape_cast %222 : vector<9x16xf32> to vector<1x9x16xf32>
    %cst_101 = arith.constant dense<0.000000e+00> : vector<1xf32>
    %224 = vector.multi_reduction <add>, %223, %cst_101 [1, 2] : vector<1x9x16xf32> to vector<1xf32>
    %225 = vector.shape_cast %224 : vector<1xf32> to vector<1x1x1xf32>
    %226 = vector.extract %225[0, 0, 0] : f32 from vector<1x1x1xf32>
    %227 = arith.mulf %193, %193 : vector<1x16xf32>
    %228 = vector.shape_cast %227 : vector<1x16xf32> to vector<1x1x16xf32>
    %cst_102 = arith.constant dense<0.000000e+00> : vector<1xf32>
    %229 = vector.multi_reduction <add>, %228, %cst_102 [1, 2] : vector<1x1x16xf32> to vector<1xf32>
    %230 = vector.shape_cast %229 : vector<1xf32> to vector<1x1x1xf32>
    %231 = vector.extract %230[0, 0, 0] : f32 from vector<1x1x1xf32>
    %232 = arith.addf %226, %231 : f32
    %cst_103 = arith.constant 0.000000e+00 : f32
    %233 = vector.broadcast %cst_103 : f32 to vector<8x8xf32>
    %234 = vector.extract_strided_slice %187 {offsets = [0, 0], sizes = [1, 128], strides = [1, 1]} : vector<9x128xf32> to vector<1x128xf32>
    %235 = vector.broadcast %234 : vector<1x128xf32> to vector<8x128xf32>
    %236 = arith.mulf %8, %235 : vector<8x128xf32>
    %cst_104 = arith.constant dense<0.000000e+00> : vector<8x16xf32>
    %237 = tpu.matmul %236, %9, %cst_104 {dimension_numbers = #tpu.dot_dimension_numbers<[1], [0], [0], [1], [0, 0, 1, 1], [], []>} : vector<8x128xf32>, vector<128x16xf32>, vector<8x16xf32> -> vector<8x16xf32>
    %cst_105 = arith.constant dense<0.000000e+00> : vector<8x8xf32>
    %238 = tpu.matmul %237, %237, %cst_105 {dimension_numbers = #tpu.dot_dimension_numbers<[1], [1], [0], [0], [0, 0, 1, 0], [], []>} : vector<8x16xf32>, vector<8x16xf32>, vector<8x8xf32> -> vector<8x8xf32>
    %239 = arith.addf %233, %238 : vector<8x8xf32>
    %240 = vector.extract_strided_slice %187 {offsets = [1, 0], sizes = [1, 128], strides = [1, 1]} : vector<9x128xf32> to vector<1x128xf32>
    %241 = vector.broadcast %240 : vector<1x128xf32> to vector<8x128xf32>
    %242 = arith.mulf %8, %241 : vector<8x128xf32>
    %cst_106 = arith.constant dense<0.000000e+00> : vector<8x16xf32>
    %243 = tpu.matmul %242, %9, %cst_106 {dimension_numbers = #tpu.dot_dimension_numbers<[1], [0], [0], [1], [0, 0, 1, 1], [], []>} : vector<8x128xf32>, vector<128x16xf32>, vector<8x16xf32> -> vector<8x16xf32>
    %cst_107 = arith.constant dense<0.000000e+00> : vector<8x8xf32>
    %244 = tpu.matmul %243, %243, %cst_107 {dimension_numbers = #tpu.dot_dimension_numbers<[1], [1], [0], [0], [0, 0, 1, 0], [], []>} : vector<8x16xf32>, vector<8x16xf32>, vector<8x8xf32> -> vector<8x8xf32>
    %245 = arith.addf %239, %244 : vector<8x8xf32>
    %246 = vector.extract_strided_slice %187 {offsets = [2, 0], sizes = [1, 128], strides = [1, 1]} : vector<9x128xf32> to vector<1x128xf32>
    %247 = vector.broadcast %246 : vector<1x128xf32> to vector<8x128xf32>
    %248 = arith.mulf %8, %247 : vector<8x128xf32>
    %cst_108 = arith.constant dense<0.000000e+00> : vector<8x16xf32>
    %249 = tpu.matmul %248, %9, %cst_108 {dimension_numbers = #tpu.dot_dimension_numbers<[1], [0], [0], [1], [0, 0, 1, 1], [], []>} : vector<8x128xf32>, vector<128x16xf32>, vector<8x16xf32> -> vector<8x16xf32>
    %cst_109 = arith.constant dense<0.000000e+00> : vector<8x8xf32>
    %250 = tpu.matmul %249, %249, %cst_109 {dimension_numbers = #tpu.dot_dimension_numbers<[1], [1], [0], [0], [0, 0, 1, 0], [], []>} : vector<8x16xf32>, vector<8x16xf32>, vector<8x8xf32> -> vector<8x8xf32>
    %251 = arith.addf %245, %250 : vector<8x8xf32>
    %252 = vector.extract_strided_slice %187 {offsets = [3, 0], sizes = [1, 128], strides = [1, 1]} : vector<9x128xf32> to vector<1x128xf32>
    %253 = vector.broadcast %252 : vector<1x128xf32> to vector<8x128xf32>
    %254 = arith.mulf %8, %253 : vector<8x128xf32>
    %cst_110 = arith.constant dense<0.000000e+00> : vector<8x16xf32>
    %255 = tpu.matmul %254, %9, %cst_110 {dimension_numbers = #tpu.dot_dimension_numbers<[1], [0], [0], [1], [0, 0, 1, 1], [], []>} : vector<8x128xf32>, vector<128x16xf32>, vector<8x16xf32> -> vector<8x16xf32>
    %cst_111 = arith.constant dense<0.000000e+00> : vector<8x8xf32>
    %256 = tpu.matmul %255, %255, %cst_111 {dimension_numbers = #tpu.dot_dimension_numbers<[1], [1], [0], [0], [0, 0, 1, 0], [], []>} : vector<8x16xf32>, vector<8x16xf32>, vector<8x8xf32> -> vector<8x8xf32>
    %257 = arith.addf %251, %256 : vector<8x8xf32>
    %258 = vector.extract_strided_slice %187 {offsets = [4, 0], sizes = [1, 128], strides = [1, 1]} : vector<9x128xf32> to vector<1x128xf32>
    %259 = vector.broadcast %258 : vector<1x128xf32> to vector<8x128xf32>
    %260 = arith.mulf %8, %259 : vector<8x128xf32>
    %cst_112 = arith.constant dense<0.000000e+00> : vector<8x16xf32>
    %261 = tpu.matmul %260, %9, %cst_112 {dimension_numbers = #tpu.dot_dimension_numbers<[1], [0], [0], [1], [0, 0, 1, 1], [], []>} : vector<8x128xf32>, vector<128x16xf32>, vector<8x16xf32> -> vector<8x16xf32>
    %cst_113 = arith.constant dense<0.000000e+00> : vector<8x8xf32>
    %262 = tpu.matmul %261, %261, %cst_113 {dimension_numbers = #tpu.dot_dimension_numbers<[1], [1], [0], [0], [0, 0, 1, 0], [], []>} : vector<8x16xf32>, vector<8x16xf32>, vector<8x8xf32> -> vector<8x8xf32>
    %263 = arith.addf %257, %262 : vector<8x8xf32>
    %264 = vector.extract_strided_slice %187 {offsets = [5, 0], sizes = [1, 128], strides = [1, 1]} : vector<9x128xf32> to vector<1x128xf32>
    %265 = vector.broadcast %264 : vector<1x128xf32> to vector<8x128xf32>
    %266 = arith.mulf %8, %265 : vector<8x128xf32>
    %cst_114 = arith.constant dense<0.000000e+00> : vector<8x16xf32>
    %267 = tpu.matmul %266, %9, %cst_114 {dimension_numbers = #tpu.dot_dimension_numbers<[1], [0], [0], [1], [0, 0, 1, 1], [], []>} : vector<8x128xf32>, vector<128x16xf32>, vector<8x16xf32> -> vector<8x16xf32>
    %cst_115 = arith.constant dense<0.000000e+00> : vector<8x8xf32>
    %268 = tpu.matmul %267, %267, %cst_115 {dimension_numbers = #tpu.dot_dimension_numbers<[1], [1], [0], [0], [0, 0, 1, 0], [], []>} : vector<8x16xf32>, vector<8x16xf32>, vector<8x8xf32> -> vector<8x8xf32>
    %269 = arith.addf %263, %268 : vector<8x8xf32>
    %270 = vector.extract_strided_slice %187 {offsets = [6, 0], sizes = [1, 128], strides = [1, 1]} : vector<9x128xf32> to vector<1x128xf32>
    %271 = vector.broadcast %270 : vector<1x128xf32> to vector<8x128xf32>
    %272 = arith.mulf %8, %271 : vector<8x128xf32>
    %cst_116 = arith.constant dense<0.000000e+00> : vector<8x16xf32>
    %273 = tpu.matmul %272, %9, %cst_116 {dimension_numbers = #tpu.dot_dimension_numbers<[1], [0], [0], [1], [0, 0, 1, 1], [], []>} : vector<8x128xf32>, vector<128x16xf32>, vector<8x16xf32> -> vector<8x16xf32>
    %cst_117 = arith.constant dense<0.000000e+00> : vector<8x8xf32>
    %274 = tpu.matmul %273, %273, %cst_117 {dimension_numbers = #tpu.dot_dimension_numbers<[1], [1], [0], [0], [0, 0, 1, 0], [], []>} : vector<8x16xf32>, vector<8x16xf32>, vector<8x8xf32> -> vector<8x8xf32>
    %275 = arith.addf %269, %274 : vector<8x8xf32>
    %276 = vector.extract_strided_slice %187 {offsets = [7, 0], sizes = [1, 128], strides = [1, 1]} : vector<9x128xf32> to vector<1x128xf32>
    %277 = vector.broadcast %276 : vector<1x128xf32> to vector<8x128xf32>
    %278 = arith.mulf %8, %277 : vector<8x128xf32>
    %cst_118 = arith.constant dense<0.000000e+00> : vector<8x16xf32>
    %279 = tpu.matmul %278, %9, %cst_118 {dimension_numbers = #tpu.dot_dimension_numbers<[1], [0], [0], [1], [0, 0, 1, 1], [], []>} : vector<8x128xf32>, vector<128x16xf32>, vector<8x16xf32> -> vector<8x16xf32>
    %cst_119 = arith.constant dense<0.000000e+00> : vector<8x8xf32>
    %280 = tpu.matmul %279, %279, %cst_119 {dimension_numbers = #tpu.dot_dimension_numbers<[1], [1], [0], [0], [0, 0, 1, 0], [], []>} : vector<8x16xf32>, vector<8x16xf32>, vector<8x8xf32> -> vector<8x8xf32>
    %281 = arith.addf %275, %280 : vector<8x8xf32>
    %282 = vector.extract_strided_slice %187 {offsets = [8, 0], sizes = [1, 128], strides = [1, 1]} : vector<9x128xf32> to vector<1x128xf32>
    %283 = vector.broadcast %282 : vector<1x128xf32> to vector<8x128xf32>
    %284 = arith.mulf %8, %283 : vector<8x128xf32>
    %cst_120 = arith.constant dense<0.000000e+00> : vector<8x16xf32>
    %285 = tpu.matmul %284, %9, %cst_120 {dimension_numbers = #tpu.dot_dimension_numbers<[1], [0], [0], [1], [0, 0, 1, 1], [], []>} : vector<8x128xf32>, vector<128x16xf32>, vector<8x16xf32> -> vector<8x16xf32>
    %cst_121 = arith.constant dense<0.000000e+00> : vector<8x8xf32>
    %286 = tpu.matmul %285, %285, %cst_121 {dimension_numbers = #tpu.dot_dimension_numbers<[1], [1], [0], [0], [0, 0, 1, 0], [], []>} : vector<8x16xf32>, vector<8x16xf32>, vector<8x8xf32> -> vector<8x8xf32>
    %287 = arith.addf %281, %286 : vector<8x8xf32>
    %288 = vector.broadcast %189 : vector<1x128xf32> to vector<8x128xf32>
    %289 = arith.mulf %8, %288 : vector<8x128xf32>
    %cst_122 = arith.constant dense<0.000000e+00> : vector<8x16xf32>
    %290 = tpu.matmul %289, %9, %cst_122 {dimension_numbers = #tpu.dot_dimension_numbers<[1], [0], [0], [1], [0, 0, 1, 1], [], []>} : vector<8x128xf32>, vector<128x16xf32>, vector<8x16xf32> -> vector<8x16xf32>
    %cst_123 = arith.constant dense<0.000000e+00> : vector<8x8xf32>
    %291 = tpu.matmul %290, %290, %cst_123 {dimension_numbers = #tpu.dot_dimension_numbers<[1], [1], [0], [0], [0, 0, 1, 0], [], []>} : vector<8x16xf32>, vector<8x16xf32>, vector<8x8xf32> -> vector<8x8xf32>
    %292 = arith.addf %287, %291 : vector<8x8xf32>
    %293 = arith.mulf %292, %292 : vector<8x8xf32>
    %294 = vector.shape_cast %293 : vector<8x8xf32> to vector<1x8x8xf32>
    %cst_124 = arith.constant dense<0.000000e+00> : vector<1xf32>
    %295 = vector.multi_reduction <add>, %294, %cst_124 [1, 2] : vector<1x8x8xf32> to vector<1xf32>
    %296 = vector.shape_cast %295 : vector<1xf32> to vector<1x1x1xf32>
    %297 = vector.extract %296[0, 0, 0] : f32 from vector<1x1x1xf32>
    %298 = arith.subf %297, %232 : f32
    %cst_125 = arith.constant 0.0204081628 : f32
    %299 = arith.mulf %298, %cst_125 : f32
    %cst_126 = arith.constant 6.250000e-03 : f32
    %300 = arith.mulf %299, %cst_126 : f32
    %cst_127 = arith.constant 9.99999996E-13 : f32
    %301 = vector.broadcast %cst_127 : f32 to vector<1x16xf32>
    %302 = arith.maximumf %185, %301 : vector<1x16xf32>
    %303 = math.log %302 : vector<1x16xf32>
    %304 = arith.mulf %185, %303 : vector<1x16xf32>
    %305 = vector.shape_cast %304 : vector<1x16xf32> to vector<1x1x16xf32>
    %cst_128 = arith.constant dense<0.000000e+00> : vector<1xf32>
    %306 = vector.multi_reduction <add>, %305, %cst_128 [1, 2] : vector<1x1x16xf32> to vector<1xf32>
    %307 = vector.shape_cast %306 : vector<1xf32> to vector<1x1x1xf32>
    %308 = vector.extract %307[0, 0, 0] : f32 from vector<1x1x1xf32>
    %cst_129 = arith.constant 2.77258873 : f32
    %309 = arith.addf %308, %cst_129 : f32
    %cst_130 = arith.constant 5.000000e-01 : f32
    %310 = arith.mulf %cst_130, %91 : f32
    %cst_131 = arith.constant 5.000000e-01 : f32
    %311 = arith.mulf %cst_131, %221 : f32
    %312 = arith.addf %310, %311 : f32
    %313 = arith.addf %170, %300 : f32
    %314 = arith.addf %179, %309 : f32
    %315 = tpu.iota {dimensions = array<i32: 1>} : vector<1x128xi32>
    %c0_i32 = arith.constant 0 : i32
    %316 = vector.broadcast %c0_i32 : i32 to vector<1x128xi32>
    %317 = arith.cmpi eq, %315, %316 : vector<1x128xi32>
    %cst_132 = arith.constant 0.000000e+00 : f32
    %318 = vector.broadcast %49 : f32 to vector<1x128xf32>
    %319 = vector.broadcast %cst_132 : f32 to vector<1x128xf32>
    %320 = arith.select %317, %318, %319 : vector<1x128xi1>, vector<1x128xf32>
    %c1_i32 = arith.constant 1 : i32
    %321 = vector.broadcast %c1_i32 : i32 to vector<1x128xi32>
    %322 = arith.cmpi eq, %315, %321 : vector<1x128xi32>
    %cst_133 = arith.constant 0.000000e+00 : f32
    %323 = vector.broadcast %314 : f32 to vector<1x128xf32>
    %324 = vector.broadcast %cst_133 : f32 to vector<1x128xf32>
    %325 = arith.select %322, %323, %324 : vector<1x128xi1>, vector<1x128xf32>
    %326 = arith.addf %320, %325 : vector<1x128xf32>
    %c2_i32 = arith.constant 2 : i32
    %327 = vector.broadcast %c2_i32 : i32 to vector<1x128xi32>
    %328 = arith.cmpi eq, %315, %327 : vector<1x128xi32>
    %cst_134 = arith.constant 0.000000e+00 : f32
    %329 = vector.broadcast %38 : f32 to vector<1x128xf32>
    %330 = vector.broadcast %cst_134 : f32 to vector<1x128xf32>
    %331 = arith.select %328, %329, %330 : vector<1x128xi1>, vector<1x128xf32>
    %332 = arith.addf %326, %331 : vector<1x128xf32>
    %c3_i32 = arith.constant 3 : i32
    %333 = vector.broadcast %c3_i32 : i32 to vector<1x128xi32>
    %334 = arith.cmpi eq, %315, %333 : vector<1x128xi32>
    %cst_135 = arith.constant 0.000000e+00 : f32
    %335 = vector.broadcast %312 : f32 to vector<1x128xf32>
    %336 = vector.broadcast %cst_135 : f32 to vector<1x128xf32>
    %337 = arith.select %334, %335, %336 : vector<1x128xi1>, vector<1x128xf32>
    %338 = arith.addf %332, %337 : vector<1x128xf32>
    %c4_i32 = arith.constant 4 : i32
    %339 = vector.broadcast %c4_i32 : i32 to vector<1x128xi32>
    %340 = arith.cmpi eq, %315, %339 : vector<1x128xi32>
    %cst_136 = arith.constant 0.000000e+00 : f32
    %341 = vector.broadcast %313 : f32 to vector<1x128xf32>
    %342 = vector.broadcast %cst_136 : f32 to vector<1x128xf32>
    %343 = arith.select %340, %341, %342 : vector<1x128xi1>, vector<1x128xf32>
    %344 = arith.addf %338, %343 : vector<1x128xf32>
    %c0_137 = arith.constant 0 : index
    %c0_138 = arith.constant 0 : index
    %345 = vector.load %arg11[%c0_137, %c0_138] : memref<1x128xf32, #tpu.memory_space<vmem>>, vector<1x128xf32>
    tpu.vector_store %arg11[%c0_137, %c0_138], %344 {strides = array<i32>} : memref<1x128xf32, #tpu.memory_space<vmem>>, vector<1x128xf32>,
    return
  }
}

</mosaic_0001>

<bundles_post_ra>
// kernel: tpu_custom_call.1
= control target key start
LH: loop header
LB: loop body
LE: loop exit
PB: predicated region body
PF: predicated region fallthrough
CT: control target
= control target key end

     0   :  { %vm76_vm0 = vcmask 64512   ;;  %vm171_vm1 = vcmask 1040384   ;;  %s8190_s0 = inlined_call_operand.vmem [shape: f32[9,128], index: 0, kind: input, shape index: {}]   ;;  %s8191_s1 = inlined_call_operand.vmem [shape: f32[9,128], index: 1, kind: input, shape index: {}]   ;;  %s8192_s2 = inlined_call_operand.vmem [shape: f32[1,128], index: 2, kind: input, shape index: {}]   ;;  %s8193_s3 = inlined_call_operand.vmem [shape: f32[1,128], index: 3, kind: input, shape index: {}]   ;;  %s8194_s4 = inlined_call_operand.vmem [shape: f32[9,8], index: 4, kind: input, shape index: {}]   ;;  %s8195_s5 = inlined_call_operand.vmem [shape: f32[27,9], index: 5, kind: input, shape index: {}]   ;;  %s8196_s6 = inlined_call_operand.vmem [shape: f32[27,9], index: 6, kind: input, shape index: {}]   ;;  %s8197_s7 = inlined_call_operand.vmem [shape: f32[9,27], index: 7, kind: input, shape index: {}]   ;;  %s8198_s8 = inlined_call_operand.vmem [shape: f32[8,128], index: 8, kind: input, shape index: {}]   ;;  %s8199_s9 = inlined_call_operand.vmem [shape: f32[128,16], index: 9, kind: input, shape index: {}]   ;;  %s8200_s10 = inlined_call_operand.vmem [shape: f32[16,128], index: 10, kind: input, shape index: {}]   ;;  %s8201_s11 = inlined_call_operand.hbm [shape: f32[1,128], index: 11, kind: output, shape index: {}]  }
   0x1   :  { %v6601_v0 = vld [vmem:[%s8198_s8] sm:$0xff]  ;;  %v46_v2 = vld [vmem:[%s8194_s4 + $0x8] sm:$0x1] }
   0x2   :  { %v45_v1 = vld [vmem:[%s8194_s4] sm:$0xff]  ;;  %5279 = vmatprep.subr.mxu0 %v6601_v0  ;;  %v40_v3 = vld [vmem:[%s8190_s0 + $0x8] sm:$0x1] }
   0x3   :  { %5281 = vmatprep.mubr.msk.f32.mxu0 %vm76_vm0, %v45_v1 }
   0x4   :  { %16 = vsyncpa [#allocation3], 0  ;;  %5280 = vmatpush3.msra.mxu0 %v6601_v0  ;;  %5284 = vmatprep.subr.msk.mxu1 %vm171_vm1, %v40_v3  ;;  %v39_v4 = vld [vmem:[%s8190_s0] sm:$0xff]  ;;  %vm158_vm2 = vcmask 72704   ;;  %v48_v6 = vld [vmem:[%s8195_s5 + $0x8] sm:$0xff]  ;;  %vm364_vm3 = vcmask 220160  }
   0x5   :  { %5282 = vmatmul.mubr.msk.f32.vlgmr.msra.gmra.mxu0 %vm76_vm0, %v46_v2  ;;  %5285 = vmatpush3.msk.msra.mxu1 %vm171_vm1, %v40_v3  ;;  %v47_v5 = vld [vmem:[%s8195_s5] sm:$0xff]  ;;  %v49_v8 = vld [vmem:[%s8195_s5 + $0x10] sm:$0xff]  ;;  %v50_v9 = vld [vmem:[%s8195_s5 + $0x18] sm:$0x7]  ;;  %vm371_vm4 = vcmask 1042432   ;;  %v6535_v34 = vmov 0.0  }
   0x6   :  { %5286 = vmatprep.subr.mxu1 %v39_v4  ;;  %5288 = vmatprep.mubr.msk.f32.mxu1 %vm158_vm2, %v47_v5  ;;  %v51_v7 = vld [vmem:[%s8196_s6] sm:$0xff]  ;;  %v52_v12 = vld [vmem:[%s8196_s6 + $0x8] sm:$0xff]  ;;  %v53_v13 = vld [vmem:[%s8196_s6 + $0x10] sm:$0xff]  ;;  %vm6536_vm5 = vmmov 0   ;;  %vm996_vm6 = vcmask 122880   ;;  %vm658_vm7 = vcmask 130048  }
   0x7   :  { %5287 = vmatpush3.msra.mxu1 %v39_v4  ;;  %5298 = vmatprep.mubr.msk.f32.mxu0 %vm158_vm2, %v51_v7  ;;  %v54_v14 = vld [vmem:[%s8196_s6 + $0x18] sm:$0x7]  ;;  %v55_v15 = vld [vmem:[%s8197_s7] sm:$0xff]  ;;  %v6668_v17 = vld [vmem:[%s8199_s9 + $0x70] sm:$0xff] }
   0x8   :  { %5289 = vmatmul.mubr.msk.f32.vlgmr.msra.gmra.mxu1 %vm158_vm2, %v48_v6  ;;  %v6662_v16 = vld [vmem:[%s8199_s9 + $0x78] sm:$0xff]  ;;  %v6675_v18 = vld [vmem:[%s8199_s9 + $0x68] sm:$0xff]  ;;  %v6682_v19 = vld [vmem:[%s8199_s9 + $0x60] sm:$0xff] }
   0x9   :  { %5291 = vmatprep.mubr.msk.f32.mxu1 %vm158_vm2, %v49_v8  ;;  %v6689_v20 = vld [vmem:[%s8199_s9 + $0x58] sm:$0xff]  ;;  %v56_v33 = vld [vmem:[%s8197_s7 + $0x8] sm:$0x1]  ;;  %v6712_v35 = vld [vmem:[%s8199_s9 + $0x50] sm:$0xff] }
   0xa   :  { %v6720_v36 = vld [vmem:[%s8199_s9 + $0x48] sm:$0xff]  ;;  %v6729_v37 = vld [vmem:[%s8199_s9 + $0x40] sm:$0xff]  ;;  %v6738_v38 = vld [vmem:[%s8199_s9 + $0x38] sm:$0xff] }
   0xb   :  { %v6747_v39 = vld [vmem:[%s8199_s9 + $0x30] sm:$0xff]  ;;  %v6756_v40 = vld [vmem:[%s8199_s9 + $0x28] sm:$0xff]  ;;  %v6765_v41 = vld [vmem:[%s8199_s9 + $0x20] sm:$0xff] }
   0xc   :  { %5292 = vmatmul.mubr.msk.f32.gmra.mxu1 %vm158_vm2, %v50_v9  ;;  %v6774_v42 = vld [vmem:[%s8199_s9 + $0x18] sm:$0xff]  ;;  %v6783_v43 = vld [vmem:[%s8199_s9 + $0x10] sm:$0xff]  ;;  %v6792_v44 = vld [vmem:[%s8199_s9 + $0x8] sm:$0xff] }
   0xd   :  { %5312 = vmatprep.mubr.msk.f32.mxu1 %vm364_vm3, %v55_v15  ;;  %v6799_v45 = vld [vmem:[%s8192_s2] sm:$0x1]  ;;  %v42_v54 = vld [vmem:[%s8191_s1 + $0x8] sm:$0x1] }
   0xe   :  { %v6806_v46 = vld [vmem:[%s8199_s9] sm:$0xff]  ;;  %v495_v47 = vmax.f32 %v6799_v45, 1e-12  ;;  %v465_v56 = vmul.f32 %v42_v54, %v42_v54 }
   0xf   :  { %v44_v49 = vld [vmem:[%s8193_s3] sm:$0x1] }
  0x10   :  { %6454 = vlog2.f32 %v495_v47  ;;  %v494_v50 = vsub.f32 0.0, %v44_v49  ;;  %v41_v55 = vld [vmem:[%s8191_s1] sm:$0xff]  ;;  %v466_v58 = vsel %vm171_vm1, %v465_v56, 0.0 }
  0x11   :  { %v464_v57 = vmul.f32 %v41_v55, %v41_v55 }
  0x13   :  { %v467_v59 = vadd.f32 %v466_v58, %v464_v57 }
  0x15   :  { %v468_v60 = vrot.slane %v467_v59, 4 }
  0x17   :  { %v469_v61 = vadd.f32 %v468_v60, %v467_v59 }
  0x19   :  { %v470_v62 = vrot.slane %v469_v61, 2 }
  0x1b   :  { %v471_v2 = vadd.f32 %v470_v62, %v469_v61 }
  0x1d   :  { %v6455_v48 = vpop.eup %6454  ;;  %v472_v7 = vrot.slane %v471_v2, 1 }
  0x1e   :  { %v497_v51 = vmul.f32 0.6931472, %v6455_v48 }
  0x20   :  { %v498_v52 = vmul.f32 %v497_v51, %v494_v50 }
  0x22   :  { %v499_v53 = vsel %vm171_vm1, %v498_v52, 0.0  ;;  %v75_v52 = vld [vmem:[%s8200_s10 + $0x8] sm:$0xff] }
  0x23   :  { %500 = vadd.xlane.f32.xlu0 %v499_v53 }
  0xac   :  { %v6884_v57 = vpop.xlane.xlu0 %500 }
  0xc5   :  { %v5283_v10 = vpop.f32.mrf.mxu0 }
  0xc6   :  { %5294 = vmatprep.subr.msk.mxu0 %vm171_vm1, %v5283_v10 }
  0xc7   :  { %v149_v11 = vpop.f32.mrf.mxu0  ;;  %5295 = vmatpush3.msk.msra.mxu0 %vm171_vm1, %v5283_v10  ;;  %v473_v10 = vadd.f32 %v472_v7, %v471_v2 }
  0xc8   :  { %5296 = vmatprep.subr.mxu0 %v149_v11  ;;  %v5290_v21 = vpop.f32.mrf.mxu1 }
  0xc9   :  { %5297 = vmatpush3.msra.mxu0 %v149_v11 }
  0xca   :  { %5299 = vmatmul.mubr.msk.f32.vlgmr.msra.gmra.mxu0 %vm158_vm2, %v52_v12  ;;  %5315 = vmatprep.subr.mxu0 %v6662_v16  ;;  %v241_v22 = vpop.f32.mrf.mxu1 }
  0xcb   :  { %5301 = vmatprep.mubr.msk.f32.mxu0 %vm158_vm2, %v53_v13  ;;  %5316 = vmatpush3.msra.mxu0 %v6662_v16  ;;  %v474_v13 = vadd.f32 1e-12, %v473_v10 }
  0xcc   :  { %5317 = vmatprep.subr.mxu0 %v6668_v17  ;;  %v5293_v24 = vpop.f32.mrf.mxu1 }
  0xcd   :  { %5318 = vmatpush3.msra.mxu0 %v6668_v17  ;;  %6456 = vrsqrt.f32 %v474_v13 }
  0xce   :  { %5302 = vmatmul.mubr.msk.f32.gmra.mxu0 %vm158_vm2, %v54_v14  ;;  %5319 = vmatprep.subr.mxu0 %v6675_v18  ;;  %v251_v28 = vpop.f32.mrf.mxu1 }
  0xcf   :  { %5320 = vmatpush3.msra.mxu0 %v6675_v18 }
  0xd0   :  { %5321 = vmatprep.subr.mxu0 %v6682_v19 }
  0xd1   :  { %5322 = vmatpush3.msra.mxu0 %v6682_v19 }
  0xd2   :  { %5323 = vmatprep.subr.mxu0 %v6689_v20 }
  0xd3   :  { %5324 = vmatpush3.msra.mxu0 %v6689_v20 }
  0xd4   :  { %5325 = vmatprep.subr.mxu0 %v6712_v35 }
  0xd5   :  { %5326 = vmatpush3.msra.mxu0 %v6712_v35 }
  0xd6   :  { %5327 = vmatprep.subr.mxu0 %v6720_v36 }
  0xd7   :  { %5328 = vmatpush3.msra.mxu0 %v6720_v36 }
  0xd8   :  { %5329 = vmatprep.subr.mxu0 %v6729_v37 }
  0xd9   :  { %5330 = vmatpush3.msra.mxu0 %v6729_v37 }
  0xda   :  { %5331 = vmatprep.subr.mxu0 %v6738_v38 }
  0xdb   :  { %5332 = vmatpush3.msra.mxu0 %v6738_v38 }
  0xdc   :  { %5333 = vmatprep.subr.mxu0 %v6747_v39 }
  0xdd   :  { %5334 = vmatpush3.msra.mxu0 %v6747_v39 }
  0xde   :  { %5335 = vmatprep.subr.mxu0 %v6756_v40 }
  0xdf   :  { %5336 = vmatpush3.msra.mxu0 %v6756_v40 }
  0xe0   :  { %5337 = vmatprep.subr.mxu0 %v6765_v41 }
  0xe1   :  { %5338 = vmatpush3.msra.mxu0 %v6765_v41 }
  0xe2   :  { %5339 = vmatprep.subr.mxu0 %v6774_v42 }
  0xe3   :  { %5340 = vmatpush3.msra.mxu0 %v6774_v42 }
  0xe4   :  { %5341 = vmatprep.subr.mxu0 %v6783_v43 }
  0xe5   :  { %5342 = vmatpush3.msra.mxu0 %v6783_v43 }
  0xe6   :  { %5343 = vmatprep.subr.mxu0 %v6792_v44 }
  0xe7   :  { %5344 = vmatpush3.msra.mxu0 %v6792_v44 }
  0xe8   :  { %5345 = vmatprep.subr.mxu0 %v6806_v46 }
  0xe9   :  { %5346 = vmatpush3.msra.mxu0 %v6806_v46 }
  0xea   :  { %5385 = vmatprep.subr.mxu0 %v75_v52 }
 0x18a   :  { %v5300_v23 = vpop.f32.mrf.mxu0 }
 0x18b   :  { %v361_v31 = vmul.f32 %v5300_v23, %v5290_v21 }
 0x18c   :  { %v341_v25 = vpop.f32.mrf.mxu0 }
 0x18d   :  { %v360_v32 = vmul.f32 %v341_v25, %v241_v22  ;;  %v6457_v22 = vpop.eup %6456 }
 0x18e   :  { %v5303_v26 = vpop.f32.mrf.mxu0  ;;  %v6861_v23 = vmul.f32 %v6457_v22, %v41_v55 }
 0x18f   :  { %v363_v27 = vmul.f32 %v5303_v26, %v5293_v24  ;;  %v6863_v24 = vmul.f32 %v6457_v22, %v42_v54  ;;  %v74_v54 = vld [vmem:[%s8200_s10] sm:$0xff] }
 0x190   :  { %v351_v29 = vpop.f32.mrf.mxu0 }
 0x191   :  { %v362_v30 = vmul.f32 %v351_v29, %v251_v28  ;;  %5304 = vmatprep.subr.msk.mxu1 %vm371_vm4, %v363_v27 }
 0x192   :  { %5305 = vmatpush3.msk.msra.mxu1 %vm371_vm4, %v363_v27 }
 0x193   :  { %5306 = vmatprep.subr.mxu1 %v362_v30 }
 0x194   :  { %5307 = vmatpush3.msra.mxu1 %v362_v30 }
 0x195   :  { %5308 = vmatprep.subr.mxu1 %v361_v31 }
 0x196   :  { %5309 = vmatpush3.msra.mxu1 %v361_v31 }
 0x197   :  { %5310 = vmatprep.subr.mxu1 %v360_v32 }
 0x198   :  { %5311 = vmatpush3.msra.mxu1 %v360_v32 }
 0x199   :  { %5313 = vmatmul.mubr.msk.f32.vlgmr.msra.gmra.mxu1 %vm364_vm3, %v56_v33  ;;  %5350 = vmatprep.subr.mxu1 %v6535_v34 }
 0x19a   :  { %5351 = vmatpush3.msra.mxu1 %v6662_v16  ;;  %5382 = vmatprep.mubr.msk.f32.mxu1 %vm6536_vm5, %v6535_v34 }
 0x19b   :  { %5352 = vmatprep.subr.mxu1 %v6535_v34 }
 0x19c   :  { %5353 = vmatpush3.msra.mxu1 %v6668_v17 }
 0x19d   :  { %5354 = vmatprep.subr.mxu1 %v6535_v34 }
 0x19e   :  { %5355 = vmatpush3.msra.mxu1 %v6675_v18 }
 0x19f   :  { %5356 = vmatprep.subr.mxu1 %v6535_v34 }
 0x1a0   :  { %5357 = vmatpush3.msra.mxu1 %v6682_v19 }
 0x1a1   :  { %5358 = vmatprep.subr.mxu1 %v6535_v34 }
 0x1a2   :  { %5359 = vmatpush3.msra.mxu1 %v6689_v20 }
 0x1a3   :  { %5360 = vmatprep.subr.mxu1 %v6535_v34 }
 0x1a4   :  { %5361 = vmatpush3.msra.mxu1 %v6712_v35 }
 0x1a5   :  { %5362 = vmatprep.subr.mxu1 %v6535_v34 }
 0x1a6   :  { %5363 = vmatpush3.msra.mxu1 %v6720_v36 }
 0x1a7   :  { %5364 = vmatprep.subr.mxu1 %v6535_v34 }
 0x1a8   :  { %5365 = vmatpush3.msra.mxu1 %v6729_v37 }
 0x1a9   :  { %5366 = vmatprep.subr.mxu1 %v6535_v34 }
 0x1aa   :  { %5367 = vmatpush3.msra.mxu1 %v6738_v38 }
 0x1ab   :  { %5368 = vmatprep.subr.mxu1 %v6535_v34 }
 0x1ac   :  { %5369 = vmatpush3.msra.mxu1 %v6747_v39 }
 0x1ad   :  { %5370 = vmatprep.subr.mxu1 %v6535_v34 }
 0x1ae   :  { %5371 = vmatpush3.msra.mxu1 %v6756_v40 }
 0x1af   :  { %5372 = vmatprep.subr.mxu1 %v6535_v34 }
 0x1b0   :  { %5373 = vmatpush3.msra.mxu1 %v6765_v41 }
 0x1b1   :  { %5374 = vmatprep.subr.mxu1 %v6535_v34 }
 0x1b2   :  { %5375 = vmatpush3.msra.mxu1 %v6774_v42 }
 0x1b3   :  { %5376 = vmatprep.subr.mxu1 %v6535_v34 }
 0x1b4   :  { %5377 = vmatpush3.msra.mxu1 %v6783_v43 }
 0x1b5   :  { %5378 = vmatprep.subr.mxu1 %v6535_v34 }
 0x1b6   :  { %5379 = vmatpush3.msra.mxu1 %v6792_v44 }
 0x1b7   :  { %5380 = vmatprep.subr.mxu1 %v6535_v34 }
 0x1b8   :  { %5381 = vmatpush3.msra.mxu1 %v6806_v46 }
 0x1b9   :  { %5383 = vmatmul.mubr.f32.vlgmr.msra.gmra.mxu1 %v6799_v45  ;;  %5399 = vmatprep.subr.mxu1 %v6662_v16 }
 0x1ba   :  { %5400 = vmatpush3.msra.mxu1 %v6662_v16 }
 0x1bb   :  { %5401 = vmatprep.subr.mxu1 %v6668_v17 }
 0x1bc   :  { %5402 = vmatpush3.msra.mxu1 %v6668_v17 }
 0x1bd   :  { %5403 = vmatprep.subr.mxu1 %v6675_v18 }
 0x1be   :  { %5404 = vmatpush3.msra.mxu1 %v6675_v18 }
 0x1bf   :  { %5405 = vmatprep.subr.mxu1 %v6682_v19 }
 0x1c0   :  { %5406 = vmatpush3.msra.mxu1 %v6682_v19 }
 0x1c1   :  { %5407 = vmatprep.subr.mxu1 %v6689_v20 }
 0x1c2   :  { %5408 = vmatpush3.msra.mxu1 %v6689_v20 }
 0x1c3   :  { %5409 = vmatprep.subr.mxu1 %v6712_v35 }
 0x1c4   :  { %5410 = vmatpush3.msra.mxu1 %v6712_v35 }
 0x1c5   :  { %5411 = vmatprep.subr.mxu1 %v6720_v36 }
 0x1c6   :  { %5412 = vmatpush3.msra.mxu1 %v6720_v36 }
 0x1c7   :  { %5413 = vmatprep.subr.mxu1 %v6729_v37 }
 0x1c8   :  { %5414 = vmatpush3.msra.mxu1 %v6729_v37 }
 0x1c9   :  { %5415 = vmatprep.subr.mxu1 %v6738_v38 }
 0x1ca   :  { %5416 = vmatpush3.msra.mxu1 %v6738_v38 }
 0x1cb   :  { %5417 = vmatprep.subr.mxu1 %v6747_v39 }
 0x1cc   :  { %5418 = vmatpush3.msra.mxu1 %v6747_v39 }
 0x1cd   :  { %5419 = vmatprep.subr.mxu1 %v6756_v40 }
 0x1ce   :  { %5420 = vmatpush3.msra.mxu1 %v6756_v40 }
 0x1cf   :  { %5421 = vmatprep.subr.mxu1 %v6765_v41 }
 0x1d0   :  { %5422 = vmatpush3.msra.mxu1 %v6765_v41 }
 0x1d1   :  { %5423 = vmatprep.subr.mxu1 %v6774_v42 }
 0x1d2   :  { %5424 = vmatpush3.msra.mxu1 %v6774_v42 }
 0x1d3   :  { %5425 = vmatprep.subr.mxu1 %v6783_v43 }
 0x1d4   :  { %5426 = vmatpush3.msra.mxu1 %v6783_v43 }
 0x1d5   :  { %5427 = vmatprep.subr.mxu1 %v6792_v44 }
 0x1d6   :  { %5428 = vmatpush3.msra.mxu1 %v6792_v44 }
 0x1d7   :  { %5429 = vmatprep.subr.mxu1 %v6806_v46 }
 0x1d8   :  { %5430 = vmatpush3.msra.mxu1 %v6806_v46 }
 0x1d9   :  { %5469 = vmatprep.subr.mxu1 %v6535_v34 }
 0x259   :  { %v5314_v63 = vpop.f32.mrf.mxu1 }
 0x25a   :  { %v451_v1 = vmul.f32 %v5314_v63, %v5314_v63 }
 0x25b   :  { %v441_v3 = vpop.f32.mrf.mxu1 }
 0x25c   :  { %v452_v4 = vsel %vm171_vm1, %v451_v1, 0.0  ;;  %v450_v5 = vmul.f32 %v441_v3, %v441_v3 }
 0x25e   :  { %v453_v6 = vadd.f32 %v452_v4, %v450_v5 }
 0x260   :  { %v454_v8 = vrot.slane %v453_v6, 4 }
 0x262   :  { %v455_v9 = vadd.f32 %v454_v8, %v453_v6 }
 0x264   :  { %v456_v11 = vrot.slane %v455_v9, 2 }
 0x266   :  { %v457_v12 = vadd.f32 %v456_v11, %v455_v9 }
 0x268   :  { %v458_v14 = vrot.slane %v457_v12, 1 }
 0x26a   :  { %v459_v15 = vadd.f32 %v458_v14, %v457_v12 }
 0x26c   :  { %v460_v21 = vadd.f32 1e-12, %v459_v15 }
 0x26e   :  { %6458 = vrsqrt.f32 %v460_v21 }
 0x279   :  { %v653_v47 = vpop.f32.mrf.mxu1 }
 0x27a   :  { %v657_v48 = vmul.f32 0.125, %v653_v47 }
 0x27b   :  { %v6459_v25 = vpop.eup %6458  ;;  %v5384_v49 = vpop.f32.mrf.mxu1 }
 0x27c   :  { %v6865_v26 = vmul.f32 %v6459_v25, %v441_v3  ;;  %v6867_v27 = vmul.f32 %v6459_v25, %v5314_v63  ;;  %v2552_v50 = vmax.f32 %v657_v48, 1e-12 }
 0x27e   :  { %5347 = vmatprep.mubr.f32.mxu0 %v6865_v26  ;;  %v478_v28 = vsub.f32 %v6865_v26, %v6861_v23  ;;  %v479_v29 = vsub.f32 %v6867_v27, %v6863_v24  ;;  %6460 = vlog2.f32 %v2552_v50 }
 0x27f   :  { %5348 = vmatmul.mubr.f32.vlgmr.msra.gmra.mxu0 %v6867_v27 }
 0x280   :  { %v480_v30 = vmul.f32 %v478_v28, %v478_v28  ;;  %v481_v31 = vmul.f32 %v479_v29, %v479_v29  ;;  %5386 = vmatpush3.msra.mxu0 %v75_v52 }
 0x281   :  { %5387 = vmatprep.subr.mxu0 %v74_v54 }
 0x282   :  { %v482_v32 = vsel %vm171_vm1, %v481_v31, 0.0  ;;  %5388 = vmatpush3.msra.mxu0 %v74_v54 }
 0x283   :  { %v483_v33 = vadd.f32 %v482_v32, %v480_v30  ;;  %5392 = vmatprep.subr.mxu0 %v6535_v34 }
 0x285   :  { %484 = vadd.xlane.f32.xlu0 %v483_v33 }
 0x28b   :  { %v6461_v51 = vpop.eup %6460 }
 0x28c   :  { %v2554_v53 = vmul.f32 0.6931472, %v6461_v51 }
 0x28e   :  { %v2555_v55 = vmul.f32 %v2554_v53, %v657_v48 }
 0x290   :  { %v2556_v56 = vsel %vm996_vm6, %v2555_v55, 0.0 }
 0x291   :  { %2557 = vadd.xlane.f32.xlu1 %v2556_v56 }
 0x30e   :  { %v485_v58 = vpop.xlane.xlu0 %484 }
 0x30f   :  { %v486_v59 = vrot.slane %v485_v58, 4 }
 0x311   :  { %v487_v60 = vadd.f32 %v486_v59, %v485_v58 }
 0x313   :  { %v488_v61 = vrot.slane %v487_v60, 2 }
 0x315   :  { %v489_v62 = vadd.f32 %v488_v61, %v487_v60 }
 0x317   :  { %v490_v63 = vrot.slane %v489_v62, 1 }
 0x319   :  { %v491_v1 = vadd.f32 %v490_v63, %v489_v62 }
 0x31b   :  { %6423 = vpush %v491_v1 }
 0x33f   :  { %v5349_v2 = vpop.f32.mrf.mxu0 }
 0x340   :  { %v586_v5 = vmul.f32 0.125, %v5349_v2 }
 0x341   :  { %v576_v3 = vpop.f32.mrf.mxu0 }
 0x342   :  { %v585_v4 = vmul.f32 0.125, %v576_v3 }
 0x344   :  { %5389 = vmatprep.mubr.msk.f32.mxu0 %vm658_vm7, %v585_v4 }
 0x345   :  { %5390 = vmatmul.mubr.msk.f32.vlgmr.msra.gmra.mxu0 %vm658_vm7, %v586_v5 }
 0x346   :  { %5393 = vmatpush3.msra.mxu0 %v75_v52  ;;  %5396 = vmatprep.mubr.msk.f32.mxu0 %vm6536_vm5, %v6535_v34 }
 0x347   :  { %5394 = vmatprep.subr.mxu0 %v6535_v34 }
 0x348   :  { %5395 = vmatpush3.msra.mxu0 %v74_v54 }
 0x349   :  { %5397 = vmatmul.mubr.msk.f32.vlgmr.msra.gmra.mxu0 %vm658_vm7, %v657_v48  ;;  %5434 = vmatprep.subr.mxu0 %v6535_v34 }
 0x34a   :  { %5435 = vmatpush3.msra.mxu0 %v6662_v16  ;;  %5466 = vmatprep.mubr.msk.f32.mxu0 %vm6536_vm5, %v6535_v34 }
 0x34b   :  { %5436 = vmatprep.subr.mxu0 %v6535_v34 }
 0x34c   :  { %5437 = vmatpush3.msra.mxu0 %v6668_v17 }
 0x34d   :  { %5438 = vmatprep.subr.mxu0 %v6535_v34 }
 0x34e   :  { %5439 = vmatpush3.msra.mxu0 %v6675_v18 }
 0x34f   :  { %5440 = vmatprep.subr.mxu0 %v6535_v34 }
 0x350   :  { %5441 = vmatpush3.msra.mxu0 %v6682_v19 }
 0x351   :  { %5442 = vmatprep.subr.mxu0 %v6535_v34 }
 0x352   :  { %5443 = vmatpush3.msra.mxu0 %v6689_v20 }
 0x353   :  { %5444 = vmatprep.subr.mxu0 %v6535_v34 }
 0x354   :  { %5445 = vmatpush3.msra.mxu0 %v6712_v35 }
 0x355   :  { %5446 = vmatprep.subr.mxu0 %v6535_v34 }
 0x356   :  { %5447 = vmatpush3.msra.mxu0 %v6720_v36 }
 0x357   :  { %5448 = vmatprep.subr.mxu0 %v6535_v34 }
 0x358   :  { %5449 = vmatpush3.msra.mxu0 %v6729_v37 }
 0x359   :  { %5450 = vmatprep.subr.mxu0 %v6535_v34 }
 0x35a   :  { %5451 = vmatpush3.msra.mxu0 %v6738_v38 }
 0x35b   :  { %5452 = vmatprep.subr.mxu0 %v6535_v34 }
 0x35c   :  { %5453 = vmatpush3.msra.mxu0 %v6747_v39 }
 0x35d   :  { %5454 = vmatprep.subr.mxu0 %v6535_v34 }
 0x35e   :  { %5455 = vmatpush3.msra.mxu0 %v6756_v40 }
 0x35f   :  { %5456 = vmatprep.subr.mxu0 %v6535_v34 }
 0x360   :  { %5457 = vmatpush3.msra.mxu0 %v6765_v41 }
 0x361   :  { %5458 = vmatprep.subr.mxu0 %v6535_v34 }
 0x362   :  { %5459 = vmatpush3.msra.mxu0 %v6774_v42 }
 0x363   :  { %5460 = vmatprep.subr.mxu0 %v6535_v34 }
 0x364   :  { %5461 = vmatpush3.msra.mxu0 %v6783_v43 }
 0x365   :  { %5462 = vmatprep.subr.mxu0 %v6535_v34 }
 0x366   :  { %5463 = vmatpush3.msra.mxu0 %v6792_v44 }
 0x367   :  { %5464 = vmatprep.subr.mxu0 %v6535_v34 }
 0x368   :  { %5465 = vmatpush3.msra.mxu0 %v6806_v46 }
 0x369   :  { %5504 = vmatprep.subr.mxu0 %v6535_v34 }
 0x405   :  { %v5391_v6 = vpop.f32.mrf.mxu0 }
 0x406   :  { %v6928_v7 = vsub.f32 %v6867_v27, %v5391_v6 }
 0x407   :  { %v731_v8 = vpop.f32.mrf.mxu0 }
 0x408   :  { %v6931_v9 = vsub.f32 %v6865_v26, %v731_v8  ;;  %v817_v13 = vmul.f32 %v6928_v7, %v6928_v7 }
 0x409   :  { %v811_v10 = vpop.f32.mrf.mxu0 }
 0x40a   :  { %v6934_v11 = vsub.f32 %v6799_v45, %v811_v10  ;;  %v816_v12 = vmul.f32 %v6931_v9, %v6931_v9  ;;  %v1048_v45 = vlaneseq }
 0x40b   :  { %v5398_v14 = vpop.f32.mrf.mxu0 }
 0x40c   :  { %v893_v15 = vmul.f32 %v6934_v11, %v6934_v11  ;;  %5431 = vmatprep.mubr.f32.mxu1 %v816_v12  ;;  %v6980_v21 = vshrl.u32 %v1048_v45, 7 }
 0x40d   :  { %5432 = vmatmul.mubr.f32.vlgmr.msra.gmra.mxu1 %v817_v13 }
 0x40e   :  { %5470 = vmatpush3.msra.mxu1 %v6662_v16  ;;  %5467 = vmatmul.mubr.f32.vlgmr.msra.gmra.mxu0 %v893_v15  ;;  %v6991_v22 = vsub.s32 0, %v6980_v21  ;;  %v1125_v25 = vsub.s32 1, %v6980_v21 }
 0x40f   :  { %5471 = vmatprep.subr.mxu1 %v6535_v34  ;;  %5505 = vmatpush3.msra.mxu0 %v6662_v16 }
 0x410   :  { %5472 = vmatpush3.msra.mxu1 %v6668_v17  ;;  %5506 = vmatprep.subr.mxu0 %v6535_v34  ;;  %v1051_v26 = vrot.slane %v6931_v9, %v6991_v22  ;;  %v1126_v27 = vrot.slane %v6931_v9, %v1125_v25 }
 0x411   :  { %5473 = vmatprep.subr.mxu1 %v6535_v34  ;;  %5507 = vmatpush3.msra.mxu0 %v6668_v17 }
 0x412   :  { %5474 = vmatpush3.msra.mxu1 %v6675_v18  ;;  %5508 = vmatprep.subr.mxu0 %v6535_v34  ;;  %v1052_v28 = vmul.f32 %v1051_v26, %v6601_v0  ;;  %v1127_v29 = vmul.f32 %v1126_v27, %v6601_v0 }
 0x413   :  { %5475 = vmatprep.subr.mxu1 %v6535_v34  ;;  %5509 = vmatpush3.msra.mxu0 %v6675_v18 }
 0x414   :  { %5476 = vmatpush3.msra.mxu1 %v6682_v19  ;;  %5510 = vmatprep.subr.mxu0 %v6535_v34 }
 0x415   :  { %5477 = vmatprep.subr.mxu1 %v6535_v34  ;;  %5511 = vmatpush3.msra.mxu0 %v6682_v19 }
 0x416   :  { %5478 = vmatpush3.msra.mxu1 %v6689_v20  ;;  %5512 = vmatprep.subr.mxu0 %v6535_v34 }
 0x417   :  { %5479 = vmatprep.subr.mxu1 %v6535_v34  ;;  %5513 = vmatpush3.msra.mxu0 %v6689_v20 }
 0x418   :  { %5480 = vmatpush3.msra.mxu1 %v6712_v35  ;;  %5514 = vmatprep.subr.mxu0 %v6535_v34 }
 0x419   :  { %5481 = vmatprep.subr.mxu1 %v6535_v34  ;;  %5515 = vmatpush3.msra.mxu0 %v6712_v35 }
 0x41a   :  { %5482 = vmatpush3.msra.mxu1 %v6720_v36  ;;  %5516 = vmatprep.subr.mxu0 %v6535_v34 }
 0x41b   :  { %5483 = vmatprep.subr.mxu1 %v6535_v34  ;;  %5517 = vmatpush3.msra.mxu0 %v6720_v36 }
 0x41c   :  { %5484 = vmatpush3.msra.mxu1 %v6729_v37  ;;  %5518 = vmatprep.subr.mxu0 %v6535_v34 }
 0x41d   :  { %5485 = vmatprep.subr.mxu1 %v6535_v34  ;;  %5519 = vmatpush3.msra.mxu0 %v6729_v37 }
 0x41e   :  { %5486 = vmatpush3.msra.mxu1 %v6738_v38  ;;  %5520 = vmatprep.subr.mxu0 %v6535_v34 }
 0x41f   :  { %5487 = vmatprep.subr.mxu1 %v6535_v34  ;;  %5521 = vmatpush3.msra.mxu0 %v6738_v38 }
 0x420   :  { %5488 = vmatpush3.msra.mxu1 %v6747_v39  ;;  %5522 = vmatprep.subr.mxu0 %v6535_v34 }
 0x421   :  { %5489 = vmatprep.subr.mxu1 %v6535_v34  ;;  %5523 = vmatpush3.msra.mxu0 %v6747_v39 }
 0x422   :  { %5490 = vmatpush3.msra.mxu1 %v6756_v40  ;;  %5524 = vmatprep.subr.mxu0 %v6535_v34 }
 0x423   :  { %5491 = vmatprep.subr.mxu1 %v6535_v34  ;;  %5525 = vmatpush3.msra.mxu0 %v6756_v40 }
 0x424   :  { %5492 = vmatpush3.msra.mxu1 %v6765_v41  ;;  %5526 = vmatprep.subr.mxu0 %v6535_v34 }
 0x425   :  { %5493 = vmatprep.subr.mxu1 %v6535_v34  ;;  %5527 = vmatpush3.msra.mxu0 %v6765_v41 }
 0x426   :  { %5494 = vmatpush3.msra.mxu1 %v6774_v42  ;;  %5528 = vmatprep.subr.mxu0 %v6535_v34 }
 0x427   :  { %5495 = vmatprep.subr.mxu1 %v6535_v34  ;;  %5529 = vmatpush3.msra.mxu0 %v6774_v42 }
 0x428   :  { %5496 = vmatpush3.msra.mxu1 %v6783_v43  ;;  %5530 = vmatprep.subr.mxu0 %v6535_v34 }
 0x429   :  { %5497 = vmatprep.subr.mxu1 %v6535_v34  ;;  %5531 = vmatpush3.msra.mxu0 %v6783_v43 }
 0x42a   :  { %5498 = vmatpush3.msra.mxu1 %v6792_v44  ;;  %5532 = vmatprep.subr.mxu0 %v6535_v34 }
 0x42b   :  { %5499 = vmatprep.subr.mxu1 %v6535_v34  ;;  %5533 = vmatpush3.msra.mxu0 %v6792_v44 }
 0x42c   :  { %5500 = vmatpush3.msra.mxu1 %v6806_v46  ;;  %5501 = vmatprep.mubr.msk.f32.mxu1 %vm6536_vm5, %v6535_v34 }
 0x42d   :  { %5534 = vmatprep.subr.mxu0 %v6535_v34  ;;  %5502 = vmatmul.mubr.f32.vlgmr.msra.gmra.mxu1 %v1052_v28 }
 0x42e   :  { %5535 = vmatpush3.msra.mxu0 %v6806_v46  ;;  %5536 = vmatprep.mubr.msk.f32.mxu0 %vm6536_vm5, %v6535_v34 }
 0x42f   :  { %5537 = vmatmul.mubr.f32.vlgmr.msra.gmra.mxu0 %v1127_v29  ;;  %5544 = vmatprep.subr.mxu0 %v6535_v34 }
 0x430   :  { %5539 = vmatprep.subr.mxu1 %v6535_v34  ;;  %5546 = vmatprep.mubr.msk.f32.mxu0 %vm6536_vm5, %v6535_v34 }
 0x431   :  { %5541 = vmatprep.mubr.msk.f32.mxu1 %vm6536_vm5, %v6535_v34 }
 0x4cd   :  { %v5433_v30 = vpop.f32.mrf.mxu1 }
 0x4ce   :  { %v965_v31 = vmul.f32 0.14285715, %v5433_v30  ;;  %v1023_v32 = vmul.f32 %v5433_v30, %v5433_v30  ;;  %v960_v33 = vpop.f32.mrf.mxu0 }
 0x4cf   :  { %v982_v47 = vmul.f32 0.14285715, %v960_v33  ;;  %v1036_v48 = vmul.f32 %v960_v33, %v960_v33  ;;  %v884_v49 = vpop.f32.mrf.mxu1 }
 0x4d0   :  { %v967_v50 = vadd.f32 0.0001, %v965_v31  ;;  %v964_v51 = vmul.f32 0.14285715, %v884_v49  ;;  %v1022_v52 = vmul.f32 %v884_v49, %v884_v49  ;;  %v5468_v53 = vpop.f32.mrf.mxu0  ;;  %v1025_v59 = vsel %vm996_vm6, %v1023_v32, 0.0 }
 0x4d1   :  { %v983_v54 = vadd.f32 0.0001, %v982_v47  ;;  %v1037_v55 = vsel %vm996_vm6, %v1036_v48, 0.0 }
 0x4d2   :  { %6462 = vrsqrt.f32 %v967_v50  ;;  %v966_v56 = vadd.f32 0.0001, %v964_v51  ;;  %1038 = vadd.xlane.f32.xlu1 %v1037_v55  ;;  %v1024_v58 = vsel %vm658_vm7, %v1022_v52, 0.0  ;;  %vm977_vm8 = vcmp.eq.f32.partialorder %v967_v50, inf }
 0x4d3   :  { %6464 = vrsqrt.f32 %v983_v54  ;;  %v1026_v60 = vadd.f32 %v1025_v59, %v1024_v58  ;;  %vm986_vm9 = vcmp.eq.f32.partialorder %v983_v54, inf  ;;  %vm988_vm10 = vcmp.eq.f32.partialorder %v983_v54, 0.0 }
 0x4d4   :  { %6466 = vrsqrt.f32 %v966_v56  ;;  %v980_v3 = vand.u32 2147483648, %v967_v50  ;;  %v989_v4 = vand.u32 2147483648, %v983_v54  ;;  %vm979_vm11 = vcmp.eq.f32.partialorder %v967_v50, 0.0 }
 0x4d5   :  { %1027 = vadd.xlane.f32.xlu0 %v1026_v60  ;;  %vm970_vm12 = vcmp.eq.f32.partialorder %v966_v56, inf  ;;  %v973_v10 = vand.u32 2147483648, %v966_v56  ;;  %vm972_vm13 = vcmp.eq.f32.partialorder %v966_v56, 0.0  ;;  %v502_v52 = vrot.slane %v6884_v57, 4 }
 0x4d6   :  { %v1346_v58 = vsub.s32 2, %v6980_v21 }
 0x4d8   :  { %v1347_v59 = vrot.slane %v6931_v9, %v1346_v58 }
 0x4da   :  { %v1348_v60 = vmul.f32 %v1347_v59, %v6601_v0  ;;  %v7097_v59 = vld [vmem:[%s8199_s9 + $0x70] sm:$0xff] }
 0x4df   :  { %v6463_v61 = vpop.eup %6462 }
 0x4e0   :  { %v6465_v62 = vpop.eup %6464  ;;  %v976_v63 = vmul.f32 %v6463_v61, %v967_v50  ;;  %v7085_v61 = vpop.xlane.xlu1 %2557 }
 0x4e1   :  { %v6467_v1 = vpop.eup %6466  ;;  %v985_v2 = vmul.f32 %v6465_v62, %v983_v54 }
 0x4e2   :  { %v969_v5 = vmul.f32 %v6467_v1, %v966_v56  ;;  %v978_v6 = vsel %vm977_vm8, %v967_v50, %v976_v63 }
 0x4e3   :  { %v987_v8 = vsel %vm986_vm9, %v983_v54, %v985_v2  ;;  %v981_v12 = vsel %vm979_vm11, %v980_v3, %v978_v6  ;;  %v503_v54 = vadd.f32 %v502_v52, %v6884_v57 }
 0x4e4   :  { %v990_v13 = vsel %vm988_vm10, %v989_v4, %v987_v8  ;;  %v971_v14 = vsel %vm970_vm12, %v966_v56, %v969_v5  ;;  %v992_v15 = vsub.f32 1.0, %v981_v12 }
 0x4e5   :  { %v1008_v26 = vsub.f32 1.0, %v990_v13  ;;  %v974_v27 = vsel %vm972_vm13, %v973_v10, %v971_v14  ;;  %v504_v55 = vrot.slane %v503_v54, 2 }
 0x4e6   :  { %v991_v28 = vsub.f32 1.0, %v974_v27  ;;  %v994_v29 = vmax.f32 %v992_v15, 0.0 }
 0x4e7   :  { %v1009_v30 = vmax.f32 %v1008_v26, 0.0  ;;  %v505_v57 = vadd.f32 %v504_v55, %v503_v54 }
 0x4e8   :  { %v993_v31 = vmax.f32 %v991_v28, 0.0  ;;  %v997_v47 = vsel %vm996_vm6, %v994_v29, 0.0 }
 0x4e9   :  { %v1010_v32 = vsel %vm996_vm6, %v1009_v30, 0.0  ;;  %v506_v56 = vrot.slane %v505_v57, 1 }
 0x4ea   :  { %1011 = vadd.xlane.f32.xlu1 %v1010_v32  ;;  %v995_v33 = vsel %vm658_vm7, %v993_v31, 0.0 }
 0x4eb   :  { %v998_v48 = vadd.f32 %v997_v47, %v995_v33 }
 0x4ed   :  { %v1119_v49 = vpop.f32.mrf.mxu1 }
 0x4ee   :  { %5545 = vmatpush3.xpose.msk.msra.mxu0 %vm658_vm7, %v1119_v49  ;;  %999 = vadd.xlane.f32.xlu1 %v998_v48 }
 0x4ef   :  { %v1194_v50 = vpop.f32.mrf.mxu0  ;;  %v5503_v51 = vpop.f32.mrf.mxu1  ;;  %5584 = vmatprep.subr.mxu0 %v6535_v34 }
 0x4f0   :  { %5540 = vmatpush3.xpose.msk.msra.mxu1 %vm658_vm7, %v1194_v50 }
 0x4f1   :  { %v5538_v53 = vpop.f32.mrf.mxu0  ;;  %5547 = vmatmul.mubr.msk.f32.vlgmr.msra.gmra.mxu0 %vm658_vm7, %v1119_v49  ;;  %5549 = vmatprep.subr.mxu1 %v6535_v34 }
 0x4f2   :  { %5586 = vmatprep.mubr.msk.f32.mxu0 %vm6536_vm5, %v6535_v34 }
 0x4f3   :  { %5542 = vmatmul.mubr.msk.f32.vlgmr.msra.gmra.mxu1 %vm658_vm7, %v1194_v50 }
 0x4f4   :  { %5550 = vmatpush3.msra.mxu1 %v6662_v16  ;;  %5581 = vmatprep.mubr.msk.f32.mxu1 %vm6536_vm5, %v6535_v34 }
 0x4f5   :  { %5551 = vmatprep.subr.mxu1 %v6535_v34 }
 0x4f6   :  { %5552 = vmatpush3.msra.mxu1 %v6668_v17  ;;  %v507_v17 = vadd.f32 %v506_v56, %v505_v57 }
 0x4f7   :  { %5553 = vmatprep.subr.mxu1 %v6535_v34 }
 0x4f8   :  { %5554 = vmatpush3.msra.mxu1 %v6675_v18  ;;  %6425 = vpush %v507_v17 }
 0x4f9   :  { %5555 = vmatprep.subr.mxu1 %v6535_v34 }
 0x4fa   :  { %5556 = vmatpush3.msra.mxu1 %v6682_v19 }
 0x4fb   :  { %5557 = vmatprep.subr.mxu1 %v6535_v34 }
 0x4fc   :  { %5558 = vmatpush3.msra.mxu1 %v6689_v20 }
 0x4fd   :  { %5559 = vmatprep.subr.mxu1 %v6535_v34 }
 0x4fe   :  { %5560 = vmatpush3.msra.mxu1 %v6712_v35 }
 0x4ff   :  { %5561 = vmatprep.subr.mxu1 %v6535_v34 }
 0x500   :  { %5562 = vmatpush3.msra.mxu1 %v6720_v36 }
 0x501   :  { %5563 = vmatprep.subr.mxu1 %v6535_v34 }
 0x502   :  { %5564 = vmatpush3.msra.mxu1 %v6729_v37 }
 0x503   :  { %5565 = vmatprep.subr.mxu1 %v6535_v34 }
 0x504   :  { %5566 = vmatpush3.msra.mxu1 %v6738_v38 }
 0x505   :  { %5567 = vmatprep.subr.mxu1 %v6535_v34 }
 0x506   :  { %5568 = vmatpush3.msra.mxu1 %v6747_v39 }
 0x507   :  { %5569 = vmatprep.subr.mxu1 %v6535_v34 }
 0x508   :  { %5570 = vmatpush3.msra.mxu1 %v6756_v40 }
 0x509   :  { %5571 = vmatprep.subr.mxu1 %v6535_v34 }
 0x50a   :  { %5572 = vmatpush3.msra.mxu1 %v6765_v41 }
 0x50b   :  { %5573 = vmatprep.subr.mxu1 %v6535_v34 }
 0x50c   :  { %5574 = vmatpush3.msra.mxu1 %v6774_v42 }
 0x50d   :  { %5575 = vmatprep.subr.mxu1 %v6535_v34 }
 0x50e   :  { %5576 = vmatpush3.msra.mxu1 %v6783_v43 }
 0x50f   :  { %5577 = vmatprep.subr.mxu1 %v6535_v34 }
 0x510   :  { %5578 = vmatpush3.msra.mxu1 %v6792_v44 }
 0x511   :  { %5579 = vmatprep.subr.mxu1 %v6535_v34 }
 0x512   :  { %5580 = vmatpush3.msra.mxu1 %v6806_v46 }
 0x513   :  { %5582 = vmatmul.mubr.f32.vlgmr.msra.gmra.mxu1 %v1348_v60  ;;  %5624 = vmatprep.subr.mxu1 %v6535_v34 }
 0x514   :  { %5626 = vmatprep.mubr.msk.f32.mxu1 %vm6536_vm5, %v6535_v34 }
 0x55b   :  { %v1039_v63 = vpop.xlane.xlu1 %1038 }
 0x55c   :  { %v1040_v2 = vrot.slane %v1039_v63, 4 }
 0x55e   :  { %v1028_v62 = vpop.xlane.xlu0 %1027  ;;  %v1041_v6 = vadd.f32 %v1040_v2, %v1039_v63  ;;  %v7147_v63 = vld [vmem:[%s8199_s9 + $0x78] sm:$0xff]  ;;  %v7165_v2 = vld [vmem:[%s8199_s9 + $0x60] sm:$0xff] }
 0x55f   :  { %v1029_v1 = vrot.slane %v1028_v62, 4 }
 0x560   :  { %v1042_v14 = vrot.slane %v1041_v6, 2 }
 0x561   :  { %v1030_v4 = vadd.f32 %v1029_v1, %v1028_v62  ;;  %v7158_v1 = vld [vmem:[%s8199_s9 + $0x68] sm:$0xff] }
 0x562   :  { %v1043_v29 = vadd.f32 %v1042_v14, %v1041_v6  ;;  %v7193_v6 = vld [vmem:[%s8199_s9 + $0x40] sm:$0xff]  ;;  %v7273_v14 = vld [vmem:[%s8199_s9 + $0x18] sm:$0xff] }
 0x563   :  { %v1031_v10 = vrot.slane %v1030_v4, 2 }
 0x564   :  { %v1044_v47 = vrot.slane %v1043_v29, 1 }
 0x565   :  { %v1032_v28 = vadd.f32 %v1031_v10, %v1030_v4  ;;  %v7179_v4 = vld [vmem:[%s8199_s9 + $0x50] sm:$0xff]  ;;  %v7258_v10 = vld [vmem:[%s8199_s9 + $0x28] sm:$0xff] }
 0x566   :  { %v1045_v51 = vadd.f32 %v1044_v47, %v1043_v29  ;;  %v7298_v29 = vld [vmem:[%s8199_s9] sm:$0xff] }
 0x567   :  { %v1033_v33 = vrot.slane %v1032_v28, 1 }
 0x569   :  { %v1034_v50 = vadd.f32 %v1033_v33, %v1032_v28 }
 0x573   :  { %v1012_v3 = vpop.xlane.xlu1 %1011 }
 0x574   :  { %v1013_v5 = vrot.slane %v1012_v3, 4 }
 0x576   :  { %v1014_v8 = vadd.f32 %v1013_v5, %v1012_v3  ;;  %v7172_v3 = vld [vmem:[%s8199_s9 + $0x58] sm:$0xff]  ;;  %v7186_v5 = vld [vmem:[%s8199_s9 + $0x48] sm:$0xff] }
 0x577   :  { %v1000_v0 = vpop.xlane.xlu1 %999 }
 0x578   :  { %v1015_v12 = vrot.slane %v1014_v8, 2  ;;  %v1001_v13 = vrot.slane %v1000_v0, 4 }
 0x57a   :  { %v1002_v15 = vadd.f32 %v1001_v13, %v1000_v0  ;;  %v1016_v26 = vadd.f32 %v1015_v12, %v1014_v8  ;;  %v1644_v8 = vsub.s32 4, %v6980_v21  ;;  %v1793_v12 = vsub.s32 5, %v6980_v21  ;;  %v7266_v13 = vld [vmem:[%s8199_s9 + $0x20] sm:$0xff] }
 0x57c   :  { %v1003_v27 = vrot.slane %v1002_v15, 2  ;;  %v1017_v31 = vrot.slane %v1016_v26, 1 }
 0x57e   :  { %v1004_v30 = vadd.f32 %v1003_v27, %v1002_v15  ;;  %v1018_v49 = vadd.f32 %v1017_v31, %v1016_v26  ;;  %v1794_v15 = vrot.slane %v6931_v9, %v1793_v12  ;;  %v7283_v26 = vld [vmem:[%s8199_s9 + $0x10] sm:$0xff]  ;;  %v7290_v27 = vld [vmem:[%s8199_s9 + $0x8] sm:$0xff] }
 0x580   :  { %v1005_v32 = vrot.slane %v1004_v30, 1 }
 0x582   :  { %v1006_v48 = vadd.f32 %v1005_v32, %v1004_v30 }
 0x584   :  { %6427 = vpush %v1006_v48  ;;  %v1942_v48 = vsub.s32 6, %v6980_v21 }
 0x585   :  { %6429 = vpush %v1018_v49 }
 0x586   :  { %6431 = vpush %v1034_v50  ;;  %v1943_v49 = vrot.slane %v6931_v9, %v1942_v48 }
 0x587   :  { %6433 = vpush %v1045_v51 }
 0x5b1   :  { %v1340_v52 = vpop.f32.mrf.mxu0 }
 0x5b3   :  { %v1267_v53 = vpop.f32.mrf.mxu1  ;;  %v5548_v54 = vpop.f32.mrf.mxu0 }
 0x5b4   :  { %v1341_v55 = vadd.f32 %v1340_v52, %v1267_v53 }
 0x5b5   :  { %v5543_v57 = vpop.f32.mrf.mxu1 }
 0x5b6   :  { %v2091_v57 = vsub.s32 7, %v6980_v21 }
 0x5d3   :  { %v1415_v56 = vpop.f32.mrf.mxu1 }
 0x5d4   :  { %5585 = vmatpush3.xpose.msk.msra.mxu0 %vm658_vm7, %v1415_v56 }
 0x5d5   :  { %v5583_v17 = vpop.f32.mrf.mxu1  ;;  %5589 = vmatprep.subr.mxu0 %v6535_v34 }
 0x5d7   :  { %5587 = vmatmul.mubr.msk.f32.vlgmr.msra.gmra.mxu0 %vm658_vm7, %v1415_v56  ;;  %v2092_v56 = vrot.slane %v6931_v9, %v2091_v57 }
 0x5d8   :  { %5590 = vmatpush3.msra.mxu0 %v6662_v16  ;;  %5621 = vmatprep.mubr.msk.f32.mxu0 %vm6536_vm5, %v6535_v34  ;;  %v1495_v16 = vsub.s32 3, %v6980_v21 }
 0x5d9   :  { %5591 = vmatprep.subr.mxu0 %v6535_v34 }
 0x5da   :  { %5592 = vmatpush3.msra.mxu0 %v7097_v59 }
 0x5db   :  { %5593 = vmatprep.subr.mxu0 %v6535_v34 }
 0x5dc   :  { %5594 = vmatpush3.msra.mxu0 %v6675_v18  ;;  %v1496_v18 = vrot.slane %v6931_v9, %v1495_v16 }
 0x5dd   :  { %5595 = vmatprep.subr.mxu0 %v6535_v34 }
 0x5de   :  { %5596 = vmatpush3.msra.mxu0 %v6682_v19  ;;  %v7134_v19 = vld [vmem:[%s8198_s8] sm:$0xff] }
 0x5df   :  { %5597 = vmatprep.subr.mxu0 %v6535_v34  ;;  %v1795_v28 = vmul.f32 %v7134_v19, %v1794_v15  ;;  %v1944_v50 = vmul.f32 %v7134_v19, %v1943_v49  ;;  %v2093_v17 = vmul.f32 %v7134_v19, %v2092_v56 }
 0x5e0   :  { %5598 = vmatpush3.msra.mxu0 %v6689_v20  ;;  %v1497_v20 = vmul.f32 %v7134_v19, %v1496_v18 }
 0x5e1   :  { %5599 = vmatprep.subr.mxu0 %v6535_v34 }
 0x5e2   :  { %5600 = vmatpush3.msra.mxu0 %v6712_v35 }
 0x5e3   :  { %5601 = vmatprep.subr.mxu0 %v6535_v34 }
 0x5e4   :  { %5602 = vmatpush3.msra.mxu0 %v6720_v36 }
 0x5e5   :  { %5603 = vmatprep.subr.mxu0 %v6535_v34 }
 0x5e6   :  { %5604 = vmatpush3.msra.mxu0 %v6729_v37 }
 0x5e7   :  { %5605 = vmatprep.subr.mxu0 %v6535_v34 }
 0x5e8   :  { %5606 = vmatpush3.msra.mxu0 %v6738_v38 }
 0x5e9   :  { %5607 = vmatprep.subr.mxu0 %v6535_v34 }
 0x5ea   :  { %5608 = vmatpush3.msra.mxu0 %v6747_v39 }
 0x5eb   :  { %5609 = vmatprep.subr.mxu0 %v6535_v34 }
 0x5ec   :  { %5610 = vmatpush3.msra.mxu0 %v6756_v40 }
 0x5ed   :  { %5611 = vmatprep.subr.mxu0 %v6535_v34 }
 0x5ee   :  { %5612 = vmatpush3.msra.mxu0 %v6765_v41 }
 0x5ef   :  { %5613 = vmatprep.subr.mxu0 %v6535_v34 }
 0x5f0   :  { %5614 = vmatpush3.msra.mxu0 %v6774_v42 }
 0x5f1   :  { %5615 = vmatprep.subr.mxu0 %v6535_v34 }
 0x5f2   :  { %5616 = vmatpush3.msra.mxu0 %v6783_v43 }
 0x5f3   :  { %5617 = vmatprep.subr.mxu0 %v6535_v34 }
 0x5f4   :  { %5618 = vmatpush3.msra.mxu0 %v6792_v44 }
 0x5f5   :  { %5619 = vmatprep.subr.mxu0 %v6535_v34 }
 0x5f6   :  { %5620 = vmatpush3.msra.mxu0 %v6806_v46 }
 0x5f7   :  { %5622 = vmatmul.mubr.f32.vlgmr.msra.gmra.mxu0 %v1497_v20  ;;  %5664 = vmatprep.subr.mxu0 %v6535_v34 }
 0x5f8   :  { %5666 = vmatprep.mubr.msk.f32.mxu0 %vm6536_vm5, %v6535_v34 }
 0x697   :  { %v1488_v35 = vpop.f32.mrf.mxu0 }
 0x698   :  { %v1492_v36 = vadd.f32 %v1488_v35, %v1341_v55 }
 0x699   :  { %v5588_v37 = vpop.f32.mrf.mxu0 }
 0x69a   :  { %v2241_v37 = vrot.slane %v6928_v7, %v6991_v22 }
 0x6b7   :  { %v1564_v60 = vpop.f32.mrf.mxu0 }
 0x6b8   :  { %5625 = vmatpush3.xpose.msk.msra.mxu1 %vm658_vm7, %v1564_v60 }
 0x6b9   :  { %v5623_v62 = vpop.f32.mrf.mxu0  ;;  %5629 = vmatprep.subr.mxu1 %v6535_v34 }
 0x6bb   :  { %5627 = vmatmul.mubr.msk.f32.vlgmr.msra.gmra.mxu1 %vm658_vm7, %v1564_v60  ;;  %v2242_v60 = vmul.f32 %v7134_v19, %v2241_v37 }
 0x6bc   :  { %5630 = vmatpush3.msra.mxu1 %v7147_v63  ;;  %5661 = vmatprep.mubr.msk.f32.mxu1 %vm6536_vm5, %v6535_v34 }
 0x6bd   :  { %5631 = vmatprep.subr.mxu1 %v6535_v34 }
 0x6be   :  { %5632 = vmatpush3.msra.mxu1 %v7097_v59 }
 0x6bf   :  { %5633 = vmatprep.subr.mxu1 %v6535_v34 }
 0x6c0   :  { %5634 = vmatpush3.msra.mxu1 %v7158_v1 }
 0x6c1   :  { %5635 = vmatprep.subr.mxu1 %v6535_v34 }
 0x6c2   :  { %5636 = vmatpush3.msra.mxu1 %v7165_v2 }
 0x6c3   :  { %5637 = vmatprep.subr.mxu1 %v6535_v34 }
 0x6c4   :  { %5638 = vmatpush3.msra.mxu1 %v7172_v3 }
 0x6c5   :  { %5639 = vmatprep.subr.mxu1 %v6535_v34 }
 0x6c6   :  { %5640 = vmatpush3.msra.mxu1 %v7179_v4 }
 0x6c7   :  { %5641 = vmatprep.subr.mxu1 %v6535_v34 }
 0x6c8   :  { %5642 = vmatpush3.msra.mxu1 %v7186_v5 }
 0x6c9   :  { %5643 = vmatprep.subr.mxu1 %v6535_v34 }
 0x6ca   :  { %5644 = vmatpush3.msra.mxu1 %v7193_v6 }
 0x6cb   :  { %5645 = vmatprep.subr.mxu1 %v6535_v34 }
 0x6cc   :  { %5646 = vmatpush3.msra.mxu1 %v6738_v38  ;;  %v1645_v38 = vrot.slane %v6931_v9, %v1644_v8 }
 0x6cd   :  { %5647 = vmatprep.subr.mxu1 %v6535_v34 }
 0x6ce   :  { %5648 = vmatpush3.msra.mxu1 %v6747_v39  ;;  %v1646_v39 = vmul.f32 %v7134_v19, %v1645_v38 }
 0x6cf   :  { %5649 = vmatprep.subr.mxu1 %v6535_v34 }
 0x6d0   :  { %5650 = vmatpush3.msra.mxu1 %v6756_v40 }
 0x6d1   :  { %5651 = vmatprep.subr.mxu1 %v6535_v34 }
 0x6d2   :  { %5652 = vmatpush3.msra.mxu1 %v6765_v41 }
 0x6d3   :  { %5653 = vmatprep.subr.mxu1 %v6535_v34 }
 0x6d4   :  { %5654 = vmatpush3.msra.mxu1 %v6774_v42 }
 0x6d5   :  { %5655 = vmatprep.subr.mxu1 %v6535_v34 }
 0x6d6   :  { %5656 = vmatpush3.msra.mxu1 %v6783_v43 }
 0x6d7   :  { %5657 = vmatprep.subr.mxu1 %v6535_v34 }
 0x6d8   :  { %5658 = vmatpush3.msra.mxu1 %v6792_v44  ;;  %v7244_v44 = vld [vmem:[%s8199_s9 + $0x38] sm:$0xff] }
 0x6d9   :  { %5659 = vmatprep.subr.mxu1 %v6535_v34 }
 0x6da   :  { %5660 = vmatpush3.msra.mxu1 %v6806_v46  ;;  %v7251_v46 = vld [vmem:[%s8199_s9 + $0x30] sm:$0xff] }
 0x6db   :  { %5662 = vmatmul.mubr.f32.vlgmr.msra.gmra.mxu1 %v1646_v39  ;;  %5704 = vmatprep.subr.mxu1 %v6535_v34 }
 0x6dc   :  { %5706 = vmatprep.mubr.msk.f32.mxu1 %vm6536_vm5, %v6535_v34 }
 0x77b   :  { %v1637_v40 = vpop.f32.mrf.mxu1 }
 0x77c   :  { %v1641_v41 = vadd.f32 %v1637_v40, %v1492_v36 }
 0x77d   :  { %v5628_v42 = vpop.f32.mrf.mxu1 }
 0x79b   :  { %v1713_v43 = vpop.f32.mrf.mxu1 }
 0x79c   :  { %5665 = vmatpush3.xpose.msk.msra.mxu0 %vm658_vm7, %v1713_v43 }
 0x79d   :  { %v5663_v0 = vpop.f32.mrf.mxu1  ;;  %5669 = vmatprep.subr.mxu0 %v6535_v34 }
 0x79f   :  { %5667 = vmatmul.mubr.msk.f32.vlgmr.msra.gmra.mxu0 %vm658_vm7, %v1713_v43  ;;  %v6495_v43 = vld [vmem:[%s8200_s10] sm:$0xff] }
 0x7a0   :  { %5670 = vmatpush3.msra.mxu0 %v7147_v63  ;;  %5701 = vmatprep.mubr.msk.f32.mxu0 %vm6536_vm5, %v6535_v34 }
 0x7a1   :  { %5671 = vmatprep.subr.mxu0 %v6535_v34 }
 0x7a2   :  { %5672 = vmatpush3.msra.mxu0 %v7097_v59 }
 0x7a3   :  { %5673 = vmatprep.subr.mxu0 %v6535_v34 }
 0x7a4   :  { %5674 = vmatpush3.msra.mxu0 %v7158_v1 }
 0x7a5   :  { %5675 = vmatprep.subr.mxu0 %v6535_v34 }
 0x7a6   :  { %5676 = vmatpush3.msra.mxu0 %v7165_v2 }
 0x7a7   :  { %5677 = vmatprep.subr.mxu0 %v6535_v34 }
 0x7a8   :  { %5678 = vmatpush3.msra.mxu0 %v7172_v3 }
 0x7a9   :  { %5679 = vmatprep.subr.mxu0 %v6535_v34 }
 0x7aa   :  { %5680 = vmatpush3.msra.mxu0 %v7179_v4 }
 0x7ab   :  { %5681 = vmatprep.subr.mxu0 %v6535_v34 }
 0x7ac   :  { %5682 = vmatpush3.msra.mxu0 %v7186_v5 }
 0x7ad   :  { %5683 = vmatprep.subr.mxu0 %v6535_v34 }
 0x7ae   :  { %5684 = vmatpush3.msra.mxu0 %v7193_v6 }
 0x7af   :  { %5685 = vmatprep.subr.mxu0 %v6535_v34 }
 0x7b0   :  { %5686 = vmatpush3.msra.mxu0 %v7244_v44 }
 0x7b1   :  { %5687 = vmatprep.subr.mxu0 %v6535_v34 }
 0x7b2   :  { %5688 = vmatpush3.msra.mxu0 %v7251_v46 }
 0x7b3   :  { %5689 = vmatprep.subr.mxu0 %v6535_v34 }
 0x7b4   :  { %5690 = vmatpush3.msra.mxu0 %v7258_v10 }
 0x7b5   :  { %5691 = vmatprep.subr.mxu0 %v6535_v34 }
 0x7b6   :  { %5692 = vmatpush3.msra.mxu0 %v7266_v13 }
 0x7b7   :  { %5693 = vmatprep.subr.mxu0 %v6535_v34 }
 0x7b8   :  { %5694 = vmatpush3.msra.mxu0 %v7273_v14 }
 0x7b9   :  { %5695 = vmatprep.subr.mxu0 %v6535_v34 }
 0x7ba   :  { %5696 = vmatpush3.msra.mxu0 %v7283_v26 }
 0x7bb   :  { %5697 = vmatprep.subr.mxu0 %v6535_v34 }
 0x7bc   :  { %5698 = vmatpush3.msra.mxu0 %v7290_v27 }
 0x7bd   :  { %5699 = vmatprep.subr.mxu0 %v6535_v34 }
 0x7be   :  { %5700 = vmatpush3.msra.mxu0 %v7298_v29 }
 0x7bf   :  { %5702 = vmatmul.mubr.f32.vlgmr.msra.gmra.mxu0 %v1795_v28  ;;  %5744 = vmatprep.subr.mxu0 %v6535_v34 }
 0x7c0   :  { %5746 = vmatprep.mubr.msk.f32.mxu0 %vm6536_vm5, %v6535_v34 }
 0x85f   :  { %v1786_v30 = vpop.f32.mrf.mxu0 }
 0x860   :  { %v1790_v31 = vadd.f32 %v1786_v30, %v1641_v41  ;;  %v2391_v41 = vrot.slane %v6934_v11, %v6991_v22  ;;  %v7512_v11 = vld [vmem:[%s8193_s3] sm:$0x1] }
 0x861   :  { %v5668_v32 = vpop.f32.mrf.mxu0 }
 0x862   :  { %v2393_v42 = vmul.f32 %v7134_v19, %v2391_v41  ;;  %v6494_v19 = vld [vmem:[%s8200_s10 + $0x8] sm:$0xff] }
 0x87f   :  { %v1862_v33 = vpop.f32.mrf.mxu0 }
 0x880   :  { %5705 = vmatpush3.xpose.msk.msra.mxu1 %vm658_vm7, %v1862_v33 }
 0x881   :  { %v5703_v47 = vpop.f32.mrf.mxu0  ;;  %5709 = vmatprep.subr.mxu1 %v6535_v34 }
 0x883   :  { %5707 = vmatmul.mubr.msk.f32.vlgmr.msra.gmra.mxu1 %vm658_vm7, %v1862_v33 }
 0x884   :  { %5710 = vmatpush3.msra.mxu1 %v7147_v63  ;;  %5741 = vmatprep.mubr.msk.f32.mxu1 %vm6536_vm5, %v6535_v34 }
 0x885   :  { %5711 = vmatprep.subr.mxu1 %v6535_v34 }
 0x886   :  { %5712 = vmatpush3.msra.mxu1 %v7097_v59 }
 0x887   :  { %5713 = vmatprep.subr.mxu1 %v6535_v34 }
 0x888   :  { %5714 = vmatpush3.msra.mxu1 %v7158_v1 }
 0x889   :  { %5715 = vmatprep.subr.mxu1 %v6535_v34 }
 0x88a   :  { %5716 = vmatpush3.msra.mxu1 %v7165_v2 }
 0x88b   :  { %5717 = vmatprep.subr.mxu1 %v6535_v34 }
 0x88c   :  { %5718 = vmatpush3.msra.mxu1 %v7172_v3 }
 0x88d   :  { %5719 = vmatprep.subr.mxu1 %v6535_v34 }
 0x88e   :  { %5720 = vmatpush3.msra.mxu1 %v7179_v4 }
 0x88f   :  { %5721 = vmatprep.subr.mxu1 %v6535_v34 }
 0x890   :  { %5722 = vmatpush3.msra.mxu1 %v7186_v5 }
 0x891   :  { %5723 = vmatprep.subr.mxu1 %v6535_v34 }
 0x892   :  { %5724 = vmatpush3.msra.mxu1 %v7193_v6 }
 0x893   :  { %5725 = vmatprep.subr.mxu1 %v6535_v34 }
 0x894   :  { %5726 = vmatpush3.msra.mxu1 %v7244_v44 }
 0x895   :  { %5727 = vmatprep.subr.mxu1 %v6535_v34 }
 0x896   :  { %5728 = vmatpush3.msra.mxu1 %v7251_v46 }
 0x897   :  { %5729 = vmatprep.subr.mxu1 %v6535_v34 }
 0x898   :  { %5730 = vmatpush3.msra.mxu1 %v7258_v10 }
 0x899   :  { %5731 = vmatprep.subr.mxu1 %v6535_v34 }
 0x89a   :  { %5732 = vmatpush3.msra.mxu1 %v7266_v13 }
 0x89b   :  { %5733 = vmatprep.subr.mxu1 %v6535_v34 }
 0x89c   :  { %5734 = vmatpush3.msra.mxu1 %v7273_v14 }
 0x89d   :  { %5735 = vmatprep.subr.mxu1 %v6535_v34 }
 0x89e   :  { %5736 = vmatpush3.msra.mxu1 %v7283_v26 }
 0x89f   :  { %5737 = vmatprep.subr.mxu1 %v6535_v34 }
 0x8a0   :  { %5738 = vmatpush3.msra.mxu1 %v7290_v27 }
 0x8a1   :  { %5739 = vmatprep.subr.mxu1 %v6535_v34 }
 0x8a2   :  { %5740 = vmatpush3.msra.mxu1 %v7298_v29 }
 0x8a3   :  { %5742 = vmatmul.mubr.f32.vlgmr.msra.gmra.mxu1 %v1944_v50  ;;  %5784 = vmatprep.subr.mxu1 %v6535_v34 }
 0x8a4   :  { %5786 = vmatprep.mubr.msk.f32.mxu1 %vm6536_vm5, %v6535_v34 }
 0x943   :  { %v1935_v51 = vpop.f32.mrf.mxu1 }
 0x944   :  { %v1939_v52 = vadd.f32 %v1935_v51, %v1790_v31 }
 0x945   :  { %v5708_v53 = vpop.f32.mrf.mxu1 }
 0x963   :  { %v2011_v54 = vpop.f32.mrf.mxu1 }
 0x964   :  { %5745 = vmatpush3.xpose.msk.msra.mxu0 %vm658_vm7, %v2011_v54 }
 0x965   :  { %v5743_v55 = vpop.f32.mrf.mxu1  ;;  %5749 = vmatprep.subr.mxu0 %v6535_v34 }
 0x967   :  { %5747 = vmatmul.mubr.msk.f32.vlgmr.msra.gmra.mxu0 %vm658_vm7, %v2011_v54 }
 0x968   :  { %5750 = vmatpush3.msra.mxu0 %v7147_v63  ;;  %5781 = vmatprep.mubr.msk.f32.mxu0 %vm6536_vm5, %v6535_v34 }
 0x969   :  { %5751 = vmatprep.subr.mxu0 %v6535_v34 }
 0x96a   :  { %5752 = vmatpush3.msra.mxu0 %v7097_v59 }
 0x96b   :  { %5753 = vmatprep.subr.mxu0 %v6535_v34 }
 0x96c   :  { %5754 = vmatpush3.msra.mxu0 %v7158_v1 }
 0x96d   :  { %5755 = vmatprep.subr.mxu0 %v6535_v34 }
 0x96e   :  { %5756 = vmatpush3.msra.mxu0 %v7165_v2 }
 0x96f   :  { %5757 = vmatprep.subr.mxu0 %v6535_v34 }
 0x970   :  { %5758 = vmatpush3.msra.mxu0 %v7172_v3 }
 0x971   :  { %5759 = vmatprep.subr.mxu0 %v6535_v34 }
 0x972   :  { %5760 = vmatpush3.msra.mxu0 %v7179_v4 }
 0x973   :  { %5761 = vmatprep.subr.mxu0 %v6535_v34 }
 0x974   :  { %5762 = vmatpush3.msra.mxu0 %v7186_v5 }
 0x975   :  { %5763 = vmatprep.subr.mxu0 %v6535_v34 }
 0x976   :  { %5764 = vmatpush3.msra.mxu0 %v7193_v6 }
 0x977   :  { %5765 = vmatprep.subr.mxu0 %v6535_v34 }
 0x978   :  { %5766 = vmatpush3.msra.mxu0 %v7244_v44 }
 0x979   :  { %5767 = vmatprep.subr.mxu0 %v6535_v34 }
 0x97a   :  { %5768 = vmatpush3.msra.mxu0 %v7251_v46 }
 0x97b   :  { %5769 = vmatprep.subr.mxu0 %v6535_v34 }
 0x97c   :  { %5770 = vmatpush3.msra.mxu0 %v7258_v10 }
 0x97d   :  { %5771 = vmatprep.subr.mxu0 %v6535_v34 }
 0x97e   :  { %5772 = vmatpush3.msra.mxu0 %v7266_v13 }
 0x97f   :  { %5773 = vmatprep.subr.mxu0 %v6535_v34 }
 0x980   :  { %5774 = vmatpush3.msra.mxu0 %v7273_v14 }
 0x981   :  { %5775 = vmatprep.subr.mxu0 %v6535_v34 }
 0x982   :  { %5776 = vmatpush3.msra.mxu0 %v7283_v26 }
 0x983   :  { %5777 = vmatprep.subr.mxu0 %v6535_v34 }
 0x984   :  { %5778 = vmatpush3.msra.mxu0 %v7290_v27 }
 0x985   :  { %5779 = vmatprep.subr.mxu0 %v6535_v34 }
 0x986   :  { %5780 = vmatpush3.msra.mxu0 %v7298_v29 }
 0x987   :  { %5782 = vmatmul.mubr.f32.vlgmr.msra.gmra.mxu0 %v2093_v17  ;;  %5824 = vmatprep.subr.mxu0 %v6535_v34 }
 0x988   :  { %5826 = vmatprep.mubr.msk.f32.mxu0 %vm6536_vm5, %v6535_v34 }
 0xa27   :  { %v2084_v18 = vpop.f32.mrf.mxu0 }
 0xa28   :  { %v2088_v9 = vadd.f32 %v2084_v18, %v1939_v52 }
 0xa29   :  { %v5748_v20 = vpop.f32.mrf.mxu0 }
 0xa47   :  { %v2160_v35 = vpop.f32.mrf.mxu0 }
 0xa48   :  { %5785 = vmatpush3.xpose.msk.msra.mxu1 %vm658_vm7, %v2160_v35 }
 0xa49   :  { %v5783_v36 = vpop.f32.mrf.mxu0  ;;  %5789 = vmatprep.subr.mxu1 %v6535_v34 }
 0xa4b   :  { %5787 = vmatmul.mubr.msk.f32.vlgmr.msra.gmra.mxu1 %vm658_vm7, %v2160_v35 }
 0xa4c   :  { %5790 = vmatpush3.msra.mxu1 %v7147_v63  ;;  %5821 = vmatprep.mubr.msk.f32.mxu1 %vm6536_vm5, %v6535_v34 }
 0xa4d   :  { %5791 = vmatprep.subr.mxu1 %v6535_v34 }
 0xa4e   :  { %5792 = vmatpush3.msra.mxu1 %v7097_v59 }
 0xa4f   :  { %5793 = vmatprep.subr.mxu1 %v6535_v34 }
 0xa50   :  { %5794 = vmatpush3.msra.mxu1 %v7158_v1 }
 0xa51   :  { %5795 = vmatprep.subr.mxu1 %v6535_v34 }
 0xa52   :  { %5796 = vmatpush3.msra.mxu1 %v7165_v2 }
 0xa53   :  { %5797 = vmatprep.subr.mxu1 %v6535_v34 }
 0xa54   :  { %5798 = vmatpush3.msra.mxu1 %v7172_v3 }
 0xa55   :  { %5799 = vmatprep.subr.mxu1 %v6535_v34 }
 0xa56   :  { %5800 = vmatpush3.msra.mxu1 %v7179_v4 }
 0xa57   :  { %5801 = vmatprep.subr.mxu1 %v6535_v34 }
 0xa58   :  { %5802 = vmatpush3.msra.mxu1 %v7186_v5 }
 0xa59   :  { %5803 = vmatprep.subr.mxu1 %v6535_v34 }
 0xa5a   :  { %5804 = vmatpush3.msra.mxu1 %v7193_v6 }
 0xa5b   :  { %5805 = vmatprep.subr.mxu1 %v6535_v34 }
 0xa5c   :  { %5806 = vmatpush3.msra.mxu1 %v7244_v44 }
 0xa5d   :  { %5807 = vmatprep.subr.mxu1 %v6535_v34 }
 0xa5e   :  { %5808 = vmatpush3.msra.mxu1 %v7251_v46 }
 0xa5f   :  { %5809 = vmatprep.subr.mxu1 %v6535_v34 }
 0xa60   :  { %5810 = vmatpush3.msra.mxu1 %v7258_v10 }
 0xa61   :  { %5811 = vmatprep.subr.mxu1 %v6535_v34 }
 0xa62   :  { %5812 = vmatpush3.msra.mxu1 %v7266_v13 }
 0xa63   :  { %5813 = vmatprep.subr.mxu1 %v6535_v34 }
 0xa64   :  { %5814 = vmatpush3.msra.mxu1 %v7273_v14 }
 0xa65   :  { %5815 = vmatprep.subr.mxu1 %v6535_v34 }
 0xa66   :  { %5816 = vmatpush3.msra.mxu1 %v7283_v26 }
 0xa67   :  { %5817 = vmatprep.subr.mxu1 %v6535_v34 }
 0xa68   :  { %5818 = vmatpush3.msra.mxu1 %v7290_v27 }
 0xa69   :  { %5819 = vmatprep.subr.mxu1 %v6535_v34 }
 0xa6a   :  { %5820 = vmatpush3.msra.mxu1 %v7298_v29 }
 0xa6b   :  { %5822 = vmatmul.mubr.f32.vlgmr.msra.gmra.mxu1 %v2242_v60  ;;  %5864 = vmatprep.subr.mxu1 %v6535_v34 }
 0xa6c   :  { %5866 = vmatprep.mubr.msk.f32.mxu1 %vm6536_vm5, %v6535_v34 }
 0xb0b   :  { %v2233_v7 = vpop.f32.mrf.mxu1 }
 0xb0c   :  { %v7434_v62 = vadd.f32 %v2233_v7, %v2088_v9 }
 0xb0d   :  { %v5788_v38 = vpop.f32.mrf.mxu1 }
 0xb2b   :  { %v2309_v39 = vpop.f32.mrf.mxu1 }
 0xb2c   :  { %5825 = vmatpush3.xpose.msk.msra.mxu0 %vm658_vm7, %v2309_v39 }
 0xb2d   :  { %v5823_v40 = vpop.f32.mrf.mxu1  ;;  %5829 = vmatprep.subr.mxu0 %v6535_v34 }
 0xb2f   :  { %5827 = vmatmul.mubr.msk.f32.vlgmr.msra.gmra.mxu0 %vm658_vm7, %v2309_v39 }
 0xb30   :  { %5830 = vmatpush3.msra.mxu0 %v7147_v63  ;;  %5861 = vmatprep.mubr.msk.f32.mxu0 %vm6536_vm5, %v6535_v34 }
 0xb31   :  { %5831 = vmatprep.subr.mxu0 %v6535_v34 }
 0xb32   :  { %5832 = vmatpush3.msra.mxu0 %v7097_v59 }
 0xb33   :  { %5833 = vmatprep.subr.mxu0 %v6535_v34 }
 0xb34   :  { %5834 = vmatpush3.msra.mxu0 %v7158_v1 }
 0xb35   :  { %5835 = vmatprep.subr.mxu0 %v6535_v34 }
 0xb36   :  { %5836 = vmatpush3.msra.mxu0 %v7165_v2 }
 0xb37   :  { %5837 = vmatprep.subr.mxu0 %v6535_v34 }
 0xb38   :  { %5838 = vmatpush3.msra.mxu0 %v7172_v3 }
 0xb39   :  { %5839 = vmatprep.subr.mxu0 %v6535_v34 }
 0xb3a   :  { %5840 = vmatpush3.msra.mxu0 %v7179_v4 }
 0xb3b   :  { %5841 = vmatprep.subr.mxu0 %v6535_v34 }
 0xb3c   :  { %5842 = vmatpush3.msra.mxu0 %v7186_v5 }
 0xb3d   :  { %5843 = vmatprep.subr.mxu0 %v6535_v34 }
 0xb3e   :  { %5844 = vmatpush3.msra.mxu0 %v7193_v6 }
 0xb3f   :  { %5845 = vmatprep.subr.mxu0 %v6535_v34 }
 0xb40   :  { %5846 = vmatpush3.msra.mxu0 %v7244_v44 }
 0xb41   :  { %5847 = vmatprep.subr.mxu0 %v6535_v34 }
 0xb42   :  { %5848 = vmatpush3.msra.mxu0 %v7251_v46 }
 0xb43   :  { %5849 = vmatprep.subr.mxu0 %v6535_v34 }
 0xb44   :  { %5850 = vmatpush3.msra.mxu0 %v7258_v10 }
 0xb45   :  { %5851 = vmatprep.subr.mxu0 %v6535_v34 }
 0xb46   :  { %5852 = vmatpush3.msra.mxu0 %v7266_v13 }
 0xb47   :  { %5853 = vmatprep.subr.mxu0 %v6535_v34 }
 0xb48   :  { %5854 = vmatpush3.msra.mxu0 %v7273_v14 }
 0xb49   :  { %5855 = vmatprep.subr.mxu0 %v6535_v34 }
 0xb4a   :  { %5856 = vmatpush3.msra.mxu0 %v7283_v26 }
 0xb4b   :  { %5857 = vmatprep.subr.mxu0 %v6535_v34 }
 0xb4c   :  { %5858 = vmatpush3.msra.mxu0 %v7290_v27 }
 0xb4d   :  { %5859 = vmatprep.subr.mxu0 %v6535_v34 }
 0xb4e   :  { %5860 = vmatpush3.msra.mxu0 %v7298_v29 }
 0xb4f   :  { %5862 = vmatmul.mubr.f32.vlgmr.msra.gmra.mxu0 %v2393_v42  ;;  %5904 = vmatprep.subr.mxu0 %v6535_v34 }
 0xb50   :  { %5905 = vmatpush3.msra.mxu0 %v7147_v63  ;;  %5936 = vmatprep.mubr.msk.f32.mxu0 %vm6536_vm5, %v6535_v34 }
 0xb51   :  { %5906 = vmatprep.subr.mxu0 %v6535_v34 }
 0xb52   :  { %5907 = vmatpush3.msra.mxu0 %v7097_v59 }
 0xb53   :  { %5908 = vmatprep.subr.mxu0 %v6535_v34 }
 0xb54   :  { %5909 = vmatpush3.msra.mxu0 %v7158_v1 }
 0xb55   :  { %5910 = vmatprep.subr.mxu0 %v6535_v34 }
 0xb56   :  { %5911 = vmatpush3.msra.mxu0 %v7165_v2 }
 0xb57   :  { %5912 = vmatprep.subr.mxu0 %v6535_v34 }
 0xb58   :  { %5913 = vmatpush3.msra.mxu0 %v7172_v3 }
 0xb59   :  { %5914 = vmatprep.subr.mxu0 %v6535_v34 }
 0xb5a   :  { %5915 = vmatpush3.msra.mxu0 %v7179_v4 }
 0xb5b   :  { %5916 = vmatprep.subr.mxu0 %v6535_v34 }
 0xb5c   :  { %5917 = vmatpush3.msra.mxu0 %v7186_v5 }
 0xb5d   :  { %5918 = vmatprep.subr.mxu0 %v6535_v34 }
 0xb5e   :  { %5919 = vmatpush3.msra.mxu0 %v7193_v6 }
 0xb5f   :  { %5920 = vmatprep.subr.mxu0 %v6535_v34 }
 0xb60   :  { %5921 = vmatpush3.msra.mxu0 %v7244_v44 }
 0xb61   :  { %5922 = vmatprep.subr.mxu0 %v6535_v34 }
 0xb62   :  { %5923 = vmatpush3.msra.mxu0 %v7251_v46 }
 0xb63   :  { %5924 = vmatprep.subr.mxu0 %v6535_v34 }
 0xb64   :  { %5925 = vmatpush3.msra.mxu0 %v7258_v10 }
 0xb65   :  { %5926 = vmatprep.subr.mxu0 %v6535_v34 }
 0xb66   :  { %5927 = vmatpush3.msra.mxu0 %v7266_v13 }
 0xb67   :  { %5928 = vmatprep.subr.mxu0 %v6535_v34 }
 0xb68   :  { %5929 = vmatpush3.msra.mxu0 %v7273_v14 }
 0xb69   :  { %5930 = vmatprep.subr.mxu0 %v6535_v34 }
 0xb6a   :  { %5931 = vmatpush3.msra.mxu0 %v7283_v26 }
 0xb6b   :  { %5932 = vmatprep.subr.mxu0 %v6535_v34 }
 0xb6c   :  { %5933 = vmatpush3.msra.mxu0 %v7290_v27 }
 0xb6d   :  { %5934 = vmatprep.subr.mxu0 %v6535_v34 }
 0xb6e   :  { %5935 = vmatpush3.msra.mxu0 %v7298_v29 }
 0xb6f   :  { %5937 = vmatmul.mubr.f32.vlgmr.msra.gmra.mxu0 %v7512_v11  ;;  %5946 = vmatprep.subr.mxu0 %v6535_v34 }
 0xb70   :  { %5947 = vmatpush3.msra.mxu0 %v6494_v19  ;;  %5950 = vmatprep.mubr.msk.f32.mxu0 %vm6536_vm5, %v6535_v34 }
 0xb71   :  { %5948 = vmatprep.subr.mxu0 %v6535_v34 }
 0xb72   :  { %5949 = vmatpush3.msra.mxu0 %v6495_v43 }
 0xb73   :  { %5988 = vmatprep.subr.mxu0 %v6535_v34 }
 0xbef   :  { %v2382_v0 = vpop.f32.mrf.mxu0 }
 0xbf0   :  { %v7527_v15 = vadd.f32 %v2382_v0, %v7434_v62 }
 0xbf1   :  { %v5828_v28 = vpop.f32.mrf.mxu0 }
 0xc0f   :  { %v2460_v30 = vpop.f32.mrf.mxu0 }
 0xc10   :  { %5865 = vmatpush3.xpose.msk.msra.mxu1 %vm658_vm7, %v2460_v30 }
 0xc11   :  { %v5863_v31 = vpop.f32.mrf.mxu0  ;;  %5869 = vmatprep.subr.mxu1 %v7147_v63 }
 0xc13   :  { %5867 = vmatmul.mubr.msk.f32.vlgmr.msra.gmra.mxu1 %vm658_vm7, %v2460_v30 }
 0xc14   :  { %5870 = vmatpush3.msra.mxu1 %v7147_v63  ;;  %5901 = vmatprep.mubr.f32.mxu1 %v6861_v23 }
 0xc15   :  { %5871 = vmatprep.subr.mxu1 %v7097_v59 }
 0xc16   :  { %5872 = vmatpush3.msra.mxu1 %v7097_v59 }
 0xc17   :  { %5873 = vmatprep.subr.mxu1 %v7158_v1 }
 0xc18   :  { %5874 = vmatpush3.msra.mxu1 %v7158_v1 }
 0xc19   :  { %5875 = vmatprep.subr.mxu1 %v7165_v2 }
 0xc1a   :  { %5876 = vmatpush3.msra.mxu1 %v7165_v2 }
 0xc1b   :  { %5877 = vmatprep.subr.mxu1 %v7172_v3 }
 0xc1c   :  { %5878 = vmatpush3.msra.mxu1 %v7172_v3 }
 0xc1d   :  { %5879 = vmatprep.subr.mxu1 %v7179_v4 }
 0xc1e   :  { %5880 = vmatpush3.msra.mxu1 %v7179_v4 }
 0xc1f   :  { %5881 = vmatprep.subr.mxu1 %v7186_v5 }
 0xc20   :  { %5882 = vmatpush3.msra.mxu1 %v7186_v5 }
 0xc21   :  { %5883 = vmatprep.subr.mxu1 %v7193_v6 }
 0xc22   :  { %5884 = vmatpush3.msra.mxu1 %v7193_v6 }
 0xc23   :  { %5885 = vmatprep.subr.mxu1 %v7244_v44 }
 0xc24   :  { %5886 = vmatpush3.msra.mxu1 %v7244_v44 }
 0xc25   :  { %5887 = vmatprep.subr.mxu1 %v7251_v46 }
 0xc26   :  { %5888 = vmatpush3.msra.mxu1 %v7251_v46 }
 0xc27   :  { %5889 = vmatprep.subr.mxu1 %v7258_v10 }
 0xc28   :  { %5890 = vmatpush3.msra.mxu1 %v7258_v10 }
 0xc29   :  { %5891 = vmatprep.subr.mxu1 %v7266_v13 }
 0xc2a   :  { %5892 = vmatpush3.msra.mxu1 %v7266_v13 }
 0xc2b   :  { %5893 = vmatprep.subr.mxu1 %v7273_v14 }
 0xc2c   :  { %5894 = vmatpush3.msra.mxu1 %v7273_v14 }
 0xc2d   :  { %5895 = vmatprep.subr.mxu1 %v7283_v26 }
 0xc2e   :  { %5896 = vmatpush3.msra.mxu1 %v7283_v26 }
 0xc2f   :  { %5897 = vmatprep.subr.mxu1 %v7290_v27  ;;  %v2710_v32 = vpop.f32.mrf.mxu0 }
 0xc30   :  { %v7561_v33 = vmul.f32 0.125, %v2710_v32  ;;  %5898 = vmatpush3.msra.mxu1 %v7290_v27 }
 0xc31   :  { %5899 = vmatprep.subr.mxu1 %v7298_v29  ;;  %v5938_v47 = vpop.f32.mrf.mxu0 }
 0xc32   :  { %5900 = vmatpush3.msra.mxu1 %v7298_v29  ;;  %5951 = vmatmul.mubr.msk.f32.vlgmr.msra.gmra.mxu0 %vm658_vm7, %v7561_v33 }
 0xc33   :  { %5902 = vmatmul.mubr.f32.vlgmr.msra.gmra.mxu1 %v6863_v24  ;;  %5989 = vmatpush3.msra.mxu0 %v7147_v63 }
 0xc34   :  { %5990 = vmatprep.subr.mxu0 %v6535_v34  ;;  %5939 = vmatprep.subr.mxu1 %v6494_v19 }
 0xc35   :  { %5991 = vmatpush3.msra.mxu0 %v7097_v59  ;;  %5940 = vmatpush3.msra.mxu1 %v6494_v19 }
 0xc36   :  { %5992 = vmatprep.subr.mxu0 %v6535_v34  ;;  %6020 = vmatprep.mubr.msk.f32.mxu0 %vm6536_vm5, %v6535_v34 }
 0xc37   :  { %5993 = vmatpush3.msra.mxu0 %v7158_v1  ;;  %5941 = vmatprep.subr.mxu1 %v6495_v43 }
 0xc38   :  { %5994 = vmatprep.subr.mxu0 %v6535_v34  ;;  %5942 = vmatpush3.msra.mxu1 %v6495_v43 }
 0xc39   :  { %5995 = vmatpush3.msra.mxu0 %v7165_v2  ;;  %5953 = vmatprep.subr.mxu1 %v7147_v63 }
 0xc3a   :  { %5996 = vmatprep.subr.mxu0 %v6535_v34 }
 0xc3b   :  { %5997 = vmatpush3.msra.mxu0 %v7172_v3 }
 0xc3c   :  { %5998 = vmatprep.subr.mxu0 %v6535_v34 }
 0xc3d   :  { %5999 = vmatpush3.msra.mxu0 %v7179_v4 }
 0xc3e   :  { %6000 = vmatprep.subr.mxu0 %v6535_v34 }
 0xc3f   :  { %6001 = vmatpush3.msra.mxu0 %v7186_v5 }
 0xc40   :  { %6002 = vmatprep.subr.mxu0 %v6535_v34 }
 0xc41   :  { %6003 = vmatpush3.msra.mxu0 %v7193_v6 }
 0xc42   :  { %6004 = vmatprep.subr.mxu0 %v6535_v34 }
 0xc43   :  { %6005 = vmatpush3.msra.mxu0 %v7244_v44 }
 0xc44   :  { %6006 = vmatprep.subr.mxu0 %v6535_v34 }
 0xc45   :  { %6007 = vmatpush3.msra.mxu0 %v7251_v46 }
 0xc46   :  { %6008 = vmatprep.subr.mxu0 %v6535_v34 }
 0xc47   :  { %6009 = vmatpush3.msra.mxu0 %v7258_v10 }
 0xc48   :  { %6010 = vmatprep.subr.mxu0 %v6535_v34 }
 0xc49   :  { %6011 = vmatpush3.msra.mxu0 %v7266_v13 }
 0xc4a   :  { %6012 = vmatprep.subr.mxu0 %v6535_v34 }
 0xc4b   :  { %6013 = vmatpush3.msra.mxu0 %v7273_v14 }
 0xc4c   :  { %6014 = vmatprep.subr.mxu0 %v6535_v34 }
 0xc4d   :  { %6015 = vmatpush3.msra.mxu0 %v7283_v26 }
 0xc4e   :  { %6016 = vmatprep.subr.mxu0 %v6535_v34 }
 0xc4f   :  { %6017 = vmatpush3.msra.mxu0 %v7290_v27 }
 0xc50   :  { %6018 = vmatprep.subr.mxu0 %v6535_v34 }
 0xc51   :  { %6019 = vmatpush3.msra.mxu0 %v7298_v29 }
 0xc52   :  { %6058 = vmatprep.subr.mxu0 %v6535_v34 }
 0xcd3   :  { %v2533_v49 = vpop.f32.mrf.mxu1 }
 0xcd4   :  { %v2537_v50 = vadd.f32 %v2533_v49, %v7527_v15 }
 0xcd5   :  { %v5868_v51 = vpop.f32.mrf.mxu1 }
 0xcd6   :  { %v2538_v52 = vmul.f32 %v2537_v50, %v2537_v50 }
 0xcd8   :  { %v2539_v53 = vsel %vm76_vm0, %v2538_v52, 0.0 }
 0xcd9   :  { %2540 = vadd.xlane.f32.xlu0 %v2539_v53 }
 0xcf2   :  { %v2867_v54 = vpop.f32.mrf.mxu0 }
 0xcf3   :  { %v7607_v55 = vsub.f32 %v7512_v11, %v2867_v54  ;;  %v5903_v56 = vpop.f32.mrf.mxu1 }
 0xcf4   :  { %v5952_v17 = vpop.f32.mrf.mxu0  ;;  %v2643_v35 = vmul.f32 0.125, %v5903_v56 }
 0xcf5   :  { %v2949_v18 = vmul.f32 %v7607_v55, %v7607_v55  ;;  %v2633_v9 = vpop.f32.mrf.mxu1 }
 0xcf6   :  { %v2642_v20 = vmul.f32 0.125, %v2633_v9 }
 0xcf7   :  { %6021 = vmatmul.mubr.f32.vlgmr.msra.gmra.mxu0 %v2949_v18  ;;  %v7738_v18 = vld [vmem:[%s8199_s9 + $0x40] sm:$0xff] }
 0xcf8   :  { %5943 = vmatprep.mubr.msk.f32.mxu1 %vm658_vm7, %v2642_v20  ;;  %6059 = vmatpush3.msra.mxu0 %v7147_v63 }
 0xcf9   :  { %5944 = vmatmul.mubr.msk.f32.vlgmr.msra.gmra.mxu1 %vm658_vm7, %v2643_v35  ;;  %6060 = vmatprep.subr.mxu0 %v6535_v34 }
 0xcfa   :  { %5954 = vmatpush3.msra.mxu1 %v7147_v63  ;;  %6061 = vmatpush3.msra.mxu0 %v7097_v59 }
 0xcfb   :  { %5955 = vmatprep.subr.mxu1 %v7097_v59  ;;  %6062 = vmatprep.subr.mxu0 %v6535_v34 }
 0xcfc   :  { %5956 = vmatpush3.msra.mxu1 %v7097_v59  ;;  %6063 = vmatpush3.msra.mxu0 %v7158_v1  ;;  %v2559_v59 = vrot.slane %v7085_v61, 4 }
 0xcfd   :  { %5957 = vmatprep.subr.mxu1 %v7158_v1  ;;  %6064 = vmatprep.subr.mxu0 %v6535_v34 }
 0xcfe   :  { %5958 = vmatpush3.msra.mxu1 %v7158_v1  ;;  %6065 = vmatpush3.msra.mxu0 %v7165_v2 }
 0xcff   :  { %5959 = vmatprep.subr.mxu1 %v7165_v2  ;;  %6066 = vmatprep.subr.mxu0 %v6535_v34 }
 0xd00   :  { %5960 = vmatpush3.msra.mxu1 %v7165_v2  ;;  %6067 = vmatpush3.msra.mxu0 %v7172_v3 }
 0xd01   :  { %5961 = vmatprep.subr.mxu1 %v7172_v3  ;;  %6068 = vmatprep.subr.mxu0 %v6535_v34 }
 0xd02   :  { %5962 = vmatpush3.msra.mxu1 %v7172_v3  ;;  %6069 = vmatpush3.msra.mxu0 %v7179_v4 }
 0xd03   :  { %5963 = vmatprep.subr.mxu1 %v7179_v4  ;;  %6070 = vmatprep.subr.mxu0 %v6535_v34 }
 0xd04   :  { %5964 = vmatpush3.msra.mxu1 %v7179_v4  ;;  %6071 = vmatpush3.msra.mxu0 %v7186_v5  ;;  %v2560_v4 = vadd.f32 %v2559_v59, %v7085_v61  ;;  %v4607_v61 = vmax.f32 %v7561_v33, 1e-12 }
 0xd05   :  { %5965 = vmatprep.subr.mxu1 %v7186_v5  ;;  %6072 = vmatprep.subr.mxu0 %v6535_v34 }
 0xd06   :  { %5966 = vmatpush3.msra.mxu1 %v7186_v5  ;;  %6073 = vmatpush3.msra.mxu0 %v7193_v6  ;;  %v2561_v5 = vrot.slane %v2560_v4, 2 }
 0xd07   :  { %5967 = vmatprep.subr.mxu1 %v7193_v6  ;;  %6074 = vmatprep.subr.mxu0 %v6535_v34 }
 0xd08   :  { %5968 = vmatpush3.msra.mxu1 %v7193_v6  ;;  %6075 = vmatpush3.msra.mxu0 %v7244_v44  ;;  %v2562_v60 = vadd.f32 %v2561_v5, %v2560_v4 }
 0xd09   :  { %5969 = vmatprep.subr.mxu1 %v7244_v44  ;;  %6076 = vmatprep.subr.mxu0 %v6535_v34 }
 0xd0a   :  { %5970 = vmatpush3.msra.mxu1 %v7244_v44  ;;  %6077 = vmatpush3.msra.mxu0 %v7251_v46  ;;  %v2563_v38 = vrot.slane %v2562_v60, 1 }
 0xd0b   :  { %5971 = vmatprep.subr.mxu1 %v7251_v46  ;;  %6078 = vmatprep.subr.mxu0 %v6535_v34 }
 0xd0c   :  { %5972 = vmatpush3.msra.mxu1 %v7251_v46  ;;  %6079 = vmatpush3.msra.mxu0 %v7258_v10  ;;  %v2564_v41 = vadd.f32 %v2563_v38, %v2562_v60  ;;  %v7774_v60 = vld [vmem:[%s8199_s9 + $0x78] sm:$0xff]  ;;  %v7792_v38 = vld [vmem:[%s8199_s9 + $0x60] sm:$0xff] }
 0xd0d   :  { %5973 = vmatprep.subr.mxu1 %v7258_v10  ;;  %6080 = vmatprep.subr.mxu0 %v6535_v34 }
 0xd0e   :  { %5974 = vmatpush3.msra.mxu1 %v7258_v10  ;;  %6081 = vmatpush3.msra.mxu0 %v7266_v13 }
 0xd0f   :  { %5975 = vmatprep.subr.mxu1 %v7266_v13  ;;  %6082 = vmatprep.subr.mxu0 %v6535_v34 }
 0xd10   :  { %5976 = vmatpush3.msra.mxu1 %v7266_v13  ;;  %6083 = vmatpush3.msra.mxu0 %v7273_v14 }
 0xd11   :  { %5977 = vmatprep.subr.mxu1 %v7273_v14  ;;  %6084 = vmatprep.subr.mxu0 %v6535_v34 }
 0xd12   :  { %5978 = vmatpush3.msra.mxu1 %v7273_v14  ;;  %6085 = vmatpush3.msra.mxu0 %v7283_v26 }
 0xd13   :  { %5979 = vmatprep.subr.mxu1 %v7283_v26  ;;  %6086 = vmatprep.subr.mxu0 %v6535_v34 }
 0xd14   :  { %5980 = vmatpush3.msra.mxu1 %v7283_v26  ;;  %6087 = vmatpush3.msra.mxu0 %v7290_v27 }
 0xd15   :  { %5981 = vmatprep.subr.mxu1 %v7290_v27  ;;  %6088 = vmatprep.subr.mxu0 %v6535_v34 }
 0xd16   :  { %5982 = vmatpush3.msra.mxu1 %v7290_v27  ;;  %6089 = vmatpush3.msra.mxu0 %v7298_v29 }
 0xd17   :  { %5983 = vmatprep.subr.mxu1 %v7298_v29  ;;  %6090 = vmatprep.mubr.msk.f32.mxu0 %vm6536_vm5, %v6535_v34 }
 0xd18   :  { %5984 = vmatpush3.msra.mxu1 %v7298_v29  ;;  %6098 = vmatprep.subr.mxu0 %v6535_v34 }
 0xd19   :  { %6023 = vmatprep.subr.mxu1 %v6535_v34 }
 0xd62   :  { %v2541_v6 = vpop.xlane.xlu0 %2540 }
 0xd63   :  { %v2542_v36 = vrot.slane %v2541_v6, 4 }
 0xd65   :  { %v2543_v37 = vadd.f32 %v2542_v36, %v2541_v6 }
 0xd67   :  { %v2544_v7 = vrot.slane %v2543_v37, 2 }
 0xd69   :  { %v2545_v62 = vadd.f32 %v2544_v7, %v2543_v37 }
 0xd6b   :  { %v2546_v39 = vrot.slane %v2545_v62, 1 }
 0xd6d   :  { %v2547_v40 = vadd.f32 %v2546_v39, %v2545_v62  ;;  %v7785_v62 = vld [vmem:[%s8199_s9 + $0x68] sm:$0xff]  ;;  %v7799_v39 = vld [vmem:[%s8199_s9 + $0x58] sm:$0xff] }
 0xd6f   :  { %6435 = vpush %v2547_v40 }
 0xd70   :  { %6437 = vpush %v2564_v41 }
 0xdb7   :  { %v3016_v42 = vpop.f32.mrf.mxu0 }
 0xdb8   :  { %v3038_v11 = vmul.f32 0.14285715, %v3016_v42  ;;  %v3091_v19 = vmul.f32 %v3016_v42, %v3016_v42 }
 0xdb9   :  { %v5945_v43 = vpop.f32.mrf.mxu1  ;;  %v6022_v0 = vpop.f32.mrf.mxu0 }
 0xdba   :  { %v3039_v15 = vadd.f32 0.0001, %v3038_v11  ;;  %v3092_v28 = vsel %vm996_vm6, %v3091_v19, 0.0  ;;  %v7684_v30 = vsub.f32 %v6863_v24, %v5945_v43  ;;  %v7699_v24 = vld [vmem:[%s8198_s8] sm:$0xff]  ;;  %v7812_v0 = vld [vmem:[%s8199_s9 + $0x38] sm:$0xff] }
 0xdbb   :  { %v2787_v31 = vpop.f32.mrf.mxu1  ;;  %3093 = vadd.xlane.f32.xlu1 %v3092_v28 }
 0xdbc   :  { %6468 = vrsqrt.f32 %v3039_v15  ;;  %v7687_v32 = vsub.f32 %v6861_v23, %v2787_v31  ;;  %v2873_v50 = vmul.f32 %v7684_v30, %v7684_v30  ;;  %vm3042_vm14 = vcmp.eq.f32.partialorder %v3039_v15, inf }
 0xdbd   :  { %6470 = vlog2.f32 %v4607_v61  ;;  %v3045_v51 = vand.u32 2147483648, %v3039_v15  ;;  %vm3044_vm15 = vcmp.eq.f32.partialorder %v3039_v15, 0.0 }
 0xdbe   :  { %v2872_v47 = vmul.f32 %v7687_v32, %v7687_v32  ;;  %v3181_v49 = vrot.slane %v7687_v32, %v1125_v25  ;;  %v7709_v25 = vld [vmem:[%s8199_s9 + $0x70] sm:$0xff] }
 0xdc0   :  { %5985 = vmatprep.mubr.f32.mxu1 %v2872_v47  ;;  %v3182_v23 = vmul.f32 %v7699_v24, %v3181_v49  ;;  %v7819_v47 = vld [vmem:[%s8199_s9 + $0x30] sm:$0xff] }
 0xdc1   :  { %5986 = vmatmul.mubr.f32.vlgmr.msra.gmra.mxu1 %v2873_v50 }
 0xdc2   :  { %6024 = vmatpush3.msra.mxu1 %v7147_v63  ;;  %6091 = vmatmul.mubr.f32.vlgmr.msra.gmra.mxu0 %v3182_v23 }
 0xdc3   :  { %6025 = vmatprep.subr.mxu1 %v6535_v34  ;;  %6055 = vmatprep.mubr.msk.f32.mxu1 %vm6536_vm5, %v6535_v34 }
 0xdc4   :  { %6026 = vmatpush3.msra.mxu1 %v7709_v25  ;;  %6100 = vmatprep.mubr.msk.f32.mxu0 %vm6536_vm5, %v6535_v34 }
 0xdc5   :  { %6027 = vmatprep.subr.mxu1 %v6535_v34 }
 0xdc6   :  { %6028 = vmatpush3.msra.mxu1 %v7158_v1  ;;  %v7724_v1 = vld [vmem:[%s8199_s9 + $0x50] sm:$0xff] }
 0xdc7   :  { %6029 = vmatprep.subr.mxu1 %v6535_v34 }
 0xdc8   :  { %6030 = vmatpush3.msra.mxu1 %v7165_v2 }
 0xdc9   :  { %v6469_v63 = vpop.eup %6468  ;;  %6031 = vmatprep.subr.mxu1 %v6535_v34 }
 0xdca   :  { %6032 = vmatpush3.msra.mxu1 %v7172_v3  ;;  %v3041_v52 = vmul.f32 %v6469_v63, %v3039_v15  ;;  %v6471_v53 = vpop.eup %6470  ;;  %v7731_v3 = vld [vmem:[%s8199_s9 + $0x48] sm:$0xff] }
 0xdcb   :  { %6033 = vmatprep.subr.mxu1 %v6535_v34  ;;  %v4609_v17 = vmul.f32 0.6931472, %v6471_v53  ;;  %v7826_v63 = vld [vmem:[%s8199_s9 + $0x28] sm:$0xff] }
 0xdcc   :  { %6034 = vmatpush3.msra.mxu1 %v7724_v1  ;;  %v3043_v2 = vsel %vm3042_vm14, %v3039_v15, %v3041_v52  ;;  %v7833_v52 = vld [vmem:[%s8199_s9 + $0x20] sm:$0xff] }
 0xdcd   :  { %6035 = vmatprep.subr.mxu1 %v6535_v34  ;;  %v3046_v54 = vsel %vm3044_vm15, %v3045_v51, %v3043_v2  ;;  %v4610_v35 = vmul.f32 %v4609_v17, %v7561_v33  ;;  %v3402_v17 = vrot.slane %v7687_v32, %v1346_v58 }
 0xdce   :  { %6036 = vmatpush3.msra.mxu1 %v7731_v3  ;;  %v3063_v56 = vsub.f32 1.0, %v3046_v54  ;;  %v7842_v54 = vld [vmem:[%s8199_s9 + $0x18] sm:$0xff] }
 0xdcf   :  { %6037 = vmatprep.subr.mxu1 %v6535_v34  ;;  %v4611_v59 = vsel %vm996_vm6, %v4610_v35, 0.0  ;;  %v3403_v58 = vmul.f32 %v7699_v24, %v3402_v17 }
 0xdd0   :  { %6038 = vmatpush3.msra.mxu1 %v7738_v18  ;;  %v3064_v9 = vmax.f32 %v3063_v56, 0.0 }
 0xdd1   :  { %6039 = vmatprep.subr.mxu1 %v6535_v34 }
 0xdd2   :  { %6040 = vmatpush3.msra.mxu1 %v7244_v44  ;;  %v3065_v20 = vsel %vm996_vm6, %v3064_v9, 0.0  ;;  %v3106_v44 = vrot.slane %v7687_v32, %v6991_v22 }
 0xdd3   :  { %6041 = vmatprep.subr.mxu1 %v6535_v34  ;;  %3066 = vadd.xlane.f32.xlu1 %v3065_v20  ;;  %v7852_v20 = vld [vmem:[%s8199_s9 + $0x10] sm:$0xff] }
 0xdd4   :  { %6042 = vmatpush3.msra.mxu1 %v7251_v46  ;;  %v3107_v46 = vmul.f32 %v7699_v24, %v3106_v44  ;;  %v7870_v44 = vld [vmem:[%s8199_s9] sm:$0xff] }
 0xdd5   :  { %6043 = vmatprep.subr.mxu1 %v6535_v34 }
 0xdd6   :  { %6044 = vmatpush3.msra.mxu1 %v7258_v10 }
 0xdd7   :  { %6045 = vmatprep.subr.mxu1 %v6535_v34  ;;  %4612 = vadd.xlane.f32.xlu1 %v4611_v59  ;;  %v7860_v59 = vld [vmem:[%s8199_s9 + $0x8] sm:$0xff]  ;;  %s8177_s9 = spop %6423 }
 0xdd8   :  { %6046 = vmatpush3.msra.mxu1 %v7266_v13  ;;  %s8179_s2 = spop %6425  ;;  %s493_s12 = smul.f32 0.00086805556, %s8177_s9 }
 0xdd9   :  { %6047 = vmatprep.subr.mxu1 %v6535_v34  ;;  %s6428_s7 = spop %6427  ;;  %s509_s4 = smul.f32 0.125, %s8179_s2 }
 0xdda   :  { %6048 = vmatpush3.msra.mxu1 %v7273_v14  ;;  %s6430_s13 = spop %6429  ;;  %s6537_s9 = smov [#allocation2]  }
 0xddb   :  { %6049 = vmatprep.subr.mxu1 %v6535_v34  ;;  %s6432_s14 = spop %6431  ;;  %s1020_s19 = sadd.f32 %s6430_s13, %s6428_s7 }
 0xddc   :  { %6050 = vmatpush3.msra.mxu1 %v7283_v26  ;;  %s6434_s15 = spop %6433 }
 0xddd   :  { %6051 = vmatprep.subr.mxu1 %v6535_v34  ;;  %s6436_s16 = spop %6435  ;;  %s1021_s20 = smul.f32 0.00625, %s1020_s19 }
 0xdde   :  { %6052 = vmatpush3.msra.mxu1 %v7290_v27  ;;  %s8181_s1 = spop %6437  ;;  %s1047_s21 = sadd.f32 %s6434_s15, %s6432_s14 }
 0xddf   :  { %6053 = vmatprep.subr.mxu1 %v6535_v34  ;;  %s4622_s6 = smul.f32 0.5, %s1021_s20  ;;  %s2566_s26 = sadd.f32 2.7725887, %s8181_s1 }
 0xde0   :  { %6054 = vmatpush3.msra.mxu1 %v7298_v29  ;;  %s2549_s24 = ssub.f32 %s6436_s16, %s1047_s21  ;;  %s4655_s16 = sshll.u32 %s6537_s9, 4  ;;  %s4656_s16 = int_to_ptr.vmem [resolvable:$true] %s4655_s16 }
 0xde1   :  { %6056 = vmatmul.mubr.f32.vlgmr.msra.gmra.mxu1 %v3107_v46  ;;  %6093 = vmatprep.subr.mxu1 %v6535_v34  ;;  %s6513_s1 = scalar_lea.vmem %s4656_s16, 16  ;;  %p6518_p1 = scmp.lt.s32.totalorder %s4656_s16, %s4656_s16 }
 0xde2   :  { %6095 = vmatprep.mubr.msk.f32.mxu1 %vm6536_vm5, %v6535_v34  ;;  %s2550_s29 = smul.f32 0.020408163, %s2549_s24  ;;  %p6514_p0 = scmp.ne.s32.totalorder %s4656_s16, %s6513_s1 }
 0xde4   :  { %s2551_s13 = smul.f32 0.00625, %s2550_s29 }
 0xe44   :  { %v3094_v46 = vpop.xlane.xlu1 %3093 }
 0xe81   :  { %v5987_v10 = vpop.f32.mrf.mxu1 }
 0xe82   :  { %v3021_v13 = vmul.f32 0.14285715, %v5987_v10  ;;  %v3078_v14 = vmul.f32 %v5987_v10, %v5987_v10  ;;  %v3249_v26 = vpop.f32.mrf.mxu0 }
 0xe83   :  { %v2940_v33 = vpop.f32.mrf.mxu1  ;;  %6094 = vmatpush3.xpose.msk.msra.mxu1 %vm658_vm7, %v3249_v26 }
 0xe84   :  { %v3023_v27 = vadd.f32 0.0001, %v3021_v13  ;;  %v3020_v4 = vmul.f32 0.14285715, %v2940_v33  ;;  %v3077_v5 = vmul.f32 %v2940_v33, %v2940_v33  ;;  %v6092_v6 = vpop.f32.mrf.mxu0  ;;  %6103 = vmatprep.subr.mxu1 %v6535_v34  ;;  %v3080_v37 = vsel %vm996_vm6, %v3078_v14, 0.0  ;;  %v3067_v13 = vpop.xlane.xlu1 %3066 }
 0xe85   :  { %v3068_v14 = vrot.slane %v3067_v13, 4  ;;  %v3095_v33 = vrot.slane %v3094_v46, 4 }
 0xe86   :  { %6472 = vrsqrt.f32 %v3023_v27  ;;  %v3022_v29 = vadd.f32 0.0001, %v3020_v4  ;;  %6096 = vmatmul.mubr.msk.f32.vlgmr.msra.gmra.mxu1 %vm658_vm7, %v3249_v26  ;;  %v3079_v36 = vsel %vm658_vm7, %v3077_v5, 0.0  ;;  %vm3033_vm1 = vcmp.eq.f32.partialorder %v3023_v27, inf }
 0xe87   :  { %6104 = vmatpush3.msra.mxu1 %v7774_v60  ;;  %v3081_v7 = vadd.f32 %v3080_v37, %v3079_v36  ;;  %6135 = vmatprep.mubr.msk.f32.mxu1 %vm6536_vm5, %v6535_v34  ;;  %v3036_v11 = vand.u32 2147483648, %v3023_v27  ;;  %vm3035_vm2 = vcmp.eq.f32.partialorder %v3023_v27, 0.0  ;;  %v3096_v5 = vadd.f32 %v3095_v33, %v3094_v46 }
 0xe88   :  { %6474 = vrsqrt.f32 %v3022_v29  ;;  %6105 = vmatprep.subr.mxu1 %v6535_v34  ;;  %vm3026_vm3 = vcmp.eq.f32.partialorder %v3022_v29, inf  ;;  %v3029_v61 = vand.u32 2147483648, %v3022_v29  ;;  %vm3028_vm4 = vcmp.eq.f32.partialorder %v3022_v29, 0.0 }
 0xe89   :  { %6106 = vmatpush3.msra.mxu1 %v7709_v25  ;;  %3082 = vadd.xlane.f32.xlu0 %v3081_v7  ;;  %v3097_v7 = vrot.slane %v3096_v5, 2  ;;  %v3551_v46 = vrot.slane %v7687_v32, %v1495_v16 }
 0xe8a   :  { %6107 = vmatprep.subr.mxu1 %v6535_v34 }
 0xe8b   :  { %6108 = vmatpush3.msra.mxu1 %v7785_v62 }
 0xe8c   :  { %6109 = vmatprep.subr.mxu1 %v6535_v34 }
 0xe8d   :  { %6110 = vmatpush3.msra.mxu1 %v7792_v38 }
 0xe8e   :  { %6111 = vmatprep.subr.mxu1 %v6535_v34 }
 0xe8f   :  { %6112 = vmatpush3.msra.mxu1 %v7799_v39 }
 0xe90   :  { %6113 = vmatprep.subr.mxu1 %v6535_v34 }
 0xe91   :  { %6114 = vmatpush3.msra.mxu1 %v7724_v1 }
 0xe92   :  { %6115 = vmatprep.subr.mxu1 %v6535_v34 }
 0xe93   :  { %v6473_v40 = vpop.eup %6472  ;;  %6116 = vmatpush3.msra.mxu1 %v7731_v3 }
 0xe94   :  { %6117 = vmatprep.subr.mxu1 %v6535_v34  ;;  %v3032_v41 = vmul.f32 %v6473_v40, %v3023_v27 }
 0xe95   :  { %v6475_v42 = vpop.eup %6474  ;;  %6118 = vmatpush3.msra.mxu1 %v7738_v18 }
 0xe96   :  { %6119 = vmatprep.subr.mxu1 %v6535_v34  ;;  %v3025_v19 = vmul.f32 %v6475_v42, %v3022_v29  ;;  %v3034_v43 = vsel %vm3033_vm1, %v3023_v27, %v3032_v41  ;;  %v3069_v27 = vadd.f32 %v3068_v14, %v3067_v13 }
 0xe97   :  { %6120 = vmatpush3.msra.mxu1 %v7812_v0  ;;  %v3037_v15 = vsel %vm3035_vm2, %v3036_v11, %v3034_v43 }
 0xe98   :  { %6121 = vmatprep.subr.mxu1 %v6535_v34  ;;  %v3027_v28 = vsel %vm3026_vm3, %v3022_v29, %v3025_v19  ;;  %v3048_v31 = vsub.f32 1.0, %v3037_v15  ;;  %v3070_v6 = vrot.slane %v3069_v27, 2  ;;  %v3098_v19 = vadd.f32 %v3097_v7, %v3096_v5 }
 0xe99   :  { %6122 = vmatpush3.msra.mxu1 %v7819_v47  ;;  %v3030_v49 = vsel %vm3028_vm4, %v3029_v61, %v3027_v28 }
 0xe9a   :  { %6123 = vmatprep.subr.mxu1 %v6535_v34  ;;  %v3047_v50 = vsub.f32 1.0, %v3030_v49  ;;  %v3050_v23 = vmax.f32 %v3048_v31, 0.0  ;;  %v3071_v41 = vadd.f32 %v3070_v6, %v3069_v27  ;;  %v3099_v31 = vrot.slane %v3098_v19, 1 }
 0xe9b   :  { %6124 = vmatpush3.msra.mxu1 %v7826_v63  ;;  %v3700_v27 = vrot.slane %v7687_v32, %v1644_v8 }
 0xe9c   :  { %6125 = vmatprep.subr.mxu1 %v6535_v34  ;;  %v3049_v51 = vmax.f32 %v3047_v50, 0.0  ;;  %v3052_v2 = vsel %vm996_vm6, %v3050_v23, 0.0  ;;  %v3072_v61 = vrot.slane %v3071_v41, 1 }
 0xe9d   :  { %6126 = vmatpush3.msra.mxu1 %v7833_v52 }
 0xe9e   :  { %6127 = vmatprep.subr.mxu1 %v6535_v34  ;;  %v3051_v53 = vsel %vm658_vm7, %v3049_v51, 0.0  ;;  %v3073_v50 = vadd.f32 %v3072_v61, %v3071_v41  ;;  %v3100_v51 = vadd.f32 %v3099_v31, %v3098_v19  ;;  %v3998_v19 = vrot.slane %v7687_v32, %v1942_v48 }
 0xe9f   :  { %6128 = vmatpush3.msra.mxu1 %v7842_v54  ;;  %v3053_v56 = vadd.f32 %v3052_v2, %v3051_v53 }
 0xea0   :  { %6129 = vmatprep.subr.mxu1 %v6535_v34 }
 0xea1   :  { %v3174_v9 = vpop.f32.mrf.mxu1  ;;  %6130 = vmatpush3.msra.mxu1 %v7852_v20  ;;  %3054 = vadd.xlane.f32.xlu0 %v3053_v56 }
 0xea2   :  { %6099 = vmatpush3.xpose.msk.msra.mxu0 %vm658_vm7, %v3174_v9  ;;  %6131 = vmatprep.subr.mxu1 %v6535_v34 }
 0xea3   :  { %v6057_v35 = vpop.f32.mrf.mxu1  ;;  %6132 = vmatpush3.msra.mxu1 %v7860_v59  ;;  %6138 = vmatprep.subr.mxu0 %v6535_v34 }
 0xea4   :  { %6133 = vmatprep.subr.mxu1 %v6535_v34 }
 0xea5   :  { %6101 = vmatmul.mubr.msk.f32.vlgmr.msra.gmra.mxu0 %vm658_vm7, %v3174_v9  ;;  %6134 = vmatpush3.msra.mxu1 %v7870_v44 }
 0xea6   :  { %6136 = vmatmul.mubr.f32.vlgmr.msra.gmra.mxu1 %v3403_v58  ;;  %6140 = vmatprep.mubr.msk.f32.mxu0 %vm6536_vm5, %v6535_v34 }
 0xea7   :  { %6178 = vmatprep.subr.mxu1 %v6535_v34  ;;  %6180 = vmatprep.mubr.msk.f32.mxu1 %vm6536_vm5, %v6535_v34 }
 0xf12   :  { %v3083_v10 = vpop.xlane.xlu0 %3082 }
 0xf13   :  { %v3084_v26 = vrot.slane %v3083_v10, 4 }
 0xf15   :  { %v3085_v4 = vadd.f32 %v3084_v26, %v3083_v10  ;;  %v3552_v10 = vmul.f32 %v7699_v24, %v3551_v46 }
 0xf17   :  { %v3086_v36 = vrot.slane %v3085_v4, 2 }
 0xf19   :  { %v3087_v11 = vadd.f32 %v3086_v36, %v3085_v4  ;;  %v3701_v4 = vmul.f32 %v7699_v24, %v3700_v27  ;;  %v4637_v27 = vstv %s493_s12 }
 0xf1b   :  { %v3088_v28 = vrot.slane %v3087_v11, 1 }
 0xf1d   :  { %v3089_v23 = vadd.f32 %v3088_v28, %v3087_v11 }
 0xf2a   :  { %v3055_v29 = vpop.xlane.xlu0 %3054 }
 0xf2b   :  { %v3056_v37 = vrot.slane %v3055_v29, 4 }
 0xf2d   :  { %v3057_v40 = vadd.f32 %v3056_v37, %v3055_v29  ;;  %v3849_v37 = vrot.slane %v7687_v32, %v1793_v12 }
 0xf2f   :  { %v3058_v42 = vrot.slane %v3057_v40, 2  ;;  %v3850_v7 = vmul.f32 %v7699_v24, %v3849_v37 }
 0xf31   :  { %v3059_v43 = vadd.f32 %v3058_v42, %v3057_v40 }
 0xf33   :  { %v3060_v15 = vrot.slane %v3059_v43, 1 }
 0xf35   :  { %v3061_v49 = vadd.f32 %v3060_v15, %v3059_v43  ;;  %v3999_v43 = vmul.f32 %v7699_v24, %v3998_v19 }
 0xf37   :  { %6439 = vpush %v3061_v49  ;;  %v4147_v49 = vrot.slane %v7687_v32, %v2091_v57 }
 0xf38   :  { %6441 = vpush %v3073_v50 }
 0xf39   :  { %6443 = vpush %v3089_v23  ;;  %v4148_v50 = vmul.f32 %v7699_v24, %v4147_v49 }
 0xf3a   :  { %6445 = vpush %v3100_v51 }
 0xf46   :  { %v3322_v53 = vpop.f32.mrf.mxu1 }
 0xf48   :  { %v6097_v2 = vpop.f32.mrf.mxu1 }
 0xf65   :  { %v3395_v56 = vpop.f32.mrf.mxu0 }
 0xf66   :  { %v3396_v17 = vadd.f32 %v3395_v56, %v3322_v53  ;;  %v3470_v9 = vpop.f32.mrf.mxu1  ;;  %v4296_v53 = vrot.slane %v7684_v30, %v6991_v22 }
 0xf67   :  { %v6102_v35 = vpop.f32.mrf.mxu0  ;;  %6139 = vmatpush3.xpose.msk.msra.mxu0 %vm658_vm7, %v3470_v9 }
 0xf68   :  { %v6137_v58 = vpop.f32.mrf.mxu1  ;;  %6143 = vmatprep.subr.mxu0 %v6535_v34  ;;  %v4297_v2 = vmul.f32 %v7699_v24, %v4296_v53  ;;  %s6440_s17 = spop %6439 }
 0xf69   :  { %s6442_s18 = spop %6441 }
 0xf6a   :  { %6141 = vmatmul.mubr.msk.f32.vlgmr.msra.gmra.mxu0 %vm658_vm7, %v3470_v9  ;;  %s3075_s5 = sadd.f32 %s6442_s18, %s6440_s17  ;;  %s6444_s22 = spop %6443 }
 0xf6b   :  { %6144 = vmatpush3.msra.mxu0 %v7774_v60  ;;  %6175 = vmatprep.mubr.msk.f32.mxu0 %vm6536_vm5, %v6535_v34  ;;  %s6446_s25 = spop %6445  ;;  %s6517_s17 = scalar_lea.vmem %s4656_s16, 32 }
 0xf6c   :  { %6145 = vmatprep.subr.mxu0 %v6535_v34  ;;  %s3076_s23 = smul.f32 0.00625, %s3075_s5  ;;  %s3102_s28 = sadd.f32 %s6446_s25, %s6444_s22 }
 0xf6d   :  { %6146 = vmatpush3.msra.mxu0 %v7709_v25  ;;  %p6519_p2 = scmp.lt.s32.totalorder %s6517_s17, %s6513_s1 }
 0xf6e   :  { %6147 = vmatprep.subr.mxu0 %v6535_v34  ;;  %s4623_s27 = smul.f32 0.5, %s3076_s23 }
 0xf6f   :  { %6148 = vmatpush3.msra.mxu0 %v7785_v62  ;;  %p6520_p3 = por %p6519_p2, %p6518_p1 }
 0xf70   :  { %6149 = vmatprep.subr.mxu0 %v6535_v34  ;;  %s4624_s8 = sadd.f32 %s4623_s27, %s4622_s6 }
 0xf71   :  { %6150 = vmatpush3.msra.mxu0 %v7792_v38  ;;  %p6521_p4 = pnand %p6520_p3, %p6514_p0 }
 0xf72   :  { %6151 = vmatprep.subr.mxu0 %v6535_v34 }
 0xf73   :  { %6152 = vmatpush3.msra.mxu0 %v7799_v39 }
 0xf74   :  { %6153 = vmatprep.subr.mxu0 %v6535_v34 }
 0xf75   :  { %6154 = vmatpush3.msra.mxu0 %v7724_v1 }
 0xf76   :  { %6155 = vmatprep.subr.mxu0 %v6535_v34 }
 0xf77   :  { %6156 = vmatpush3.msra.mxu0 %v7731_v3 }
 0xf78   :  { %6157 = vmatprep.subr.mxu0 %v6535_v34 }
 0xf79   :  { %6158 = vmatpush3.msra.mxu0 %v7738_v18 }
 0xf7a   :  { %6159 = vmatprep.subr.mxu0 %v6535_v34 }
 0xf7b   :  { %6160 = vmatpush3.msra.mxu0 %v7812_v0 }
 0xf7c   :  { %6161 = vmatprep.subr.mxu0 %v6535_v34 }
 0xf7d   :  { %6162 = vmatpush3.msra.mxu0 %v7819_v47 }
 0xf7e   :  { %6163 = vmatprep.subr.mxu0 %v6535_v34 }
 0xf7f   :  { %6164 = vmatpush3.msra.mxu0 %v7826_v63 }
 0xf80   :  { %6165 = vmatprep.subr.mxu0 %v6535_v34 }
 0xf81   :  { %6166 = vmatpush3.msra.mxu0 %v7833_v52 }
 0xf82   :  { %6167 = vmatprep.subr.mxu0 %v6535_v34 }
 0xf83   :  { %6168 = vmatpush3.msra.mxu0 %v7842_v54 }
 0xf84   :  { %6169 = vmatprep.subr.mxu0 %v6535_v34 }
 0xf85   :  { %6170 = vmatpush3.msra.mxu0 %v7852_v20 }
 0xf86   :  { %6171 = vmatprep.subr.mxu0 %v6535_v34 }
 0xf87   :  { %6172 = vmatpush3.msra.mxu0 %v7860_v59 }
 0xf88   :  { %6173 = vmatprep.subr.mxu0 %v6535_v34 }
 0xf89   :  { %6174 = vmatpush3.msra.mxu0 %v7870_v44 }
 0xf8a   :  { %6176 = vmatmul.mubr.f32.vlgmr.msra.gmra.mxu0 %v3552_v10  ;;  %6218 = vmatprep.subr.mxu0 %v6535_v34 }
 0xf8b   :  { %6220 = vmatprep.mubr.msk.f32.mxu0 %vm6536_vm5, %v6535_v34 }
0x102a   :  { %v3543_v13 = vpop.f32.mrf.mxu0 }
0x102b   :  { %v3547_v16 = vadd.f32 %v3543_v13, %v3396_v17 }
0x102c   :  { %v6142_v14 = vpop.f32.mrf.mxu0 }
0x104a   :  { %v3619_v26 = vpop.f32.mrf.mxu0 }
0x104b   :  { %6179 = vmatpush3.xpose.msk.msra.mxu1 %vm658_vm7, %v3619_v26 }
0x104c   :  { %v6177_v33 = vpop.f32.mrf.mxu0  ;;  %6183 = vmatprep.subr.mxu1 %v6535_v34 }
0x104d   :  { %v4630_v33 = vstv %s509_s4 }
0x104e   :  { %6181 = vmatmul.mubr.msk.f32.vlgmr.msra.gmra.mxu1 %vm658_vm7, %v3619_v26  ;;  %v4628_v26 = vand.u32 127, %v1048_v45 }
0x104f   :  { %6184 = vmatpush3.msra.mxu1 %v7774_v60  ;;  %6215 = vmatprep.mubr.msk.f32.mxu1 %vm6536_vm5, %v6535_v34 }
0x1050   :  { %6185 = vmatprep.subr.mxu1 %v6535_v34  ;;  %vm4636_vm6 = vcmp.eq.s32.totalorder %v4628_v26, 2  ;;  %vm4644_vm8 = vcmp.eq.s32.totalorder %v4628_v26, 4 }
0x1051   :  { %6186 = vmatpush3.msra.mxu1 %v7709_v25 }
0x1052   :  { %6187 = vmatprep.subr.mxu1 %v6535_v34 }
0x1053   :  { %6188 = vmatpush3.msra.mxu1 %v7785_v62 }
0x1054   :  { %6189 = vmatprep.subr.mxu1 %v6535_v34 }
0x1055   :  { %6190 = vmatpush3.msra.mxu1 %v7792_v38 }
0x1056   :  { %6191 = vmatprep.subr.mxu1 %v6535_v34 }
0x1057   :  { %6192 = vmatpush3.msra.mxu1 %v7799_v39 }
0x1058   :  { %6193 = vmatprep.subr.mxu1 %v6535_v34 }
0x1059   :  { %6194 = vmatpush3.msra.mxu1 %v7724_v1 }
0x105a   :  { %6195 = vmatprep.subr.mxu1 %v6535_v34 }
0x105b   :  { %6196 = vmatpush3.msra.mxu1 %v7731_v3 }
0x105c   :  { %6197 = vmatprep.subr.mxu1 %v6535_v34 }
0x105d   :  { %6198 = vmatpush3.msra.mxu1 %v7738_v18 }
0x105e   :  { %6199 = vmatprep.subr.mxu1 %v6535_v34 }
0x105f   :  { %6200 = vmatpush3.msra.mxu1 %v7812_v0 }
0x1060   :  { %6201 = vmatprep.subr.mxu1 %v6535_v34 }
0x1061   :  { %6202 = vmatpush3.msra.mxu1 %v7819_v47 }
0x1062   :  { %6203 = vmatprep.subr.mxu1 %v6535_v34 }
0x1063   :  { %6204 = vmatpush3.msra.mxu1 %v7826_v63 }
0x1064   :  { %6205 = vmatprep.subr.mxu1 %v6535_v34 }
0x1065   :  { %6206 = vmatpush3.msra.mxu1 %v7833_v52 }
0x1066   :  { %6207 = vmatprep.subr.mxu1 %v6535_v34 }
0x1067   :  { %6208 = vmatpush3.msra.mxu1 %v7842_v54 }
0x1068   :  { %6209 = vmatprep.subr.mxu1 %v6535_v34 }
0x1069   :  { %6210 = vmatpush3.msra.mxu1 %v7852_v20 }
0x106a   :  { %6211 = vmatprep.subr.mxu1 %v6535_v34 }
0x106b   :  { %6212 = vmatpush3.msra.mxu1 %v7860_v59 }
0x106c   :  { %6213 = vmatprep.subr.mxu1 %v6535_v34 }
0x106d   :  { %6214 = vmatpush3.msra.mxu1 %v7870_v44 }
0x106e   :  { %6216 = vmatmul.mubr.f32.vlgmr.msra.gmra.mxu1 %v3701_v4  ;;  %6258 = vmatprep.subr.mxu1 %v6535_v34 }
0x106f   :  { %6260 = vmatprep.mubr.msk.f32.mxu1 %vm6536_vm5, %v6535_v34 }
0x110e   :  { %v3692_v5 = vpop.f32.mrf.mxu1 }
0x110f   :  { %v3696_v8 = vadd.f32 %v3692_v5, %v3547_v16 }
0x1110   :  { %v6182_v6 = vpop.f32.mrf.mxu1 }
0x1111   :  { %v4641_v6 = vstv %s4624_s8 }
0x112e   :  { %v3768_v29 = vpop.f32.mrf.mxu1 }
0x112f   :  { %6219 = vmatpush3.xpose.msk.msra.mxu0 %vm658_vm7, %v3768_v29 }
0x1130   :  { %v6217_v36 = vpop.f32.mrf.mxu1  ;;  %6223 = vmatprep.subr.mxu0 %v6535_v34 }
0x1131   :  { %v4638_v36 = vsel %vm4636_vm6, %v4637_v27, 0.0 }
0x1132   :  { %6221 = vmatmul.mubr.msk.f32.vlgmr.msra.gmra.mxu0 %vm658_vm7, %v3768_v29 }
0x1133   :  { %6224 = vmatpush3.msra.mxu0 %v7774_v60  ;;  %6255 = vmatprep.mubr.msk.f32.mxu0 %vm6536_vm5, %v6535_v34 }
0x1134   :  { %6225 = vmatprep.subr.mxu0 %v6535_v34 }
0x1135   :  { %6226 = vmatpush3.msra.mxu0 %v7709_v25 }
0x1136   :  { %6227 = vmatprep.subr.mxu0 %v6535_v34 }
0x1137   :  { %6228 = vmatpush3.msra.mxu0 %v7785_v62 }
0x1138   :  { %6229 = vmatprep.subr.mxu0 %v6535_v34 }
0x1139   :  { %6230 = vmatpush3.msra.mxu0 %v7792_v38 }
0x113a   :  { %6231 = vmatprep.subr.mxu0 %v6535_v34 }
0x113b   :  { %6232 = vmatpush3.msra.mxu0 %v7799_v39 }
0x113c   :  { %6233 = vmatprep.subr.mxu0 %v6535_v34 }
0x113d   :  { %6234 = vmatpush3.msra.mxu0 %v7724_v1 }
0x113e   :  { %6235 = vmatprep.subr.mxu0 %v6535_v34 }
0x113f   :  { %6236 = vmatpush3.msra.mxu0 %v7731_v3 }
0x1140   :  { %6237 = vmatprep.subr.mxu0 %v6535_v34 }
0x1141   :  { %6238 = vmatpush3.msra.mxu0 %v7738_v18 }
0x1142   :  { %6239 = vmatprep.subr.mxu0 %v6535_v34 }
0x1143   :  { %6240 = vmatpush3.msra.mxu0 %v7812_v0 }
0x1144   :  { %6241 = vmatprep.subr.mxu0 %v6535_v34 }
0x1145   :  { %6242 = vmatpush3.msra.mxu0 %v7819_v47 }
0x1146   :  { %6243 = vmatprep.subr.mxu0 %v6535_v34 }
0x1147   :  { %6244 = vmatpush3.msra.mxu0 %v7826_v63 }
0x1148   :  { %6245 = vmatprep.subr.mxu0 %v6535_v34 }
0x1149   :  { %6246 = vmatpush3.msra.mxu0 %v7833_v52 }
0x114a   :  { %6247 = vmatprep.subr.mxu0 %v6535_v34 }
0x114b   :  { %6248 = vmatpush3.msra.mxu0 %v7842_v54 }
0x114c   :  { %6249 = vmatprep.subr.mxu0 %v6535_v34 }
0x114d   :  { %6250 = vmatpush3.msra.mxu0 %v7852_v20 }
0x114e   :  { %6251 = vmatprep.subr.mxu0 %v6535_v34 }
0x114f   :  { %6252 = vmatpush3.msra.mxu0 %v7860_v59 }
0x1150   :  { %6253 = vmatprep.subr.mxu0 %v6535_v34 }
0x1151   :  { %6254 = vmatpush3.msra.mxu0 %v7870_v44 }
0x1152   :  { %6256 = vmatmul.mubr.f32.vlgmr.msra.gmra.mxu0 %v3850_v7  ;;  %6298 = vmatprep.subr.mxu0 %v6535_v34 }
0x1153   :  { %6300 = vmatprep.mubr.msk.f32.mxu0 %vm6536_vm5, %v6535_v34 }
0x11f2   :  { %v3841_v40 = vpop.f32.mrf.mxu0 }
0x11f3   :  { %v3845_v12 = vadd.f32 %v3841_v40, %v3696_v8 }
0x11f4   :  { %v6222_v41 = vpop.f32.mrf.mxu0 }
0x1212   :  { %v3917_v42 = vpop.f32.mrf.mxu0 }
0x1213   :  { %6259 = vmatpush3.xpose.msk.msra.mxu1 %vm658_vm7, %v3917_v42 }
0x1214   :  { %v6257_v11 = vpop.f32.mrf.mxu0  ;;  %6263 = vmatprep.subr.mxu1 %v6535_v34 }
0x1216   :  { %6261 = vmatmul.mubr.msk.f32.vlgmr.msra.gmra.mxu1 %vm658_vm7, %v3917_v42 }
0x1217   :  { %6264 = vmatpush3.msra.mxu1 %v7774_v60  ;;  %6295 = vmatprep.mubr.msk.f32.mxu1 %vm6536_vm5, %v6535_v34 }
0x1218   :  { %6265 = vmatprep.subr.mxu1 %v6535_v34 }
0x1219   :  { %6266 = vmatpush3.msra.mxu1 %v7709_v25 }
0x121a   :  { %6267 = vmatprep.subr.mxu1 %v6535_v34 }
0x121b   :  { %6268 = vmatpush3.msra.mxu1 %v7785_v62 }
0x121c   :  { %6269 = vmatprep.subr.mxu1 %v6535_v34 }
0x121d   :  { %6270 = vmatpush3.msra.mxu1 %v7792_v38 }
0x121e   :  { %6271 = vmatprep.subr.mxu1 %v6535_v34 }
0x121f   :  { %6272 = vmatpush3.msra.mxu1 %v7799_v39 }
0x1220   :  { %6273 = vmatprep.subr.mxu1 %v6535_v34 }
0x1221   :  { %6274 = vmatpush3.msra.mxu1 %v7724_v1 }
0x1222   :  { %6275 = vmatprep.subr.mxu1 %v6535_v34 }
0x1223   :  { %6276 = vmatpush3.msra.mxu1 %v7731_v3 }
0x1224   :  { %6277 = vmatprep.subr.mxu1 %v6535_v34 }
0x1225   :  { %6278 = vmatpush3.msra.mxu1 %v7738_v18 }
0x1226   :  { %6279 = vmatprep.subr.mxu1 %v6535_v34 }
0x1227   :  { %6280 = vmatpush3.msra.mxu1 %v7812_v0 }
0x1228   :  { %6281 = vmatprep.subr.mxu1 %v6535_v34 }
0x1229   :  { %6282 = vmatpush3.msra.mxu1 %v7819_v47 }
0x122a   :  { %6283 = vmatprep.subr.mxu1 %v6535_v34 }
0x122b   :  { %6284 = vmatpush3.msra.mxu1 %v7826_v63 }
0x122c   :  { %6285 = vmatprep.subr.mxu1 %v6535_v34 }
0x122d   :  { %6286 = vmatpush3.msra.mxu1 %v7833_v52 }
0x122e   :  { %6287 = vmatprep.subr.mxu1 %v6535_v34 }
0x122f   :  { %6288 = vmatpush3.msra.mxu1 %v7842_v54 }
0x1230   :  { %6289 = vmatprep.subr.mxu1 %v6535_v34 }
0x1231   :  { %6290 = vmatpush3.msra.mxu1 %v7852_v20 }
0x1232   :  { %6291 = vmatprep.subr.mxu1 %v6535_v34 }
0x1233   :  { %6292 = vmatpush3.msra.mxu1 %v7860_v59 }
0x1234   :  { %6293 = vmatprep.subr.mxu1 %v6535_v34 }
0x1235   :  { %6294 = vmatpush3.msra.mxu1 %v7870_v44 }
0x1236   :  { %6296 = vmatmul.mubr.f32.vlgmr.msra.gmra.mxu1 %v3999_v43  ;;  %6338 = vmatprep.subr.mxu1 %v6535_v34 }
0x1237   :  { %6340 = vmatprep.mubr.msk.f32.mxu1 %vm6536_vm5, %v6535_v34 }
0x12d6   :  { %v3990_v61 = vpop.f32.mrf.mxu1 }
0x12d7   :  { %v3994_v48 = vadd.f32 %v3990_v61, %v3845_v12 }
0x12d8   :  { %v6262_v15 = vpop.f32.mrf.mxu1 }
0x12f6   :  { %v4066_v28 = vpop.f32.mrf.mxu1 }
0x12f7   :  { %6299 = vmatpush3.xpose.msk.msra.mxu0 %vm658_vm7, %v4066_v28 }
0x12f8   :  { %v6297_v31 = vpop.f32.mrf.mxu1  ;;  %6303 = vmatprep.subr.mxu0 %v6535_v34 }
0x12fa   :  { %6301 = vmatmul.mubr.msk.f32.vlgmr.msra.gmra.mxu0 %vm658_vm7, %v4066_v28 }
0x12fb   :  { %6304 = vmatpush3.msra.mxu0 %v7774_v60  ;;  %6335 = vmatprep.mubr.msk.f32.mxu0 %vm6536_vm5, %v6535_v34 }
0x12fc   :  { %6305 = vmatprep.subr.mxu0 %v6535_v34 }
0x12fd   :  { %6306 = vmatpush3.msra.mxu0 %v7709_v25 }
0x12fe   :  { %6307 = vmatprep.subr.mxu0 %v6535_v34 }
0x12ff   :  { %6308 = vmatpush3.msra.mxu0 %v7785_v62 }
0x1300   :  { %6309 = vmatprep.subr.mxu0 %v6535_v34 }
0x1301   :  { %6310 = vmatpush3.msra.mxu0 %v7792_v38 }
0x1302   :  { %6311 = vmatprep.subr.mxu0 %v6535_v34 }
0x1303   :  { %6312 = vmatpush3.msra.mxu0 %v7799_v39 }
0x1304   :  { %6313 = vmatprep.subr.mxu0 %v6535_v34 }
0x1305   :  { %6314 = vmatpush3.msra.mxu0 %v7724_v1 }
0x1306   :  { %6315 = vmatprep.subr.mxu0 %v6535_v34 }
0x1307   :  { %6316 = vmatpush3.msra.mxu0 %v7731_v3 }
0x1308   :  { %6317 = vmatprep.subr.mxu0 %v6535_v34 }
0x1309   :  { %6318 = vmatpush3.msra.mxu0 %v7738_v18 }
0x130a   :  { %6319 = vmatprep.subr.mxu0 %v6535_v34 }
0x130b   :  { %6320 = vmatpush3.msra.mxu0 %v7812_v0 }
0x130c   :  { %6321 = vmatprep.subr.mxu0 %v6535_v34 }
0x130d   :  { %6322 = vmatpush3.msra.mxu0 %v7819_v47 }
0x130e   :  { %6323 = vmatprep.subr.mxu0 %v6535_v34 }
0x130f   :  { %6324 = vmatpush3.msra.mxu0 %v7826_v63 }
0x1310   :  { %6325 = vmatprep.subr.mxu0 %v6535_v34 }
0x1311   :  { %6326 = vmatpush3.msra.mxu0 %v7833_v52 }
0x1312   :  { %6327 = vmatprep.subr.mxu0 %v6535_v34 }
0x1313   :  { %6328 = vmatpush3.msra.mxu0 %v7842_v54 }
0x1314   :  { %6329 = vmatprep.subr.mxu0 %v6535_v34 }
0x1315   :  { %6330 = vmatpush3.msra.mxu0 %v7852_v20 }
0x1316   :  { %6331 = vmatprep.subr.mxu0 %v6535_v34 }
0x1317   :  { %6332 = vmatpush3.msra.mxu0 %v7860_v59 }
0x1318   :  { %6333 = vmatprep.subr.mxu0 %v6535_v34 }
0x1319   :  { %6334 = vmatpush3.msra.mxu0 %v7870_v44 }
0x131a   :  { %6336 = vmatmul.mubr.f32.vlgmr.msra.gmra.mxu0 %v4148_v50  ;;  %6378 = vmatprep.subr.mxu0 %v6535_v34 }
0x131b   :  { %6380 = vmatprep.mubr.msk.f32.mxu0 %vm6536_vm5, %v6535_v34 }
0x13ba   :  { %v4139_v21 = vpop.f32.mrf.mxu0 }
0x13bb   :  { %v4143_v57 = vadd.f32 %v4139_v21, %v3994_v48 }
0x13bc   :  { %v6302_v32 = vpop.f32.mrf.mxu0 }
0x13da   :  { %v4215_v23 = vpop.f32.mrf.mxu0 }
0x13db   :  { %6339 = vmatpush3.xpose.msk.msra.mxu1 %vm658_vm7, %v4215_v23 }
0x13dc   :  { %v6337_v51 = vpop.f32.mrf.mxu0  ;;  %6343 = vmatprep.subr.mxu1 %v6535_v34 }
0x13de   :  { %6341 = vmatmul.mubr.msk.f32.vlgmr.msra.gmra.mxu1 %vm658_vm7, %v4215_v23 }
0x13df   :  { %6344 = vmatpush3.msra.mxu1 %v7774_v60  ;;  %6375 = vmatprep.mubr.msk.f32.mxu1 %vm6536_vm5, %v6535_v34 }
0x13e0   :  { %6345 = vmatprep.subr.mxu1 %v6535_v34 }
0x13e1   :  { %6346 = vmatpush3.msra.mxu1 %v7709_v25 }
0x13e2   :  { %6347 = vmatprep.subr.mxu1 %v6535_v34 }
0x13e3   :  { %6348 = vmatpush3.msra.mxu1 %v7785_v62 }
0x13e4   :  { %6349 = vmatprep.subr.mxu1 %v6535_v34 }
0x13e5   :  { %6350 = vmatpush3.msra.mxu1 %v7792_v38 }
0x13e6   :  { %6351 = vmatprep.subr.mxu1 %v6535_v34 }
0x13e7   :  { %6352 = vmatpush3.msra.mxu1 %v7799_v39 }
0x13e8   :  { %6353 = vmatprep.subr.mxu1 %v6535_v34 }
0x13e9   :  { %6354 = vmatpush3.msra.mxu1 %v7724_v1 }
0x13ea   :  { %6355 = vmatprep.subr.mxu1 %v6535_v34 }
0x13eb   :  { %6356 = vmatpush3.msra.mxu1 %v7731_v3 }
0x13ec   :  { %6357 = vmatprep.subr.mxu1 %v6535_v34 }
0x13ed   :  { %6358 = vmatpush3.msra.mxu1 %v7738_v18 }
0x13ee   :  { %6359 = vmatprep.subr.mxu1 %v6535_v34 }
0x13ef   :  { %6360 = vmatpush3.msra.mxu1 %v7812_v0 }
0x13f0   :  { %6361 = vmatprep.subr.mxu1 %v6535_v34 }
0x13f1   :  { %6362 = vmatpush3.msra.mxu1 %v7819_v47 }
0x13f2   :  { %6363 = vmatprep.subr.mxu1 %v6535_v34 }
0x13f3   :  { %6364 = vmatpush3.msra.mxu1 %v7826_v63 }
0x13f4   :  { %6365 = vmatprep.subr.mxu1 %v6535_v34 }
0x13f5   :  { %6366 = vmatpush3.msra.mxu1 %v7833_v52 }
0x13f6   :  { %6367 = vmatprep.subr.mxu1 %v6535_v34 }
0x13f7   :  { %6368 = vmatpush3.msra.mxu1 %v7842_v54 }
0x13f8   :  { %6369 = vmatprep.subr.mxu1 %v6535_v34 }
0x13f9   :  { %6370 = vmatpush3.msra.mxu1 %v7852_v20 }
0x13fa   :  { %6371 = vmatprep.subr.mxu1 %v6535_v34 }
0x13fb   :  { %6372 = vmatpush3.msra.mxu1 %v7860_v59 }
0x13fc   :  { %6373 = vmatprep.subr.mxu1 %v6535_v34 }
0x13fd   :  { %6374 = vmatpush3.msra.mxu1 %v7870_v44 }
0x13fe   :  { %6376 = vmatmul.mubr.f32.vlgmr.msra.gmra.mxu1 %v4297_v2  ;;  %6418 = vmatprep.subr.mxu1 %v6535_v34 }
0x13ff   :  { %6420 = vmatprep.mubr.msk.f32.mxu1 %vm6536_vm5, %v6535_v34 }
0x149e   :  { %v4288_v30 = vpop.f32.mrf.mxu1 }
0x149f   :  { %v4292_v56 = vadd.f32 %v4288_v30, %v4143_v57 }
0x14a0   :  { %v6342_v17 = vpop.f32.mrf.mxu1 }
0x14be   :  { %v4364_v9 = vpop.f32.mrf.mxu1 }
0x14bf   :  { %6379 = vmatpush3.xpose.msk.msra.mxu0 %vm658_vm7, %v4364_v9 }
0x14c0   :  { %v6377_v35 = vpop.f32.mrf.mxu1  ;;  %6383 = vmatprep.subr.mxu0 %v6535_v34 }
0x14c2   :  { %6381 = vmatmul.mubr.msk.f32.vlgmr.msra.gmra.mxu0 %vm658_vm7, %v4364_v9 }
0x14c3   :  { %6384 = vmatpush3.msra.mxu0 %v7774_v60  ;;  %6415 = vmatprep.mubr.msk.f32.mxu0 %vm6536_vm5, %v6535_v34  ;;  %vm4632_vm5 = vcmp.eq.s32.totalorder %v4628_v26, 1 }
0x14c4   :  { %6385 = vmatprep.subr.mxu0 %v6535_v34 }
0x14c5   :  { %6386 = vmatpush3.msra.mxu0 %v7709_v25  ;;  %v4446_v25 = vrot.slane %v7607_v55, %v6991_v22 }
0x14c6   :  { %6387 = vmatprep.subr.mxu0 %v6535_v34 }
0x14c7   :  { %6388 = vmatpush3.msra.mxu0 %v7785_v62 }
0x14c8   :  { %6389 = vmatprep.subr.mxu0 %v6535_v34 }
0x14c9   :  { %6390 = vmatpush3.msra.mxu0 %v7792_v38 }
0x14ca   :  { %6391 = vmatprep.subr.mxu0 %v6535_v34 }
0x14cb   :  { %6392 = vmatpush3.msra.mxu0 %v7799_v39 }
0x14cc   :  { %6393 = vmatprep.subr.mxu0 %v6535_v34 }
0x14cd   :  { %6394 = vmatpush3.msra.mxu0 %v7724_v1  ;;  %v4448_v1 = vmul.f32 %v7699_v24, %v4446_v25 }
0x14ce   :  { %6395 = vmatprep.subr.mxu0 %v6535_v34 }
0x14cf   :  { %6396 = vmatpush3.msra.mxu0 %v7731_v3 }
0x14d0   :  { %6397 = vmatprep.subr.mxu0 %v6535_v34 }
0x14d1   :  { %6398 = vmatpush3.msra.mxu0 %v7738_v18 }
0x14d2   :  { %6399 = vmatprep.subr.mxu0 %v6535_v34 }
0x14d3   :  { %6400 = vmatpush3.msra.mxu0 %v7812_v0 }
0x14d4   :  { %6401 = vmatprep.subr.mxu0 %v6535_v34 }
0x14d5   :  { %6402 = vmatpush3.msra.mxu0 %v7819_v47 }
0x14d6   :  { %6403 = vmatprep.subr.mxu0 %v6535_v34 }
0x14d7   :  { %6404 = vmatpush3.msra.mxu0 %v7826_v63 }
0x14d8   :  { %6405 = vmatprep.subr.mxu0 %v6535_v34 }
0x14d9   :  { %6406 = vmatpush3.msra.mxu0 %v7833_v52 }
0x14da   :  { %6407 = vmatprep.subr.mxu0 %v6535_v34 }
0x14db   :  { %6408 = vmatpush3.msra.mxu0 %v7842_v54 }
0x14dc   :  { %6409 = vmatprep.subr.mxu0 %v6535_v34 }
0x14dd   :  { %6410 = vmatpush3.msra.mxu0 %v7852_v20 }
0x14de   :  { %6411 = vmatprep.subr.mxu0 %v6535_v34 }
0x14df   :  { %6412 = vmatpush3.msra.mxu0 %v7860_v59 }
0x14e0   :  { %6413 = vmatprep.subr.mxu0 %v6535_v34  ;;  %v4613_v34 = vpop.xlane.xlu1 %4612 }
0x14e1   :  { %6414 = vmatpush3.msra.mxu0 %v7870_v44  ;;  %v4614_v47 = vrot.slane %v4613_v34, 4 }
0x14e2   :  { %6416 = vmatmul.mubr.f32.vlgmr.msra.gmra.mxu0 %v4448_v1 }
0x14e3   :  { %v4615_v63 = vadd.f32 %v4614_v47, %v4613_v34 }
0x14e5   :  { %v4616_v52 = vrot.slane %v4615_v63, 2 }
0x14e7   :  { %v4617_v44 = vadd.f32 %v4616_v52, %v4615_v63 }
0x14e9   :  { %v4618_v10 = vrot.slane %v4617_v44, 1 }
0x14eb   :  { %v4619_v14 = vadd.f32 %v4618_v10, %v4617_v44 }
0x1582   :  { %v4437_v3 = vpop.f32.mrf.mxu0 }
0x1583   :  { %v4441_v18 = vadd.f32 %v4437_v3, %v4292_v56 }
0x1584   :  { %v6382_v60 = vpop.f32.mrf.mxu0 }
0x15a2   :  { %v4515_v62 = vpop.f32.mrf.mxu0 }
0x15a3   :  { %6419 = vmatpush3.xpose.msk.msra.mxu1 %vm658_vm7, %v4515_v62 }
0x15a4   :  { %v6417_v22 = vpop.f32.mrf.mxu0 }
0x15a6   :  { %6421 = vmatmul.mubr.msk.f32.vlgmr.msra.gmra.mxu1 %vm658_vm7, %v4515_v62  ;;  %vm4640_vm7 = vcmp.eq.s32.totalorder %v4628_v26, 3 }
0x15a7   :  { %v4642_v7 = vsel %vm4640_vm7, %v4641_v6, 0.0 }
0x1666   :  { %v4588_v55 = vpop.f32.mrf.mxu1 }
0x1667   :  { %v4592_v38 = vadd.f32 %v4588_v55, %v4441_v18 }
0x1668   :  { %v6422_v39 = vpop.f32.mrf.mxu1 }
0x1669   :  { %v4593_v0 = vmul.f32 %v4592_v38, %v4592_v38 }
0x166b   :  { %v4594_v24 = vsel %vm76_vm0, %v4593_v0, 0.0  ;;  %vm4629_vm0 = vcmp.eq.s32.totalorder %v4628_v26, 0 }
0x166c   :  { %4595 = vadd.xlane.f32.xlu0 %v4594_v24  ;;  %v4631_v5 = vsel %vm4629_vm0, %v4630_v33, 0.0 }
0x16f5   :  { %v4596_v54 = vpop.xlane.xlu0 %4595 }
0x16f6   :  { %v4597_v20 = vrot.slane %v4596_v54, 4 }
0x16f8   :  { %v4598_v59 = vadd.f32 %v4597_v20, %v4596_v54 }
0x16fa   :  { %v4599_v58 = vrot.slane %v4598_v59, 2 }
0x16fc   :  { %v4600_v46 = vadd.f32 %v4599_v58, %v4598_v59 }
0x16fe   :  { %v4601_v13 = vrot.slane %v4600_v46, 1 }
0x1700   :  { %v4602_v16 = vadd.f32 %v4601_v13, %v4600_v46 }
0x1702   :  { %6447 = vpush %v4602_v16 }
0x1703   :  { %6449 = vpush %v4619_v14 }
0x1733   :  { %s6448_s30 = spop %6447 }
0x1734   :  { %s4604_s3 = ssub.f32 %s6448_s30, %s3102_s28  ;;  %s6450_s10 = spop %6449 }
0x1735   :  { %s4621_s0 = sadd.f32 2.7725887, %s6450_s10 }
0x1736   :  { %s4605_s7 = smul.f32 0.020408163, %s4604_s3 }
0x1737   :  { %s4626_s14 = sadd.f32 %s4621_s0, %s2566_s26 }
0x1738   :  { %s4606_s2 = smul.f32 0.00625, %s4605_s7 }
0x1739   :  { %v4633_v4 = vstv %s4626_s14 }
0x173a   :  { %s4625_s15 = sadd.f32 %s4606_s2, %s2551_s13  ;;  %v4634_v8 = vsel %vm4632_vm5, %v4633_v4, 0.0 }
0x173b   :  { %v4635_v29 = vadd.f32 %v4634_v8, %v4631_v5 }
0x173c   :  { %v4645_v45 = vstv %s4625_s15 }
0x173d   :  { %v4639_v37 = vadd.f32 %v4638_v36, %v4635_v29  ;;  %v4646_v12 = vsel %vm4644_vm8, %v4645_v45, 0.0 }
0x173f   :  { %v4643_v40 = vadd.f32 %v4642_v7, %v4639_v37 }
0x1741   :  { %v4647_v41 = vadd.f32 %v4646_v12, %v4643_v40 }
0x1743   :  { %4648 = vst [vmem:[#allocation2] sm:$0x1] %v4647_v41 }
0x1744   :  { %6524 = shalt.err (!%p6521_p4)
}
0x1745   :  { %4658 = dma.vmem_to_hbm [thread:$0]  %s4656_s16, 16, %s8201_s11, [#allocation3]  }
0x1746   :  { %6533 = dma.done.wait [#allocation3], 16  }
0x1747   :  { %6534 = vsyncadd [#allocation3], 4294967280 }
0x1748   :  { %4662 = vsyncpa [#allocation3], 1 }

</bundles_post_ra>
